<compile_context>
chip_gen: v6e
topology: v6e:2x2x1
jax: 0.10.0
libtpu: 0.0.40
codegen_flags: <defaults>
</compile_context>

<pallas_src>
import functools

import jax
import jax.numpy as jnp
from jax.experimental import pallas as pl
from jax.experimental.pallas import tpu as pltpu


# --------------------------- tiled matmul + bias ----------------------------

def _matmul_bias_kernel(a_ref, b_ref, bias_ref, o_ref, acc_ref):
    @pl.when(pl.program_id(2) == 0)
    def _init():
        acc_ref[...] = jnp.zeros(acc_ref.shape, acc_ref.dtype)

    acc_ref[...] += jnp.dot(a_ref[...], b_ref[...],
                            preferred_element_type=jnp.float32)

    @pl.when(pl.program_id(2) == pl.num_programs(2) - 1)
    def _fin():
        o_ref[...] = (acc_ref[...] + bias_ref[...]).astype(o_ref.dtype)


def _matmul_bias_res_kernel(a_ref, b_ref, bias_ref, r_ref, o_ref, acc_ref):
    @pl.when(pl.program_id(2) == 0)
    def _init():
        acc_ref[...] = jnp.zeros(acc_ref.shape, acc_ref.dtype)

    acc_ref[...] += jnp.dot(a_ref[...], b_ref[...],
                            preferred_element_type=jnp.float32)

    @pl.when(pl.program_id(2) == pl.num_programs(2) - 1)
    def _fin():
        o_ref[...] = (acc_ref[...] + bias_ref[...] + r_ref[...]).astype(o_ref.dtype)


def _pick_tile(dim, candidates, full_max):
    if dim <= full_max:
        return dim
    for t in candidates:
        if dim % t == 0:
            return t
    return dim


def matmul_bias(a, b, bias, residual=None):
    """(M, K) @ (K, N) + bias [+ residual] -> f32.  bf16 MXU inputs, f32 accumulate."""
    M, K = a.shape
    _, N = b.shape

    # M tile: pad M up instead of the old "tm = M" fallback.
    if M % 256 == 0:
        tm, Mp = 256, M
    elif M % 128 == 0:
        tm, Mp = 128, M
    else:
        tm = 128
        Mp = ((M + 127) // 128) * 128
    tk = _pick_tile(K, (512, 256, 128), 1024)
    tn = _pick_tile(N, (512, 256, 128), 512)

    a = a.astype(jnp.bfloat16)
    b = b.astype(jnp.bfloat16)
    bias = bias.reshape(1, N).astype(jnp.float32)
    if Mp != M:
        a = jnp.pad(a, ((0, Mp - M), (0, 0)))
        if residual is not None:
            residual = jnp.pad(residual, ((0, Mp - M), (0, 0)))

    grid = (Mp // tm, N // tn, K // tk)
    a_spec = pl.BlockSpec((tm, tk), lambda i, j, k: (i, k))
    b_spec = pl.BlockSpec((tk, tn), lambda i, j, k: (k, j))
    bias_spec = pl.BlockSpec((1, tn), lambda i, j, k: (0, j))
    o_spec = pl.BlockSpec((tm, tn), lambda i, j, k: (i, j))
    cp = pltpu.CompilerParams(
        dimension_semantics=("parallel", "parallel", "arbitrary"))
    scratch = [pltpu.VMEM((tm, tn), jnp.float32)]

    if residual is None:
        out = pl.pallas_call(
            _matmul_bias_kernel,
            out_shape=jax.ShapeDtypeStruct((Mp, N), jnp.float32),
            grid=grid,
            in_specs=[a_spec, b_spec, bias_spec],
            out_specs=o_spec,
            scratch_shapes=scratch,
            compiler_params=cp,
        )(a, b, bias)
    else:
        r_spec = pl.BlockSpec((tm, tn), lambda i, j, k: (i, j))
        out = pl.pallas_call(
            _matmul_bias_res_kernel,
            out_shape=jax.ShapeDtypeStruct((Mp, N), jnp.float32),
            grid=grid,
            in_specs=[a_spec, b_spec, bias_spec, r_spec],
            out_specs=o_spec,
            scratch_shapes=scratch,
            compiler_params=cp,
        )(a, b, bias, residual.astype(jnp.float32))
    return out[:M] if Mp != M else out


# ------------------------ direct 3x3 convolution ----------------------------
# No im2col: the padded image stays resident in VMEM per batch; the kernel
# accumulates the 9 taps as (Wo, C) @ (C, Cout) matmuls per output row.

def _make_conv3x3_kernel(stride, Wo, Cout):
    def kernel(*refs):
        plane_refs = refs[:stride]
        w_ref, b_ref, o_ref = refs[stride], refs[stride + 1], refs[stride + 2]
        y = pl.program_id(1)
        # 3 input rows (per column-parity plane) needed for this output row.
        wins = [p_ref[0, pl.ds(y * stride, 3)] for p_ref in plane_refs]
        acc = jnp.zeros((Wo, Cout), jnp.float32)
        for kh in range(3):
            for kw in range(3):
                plane, off = kw % stride, kw // stride
                xs = wins[plane][kh, off:off + Wo, :]
                acc = acc + jnp.dot(xs, w_ref[kh * 3 + kw],
                                    preferred_element_type=jnp.float32)
        o_ref[0, 0] = (acc + b_ref[...]).astype(o_ref.dtype)
    return kernel


def conv3x3(x_nhwc, w9, bias, stride=1):
    """3x3 conv, padding=1, stride in {1, 2}.  w9: (9, Cin, Cout)."""
    B, H, W, C = x_nhwc.shape
    Cout = w9.shape[-1]
    Ho = (H + 2 - 3) // stride + 1
    Wo = (W + 2 - 3) // stride + 1
    xp = jnp.pad(x_nhwc, ((0, 0), (1, 1), (1, 1), (0, 0))).astype(jnp.bfloat16)
    # Split padded columns by parity so every in-kernel tap slice is unit stride.
    planes = [xp[:, :, r::stride, :] for r in range(stride)]
    w9 = w9.astype(jnp.bfloat16)
    bias = bias.reshape(1, Cout).astype(jnp.float32)

    plane_specs = [
        pl.BlockSpec((1, H + 2, p.shape[2], C), lambda b, y: (b, 0, 0, 0))
        for p in planes
    ]
    in_specs = plane_specs + [
        pl.BlockSpec((9, C, Cout), lambda b, y: (0, 0, 0)),
        pl.BlockSpec((1, Cout), lambda b, y: (0, 0)),
    ]
    out_spec = pl.BlockSpec((1, 1, Wo, Cout), lambda b, y: (b, y, 0, 0))
    return pl.pallas_call(
        _make_conv3x3_kernel(stride, Wo, Cout),
        out_shape=jax.ShapeDtypeStruct((B, Ho, Wo, Cout), jnp.float32),
        grid=(B, Ho),
        in_specs=in_specs,
        out_specs=out_spec,
        compiler_params=pltpu.CompilerParams(
            dimension_semantics=("parallel", "arbitrary")),
    )(*planes, w9, bias)


# -------------------- GroupNorm (+ fused SiLU / residual) -------------------

def _make_gn_kernel(n_per_group, eps, silu, add_skip):
    def _norm(x, gm, gmt, gamma, beta):
        # Two-pass centered statistics per group (avoids E[x^2]-E[x]^2 cancellation).
        # Per-group reduction via a tiny (1,C)@(C,G) matmul -> no lane reshapes.
        col_sum = jnp.sum(x, axis=0, keepdims=True)                          # (1, C)
        g_mean = jnp.dot(col_sum, gm,
                         preferred_element_type=jnp.float32) / n_per_group   # (1, G)
        mean_c = jnp.dot(g_mean, gmt, preferred_element_type=jnp.float32)    # (1, C)
        xc = x - mean_c
        col_sq = jnp.sum(xc * xc, axis=0, keepdims=True)                     # (1, C)
        g_var = jnp.dot(col_sq, gm,
                        preferred_element_type=jnp.float32) / n_per_group    # (1, G)
        inv_c = jnp.dot(jax.lax.rsqrt(g_var + eps), gmt,
                        preferred_element_type=jnp.float32)                  # (1, C)
        y = xc * inv_c * gamma + beta
        if silu:
            y = y * jax.nn.sigmoid(y)
        return y

    if add_skip:
        def kernel(x_ref, gm_ref, gmt_ref, g_ref, b_ref, s_ref, o_ref):
            y = _norm(x_ref[0], gm_ref[...], gmt_ref[...], g_ref[...], b_ref[...])
            o_ref[0] = (y + s_ref[0]).astype(o_ref.dtype)
    else:
        def kernel(x_ref, gm_ref, gmt_ref, g_ref, b_ref, o_ref):
            y = _norm(x_ref[0], gm_ref[...], gmt_ref[...], g_ref[...], b_ref[...])
            o_ref[0] = y.astype(o_ref.dtype)
    return kernel


def group_norm(x_nhwc, gamma, beta, num_groups, eps=1e-5, silu=False, skip=None):
    B, H, W, C = x_nhwc.shape
    G = num_groups
    cpg = C // G
    HW = H * W

    x = x_nhwc.reshape(B, HW, C)                                   # no transpose
    gmat = jnp.repeat(jnp.eye(G, dtype=jnp.float32), cpg, axis=0)  # (C, G)
    gmat_t = gmat.T                                                # (G, C)
    gamma = gamma.reshape(1, C).astype(jnp.float32)
    beta = beta.reshape(1, C).astype(jnp.float32)

    x_spec = pl.BlockSpec((1, HW, C), lambda b: (b, 0, 0))
    in_specs = [x_spec,
                pl.BlockSpec((C, G), lambda b: (0, 0)),
                pl.BlockSpec((G, C), lambda b: (0, 0)),
                pl.BlockSpec((1, C), lambda b: (0, 0)),
                pl.BlockSpec((1, C), lambda b: (0, 0))]
    args = [x, gmat, gmat_t, gamma, beta]
    if skip is not None:
        in_specs.append(x_spec)
        args.append(skip.reshape(B, HW, C).astype(jnp.float32))

    out = pl.pallas_call(
        _make_gn_kernel(HW * cpg, eps, silu, skip is not None),
        out_shape=jax.ShapeDtypeStruct((B, HW, C), jnp.float32),
        grid=(B,),
        in_specs=in_specs,
        out_specs=x_spec,
        compiler_params=pltpu.CompilerParams(dimension_semantics=("parallel",)),
    )(*args)
    return out.reshape(B, H, W, C)


# ------------------- flash-style multi-head attention core -------------------

def _flash_attn_kernel(q_ref, k_ref, v_ref, o_ref, m_ref, l_ref, acc_ref, *, scale):
    kv = pl.program_id(3)

    @pl.when(kv == 0)
    def _init():
        m_ref[...] = jnp.full(m_ref.shape, -jnp.inf, m_ref.dtype)
        l_ref[...] = jnp.zeros(l_ref.shape, l_ref.dtype)
        acc_ref[...] = jnp.zeros(acc_ref.shape, acc_ref.dtype)

    q = q_ref[0, 0]                                    # (tq, dh) bf16
    k = k_ref[0, 0]                                    # (tk, dh) bf16
    v = v_ref[0, 0]                                    # (tk, dh) bf16
    s = jax.lax.dot_general(q, k, (((1,), (1,)), ((), ())),
                            preferred_element_type=jnp.float32) * scale   # (tq, tk)
    m_prev = m_ref[...]
    m_new = jnp.maximum(m_prev, jnp.max(s, axis=-1, keepdims=True))
    alpha = jnp.exp(m_prev - m_new)
    p = jnp.exp(s - m_new)
    l_ref[...] = alpha * l_ref[...] + jnp.sum(p, axis=-1, keepdims=True)
    acc_ref[...] = alpha * acc_ref[...] + jnp.dot(p.astype(v.dtype), v,
                                                  preferred_element_type=jnp.float32)
    m_ref[...] = m_new

    @pl.when(kv == pl.num_programs(3) - 1)
    def _fin():
        inv_l = pl.reciprocal(l_ref[...], approx=True)   # EUP slot, after P@V
        o_ref[0, 0] = (acc_ref[...] * inv_l).astype(o_ref.dtype)


def attention_core(q, k, v, scale):
    B, nh, HW, dh = q.shape
    tq = 256 if HW % 256 == 0 else (128 if HW % 128 == 0 else HW)
    tk = 128 if HW % 128 == 0 else HW
    grid = (B, nh, HW // tq, HW // tk)
    q_spec = pl.BlockSpec((1, 1, tq, dh), lambda b, h, qi, kv: (b, h, qi, 0))
    kv_spec = pl.BlockSpec((1, 1, tk, dh), lambda b, h, qi, kv: (b, h, kv, 0))
    o_spec = pl.BlockSpec((1, 1, tq, dh), lambda b, h, qi, kv: (b, h, qi, 0))
    return pl.pallas_call(
        functools.partial(_flash_attn_kernel, scale=scale),
        out_shape=jax.ShapeDtypeStruct((B, nh, HW, dh), jnp.float32),
        grid=grid,
        in_specs=[q_spec, kv_spec, kv_spec],
        out_specs=o_spec,
        scratch_shapes=[pltpu.VMEM((tq, 1), jnp.float32),
                        pltpu.VMEM((tq, 1), jnp.float32),
                        pltpu.VMEM((tq, dh), jnp.float32)],
        compiler_params=pltpu.CompilerParams(
            dimension_semantics=("parallel", "parallel", "parallel", "arbitrary")),
    )(q.astype(jnp.bfloat16), k.astype(jnp.bfloat16), v.astype(jnp.bfloat16))


# ------------------------------- block logic ---------------------------------

def res_block(x, p, num_groups):
    B, H, W, C = x.shape
    if p["skip_w"] is not None:
        skip = matmul_bias(x.reshape(B * H * W, C), p["skip_w"], p["skip_b"])
        skip = skip.reshape(B, H, W, -1)
    else:
        skip = x                                      # nn.Identity
    h = conv3x3(x, p["w1"], p["b1"], stride=1)
    h = group_norm(h, p["g1"], p["be1"], num_groups, silu=True)
    h = conv3x3(h, p["w2"], p["b2"], stride=1)
    # nn.Dropout(0.1) is identity in eval mode; residual add fused into the GN kernel.
    h = group_norm(h, p["g2"], p["be2"], num_groups, silu=False, skip=skip)
    return h


def attention_block(x, p, num_groups, num_heads):
    B, H, W, C = x.shape
    HW = H * W
    dh = C // num_heads
    skip2d = x.reshape(B * HW, C)
    h = group_norm(x, p["gn_g"], p["gn_b"], num_groups)
    qkv = matmul_bias(h.reshape(B * HW, C), p["wqkv"], p["bqkv"])        # (B*HW, 3C)
    # one head-major layout change in; heads are then plain lane-dense blocks
    qkv = qkv.reshape(B, HW, 3, num_heads, dh).transpose(2, 0, 3, 1, 4)  # (3,B,nh,HW,dh)
    o = attention_core(qkv[0], qkv[1], qkv[2], scale=1.0 / (dh ** 0.5))  # (B,nh,HW,dh)
    o2d = o.transpose(0, 2, 1, 3).reshape(B * HW, C)
    out = matmul_bias(o2d, p["wo"], p["bo"], residual=skip2d)            # out_proj + skip
    return out.reshape(B, H, W, C)


def down_block_forward(x_nchw, params):
    x = jnp.transpose(x_nchw, (0, 2, 3, 1)).astype(jnp.float32)          # NCHW -> NHWC
    cfg = params["cfg"]
    G = cfg["num_groups"]
    for i in range(cfg["num_layers"]):
        x = res_block(x, params["res"][i], G)
        if cfg["attention"]:
            x = attention_block(x, params["attn"][i], G, cfg["num_heads"])
    res_out = x
    x = conv3x3(x, params["down_w"], params["down_b"], stride=2)
    return (jnp.transpose(x, (0, 3, 1, 2)),                              # NHWC -> NCHW
            jnp.transpose(res_out, (0, 3, 1, 2)))


# ------------------------------- param init ----------------------------------

def _dense(key, shape, scale=0.1):
    return jax.random.normal(key, shape, jnp.float32) * scale


def init_down_block(key, in_ch, out_ch, num_layers=2, attention=False, num_heads=8):
    num_groups = min(32, out_ch // 4)
    keys = iter(jax.random.split(key, 64))
    res = []
    for i in range(num_layers):
        cin = in_ch if i == 0 else out_ch
        res.append(dict(
            w1=_dense(next(keys), (9, cin, out_ch)),
            b1=_dense(next(keys), (out_ch,)),
            g1=jnp.ones((out_ch,), jnp.float32),
            be1=jnp.zeros((out_ch,), jnp.float32),
            w2=_dense(next(keys), (9, out_ch, out_ch)),
            b2=_dense(next(keys), (out_ch,)),
            g2=jnp.ones((out_ch,), jnp.float32),
            be2=jnp.zeros((out_ch,), jnp.float32),
            skip_w=_dense(next(keys), (cin, out_ch)) if cin != out_ch else None,
            skip_b=_dense(next(keys), (out_ch,)) if cin != out_ch else None,
        ))
    attn = []
    if attention:
        for _ in range(num_layers):
            attn.append(dict(
                gn_g=jnp.ones((out_ch,), jnp.float32),
                gn_b=jnp.zeros((out_ch,), jnp.float32),
                wqkv=_dense(next(keys), (out_ch, 3 * out_ch)),
                bqkv=_dense(next(keys), (3 * out_ch,)),
                wo=_dense(next(keys), (out_ch, out_ch)),
                bo=_dense(next(keys), (out_ch,)),
            ))
    return dict(
        cfg=dict(num_layers=num_layers, attention=attention,
                 num_groups=num_groups, num_heads=num_heads),
        res=res, attn=attn,
        down_w=_dense(next(keys), (9, out_ch, out_ch)),
        down_b=_dense(next(keys), (out_ch,)),
    )


# ---------------------------------- main --------------------------------------

if __name__ == "__main__":
    key = jax.random.PRNGKey(0)
    x = jax.random.normal(key, (2, 4, 16, 16), jnp.float32)   # NCHW like PyTorch

    # Default config (attention=False), in_channels=4 -> out_channels=16.
    p0 = init_down_block(jax.random.PRNGKey(42), 4, 16, num_layers=2,
                         attention=False)
    fwd0 = jax.jit(functools.partial(down_block_forward, params=p0))
    down0, res0 = fwd0(x)
    jax.block_until_ready((down0, res0))
    assert down0.shape == (2, 16, 8, 8) and res0.shape == (2, 16, 16, 16)

    # attention=True config exercises the GroupNorm + flash-attention kernels too.
    p1 = init_down_block(jax.random.PRNGKey(43), 4, 16, num_layers=2,
                         attention=True)
    fwd1 = jax.jit(functools.partial(down_block_forward, params=p1))
    down1, res1 = fwd1(x)
    jax.block_until_ready((down1, res1))
    assert down1.shape == (2, 16, 8, 8) and res1.shape == (2, 16, 16, 16)

    print("KERNEL_OK")
</pallas_src>

<mosaic_0001>
module attributes {stable_mosaic.version = 11 : i64} {
  func.func @kernel(%arg0: i32, %arg1: i32, %arg2: memref<1x18x18x4xbf16, #tpu.memory_space<vmem>>, %arg3: memref<9x4x16xbf16, #tpu.memory_space<vmem>>, %arg4: memref<1x16xf32, #tpu.memory_space<vmem>>, %arg5: memref<1x1x16x16xf32, #tpu.memory_space<vmem>>) attributes {dimension_semantics = [#tpu.dimension_semantics<parallel>, #tpu.dimension_semantics<arbitrary>], iteration_bounds = array<i64: 2, 16>, scalar_prefetch = 0 : i64, scratch_operands = 0 : i64, tpu.core_type = #tpu.core_type<tc>, window_params = [{transform_indices = @transform_0, window_bounds = array<i64: 1, 18, 18, 4>}, {pipeline_mode = #tpu.pipeline_mode<synchronous>, transform_indices = @transform_1, window_bounds = array<i64: 9, 4, 16>}, {pipeline_mode = #tpu.pipeline_mode<synchronous>, transform_indices = @transform_2, window_bounds = array<i64: 1, 16>}, {transform_indices = @transform_3, window_bounds = array<i64: 1, 1, 16, 16>}]} {
    %c1_i32 = arith.constant 1 : i32
    %0 = arith.muli %arg1, %c1_i32 : i32
    %c0 = arith.constant 0 : index
    %1 = arith.index_cast %0 : i32 to index
    %c0_0 = arith.constant 0 : index
    %c0_1 = arith.constant 0 : index
    %2 = vector.load %arg2[%c0, %1, %c0_0, %c0_1] : memref<1x18x18x4xbf16, #tpu.memory_space<vmem>>, vector<1x3x18x4xbf16>
    %3 = vector.shape_cast %2 : vector<1x3x18x4xbf16> to vector<3x18x4xbf16>
    %cst = arith.constant 0.000000e+00 : f32
    %4 = vector.broadcast %cst : f32 to vector<16x16xf32>
    %5 = vector.extract_strided_slice %3 {offsets = [0, 0, 0], sizes = [1, 16, 4], strides = [1, 1, 1]} : vector<3x18x4xbf16> to vector<1x16x4xbf16>
    %6 = vector.shape_cast %5 : vector<1x16x4xbf16> to vector<16x4xbf16>
    %c0_2 = arith.constant 0 : index
    %c0_3 = arith.constant 0 : index
    %c0_4 = arith.constant 0 : index
    %7 = vector.load %arg3[%c0_2, %c0_3, %c0_4] : memref<9x4x16xbf16, #tpu.memory_space<vmem>>, vector<1x4x16xbf16>
    %8 = vector.shape_cast %7 : vector<1x4x16xbf16> to vector<4x16xbf16>
    %cst_5 = arith.constant dense<0.000000e+00> : vector<16x16xf32>
    %9 = tpu.matmul %6, %8, %cst_5 {dimension_numbers = #tpu.dot_dimension_numbers<[1], [0], [0], [1], [0, 0, 1, 1], [], []>} : vector<16x4xbf16>, vector<4x16xbf16>, vector<16x16xf32> -> vector<16x16xf32>
    %10 = arith.addf %4, %9 : vector<16x16xf32>
    %11 = vector.extract_strided_slice %3 {offsets = [0, 1, 0], sizes = [1, 16, 4], strides = [1, 1, 1]} : vector<3x18x4xbf16> to vector<1x16x4xbf16>
    %12 = vector.shape_cast %11 : vector<1x16x4xbf16> to vector<16x4xbf16>
    %c1 = arith.constant 1 : index
    %c0_6 = arith.constant 0 : index
    %c0_7 = arith.constant 0 : index
    %13 = vector.load %arg3[%c1, %c0_6, %c0_7] : memref<9x4x16xbf16, #tpu.memory_space<vmem>>, vector<1x4x16xbf16>
    %14 = vector.shape_cast %13 : vector<1x4x16xbf16> to vector<4x16xbf16>
    %cst_8 = arith.constant dense<0.000000e+00> : vector<16x16xf32>
    %15 = tpu.matmul %12, %14, %cst_8 {dimension_numbers = #tpu.dot_dimension_numbers<[1], [0], [0], [1], [0, 0, 1, 1], [], []>} : vector<16x4xbf16>, vector<4x16xbf16>, vector<16x16xf32> -> vector<16x16xf32>
    %16 = arith.addf %10, %15 : vector<16x16xf32>
    %17 = vector.extract_strided_slice %3 {offsets = [0, 2, 0], sizes = [1, 16, 4], strides = [1, 1, 1]} : vector<3x18x4xbf16> to vector<1x16x4xbf16>
    %18 = vector.shape_cast %17 : vector<1x16x4xbf16> to vector<16x4xbf16>
    %c2 = arith.constant 2 : index
    %c0_9 = arith.constant 0 : index
    %c0_10 = arith.constant 0 : index
    %19 = vector.load %arg3[%c2, %c0_9, %c0_10] : memref<9x4x16xbf16, #tpu.memory_space<vmem>>, vector<1x4x16xbf16>
    %20 = vector.shape_cast %19 : vector<1x4x16xbf16> to vector<4x16xbf16>
    %cst_11 = arith.constant dense<0.000000e+00> : vector<16x16xf32>
    %21 = tpu.matmul %18, %20, %cst_11 {dimension_numbers = #tpu.dot_dimension_numbers<[1], [0], [0], [1], [0, 0, 1, 1], [], []>} : vector<16x4xbf16>, vector<4x16xbf16>, vector<16x16xf32> -> vector<16x16xf32>
    %22 = arith.addf %16, %21 : vector<16x16xf32>
    %23 = vector.extract_strided_slice %3 {offsets = [1, 0, 0], sizes = [1, 16, 4], strides = [1, 1, 1]} : vector<3x18x4xbf16> to vector<1x16x4xbf16>
    %24 = vector.shape_cast %23 : vector<1x16x4xbf16> to vector<16x4xbf16>
    %c3 = arith.constant 3 : index
    %c0_12 = arith.constant 0 : index
    %c0_13 = arith.constant 0 : index
    %25 = vector.load %arg3[%c3, %c0_12, %c0_13] : memref<9x4x16xbf16, #tpu.memory_space<vmem>>, vector<1x4x16xbf16>
    %26 = vector.shape_cast %25 : vector<1x4x16xbf16> to vector<4x16xbf16>
    %cst_14 = arith.constant dense<0.000000e+00> : vector<16x16xf32>
    %27 = tpu.matmul %24, %26, %cst_14 {dimension_numbers = #tpu.dot_dimension_numbers<[1], [0], [0], [1], [0, 0, 1, 1], [], []>} : vector<16x4xbf16>, vector<4x16xbf16>, vector<16x16xf32> -> vector<16x16xf32>
    %28 = arith.addf %22, %27 : vector<16x16xf32>
    %29 = vector.extract_strided_slice %3 {offsets = [1, 1, 0], sizes = [1, 16, 4], strides = [1, 1, 1]} : vector<3x18x4xbf16> to vector<1x16x4xbf16>
    %30 = vector.shape_cast %29 : vector<1x16x4xbf16> to vector<16x4xbf16>
    %c4 = arith.constant 4 : index
    %c0_15 = arith.constant 0 : index
    %c0_16 = arith.constant 0 : index
    %31 = vector.load %arg3[%c4, %c0_15, %c0_16] : memref<9x4x16xbf16, #tpu.memory_space<vmem>>, vector<1x4x16xbf16>
    %32 = vector.shape_cast %31 : vector<1x4x16xbf16> to vector<4x16xbf16>
    %cst_17 = arith.constant dense<0.000000e+00> : vector<16x16xf32>
    %33 = tpu.matmul %30, %32, %cst_17 {dimension_numbers = #tpu.dot_dimension_numbers<[1], [0], [0], [1], [0, 0, 1, 1], [], []>} : vector<16x4xbf16>, vector<4x16xbf16>, vector<16x16xf32> -> vector<16x16xf32>
    %34 = arith.addf %28, %33 : vector<16x16xf32>
    %35 = vector.extract_strided_slice %3 {offsets = [1, 2, 0], sizes = [1, 16, 4], strides = [1, 1, 1]} : vector<3x18x4xbf16> to vector<1x16x4xbf16>
    %36 = vector.shape_cast %35 : vector<1x16x4xbf16> to vector<16x4xbf16>
    %c5 = arith.constant 5 : index
    %c0_18 = arith.constant 0 : index
    %c0_19 = arith.constant 0 : index
    %37 = vector.load %arg3[%c5, %c0_18, %c0_19] : memref<9x4x16xbf16, #tpu.memory_space<vmem>>, vector<1x4x16xbf16>
    %38 = vector.shape_cast %37 : vector<1x4x16xbf16> to vector<4x16xbf16>
    %cst_20 = arith.constant dense<0.000000e+00> : vector<16x16xf32>
    %39 = tpu.matmul %36, %38, %cst_20 {dimension_numbers = #tpu.dot_dimension_numbers<[1], [0], [0], [1], [0, 0, 1, 1], [], []>} : vector<16x4xbf16>, vector<4x16xbf16>, vector<16x16xf32> -> vector<16x16xf32>
    %40 = arith.addf %34, %39 : vector<16x16xf32>
    %41 = vector.extract_strided_slice %3 {offsets = [2, 0, 0], sizes = [1, 16, 4], strides = [1, 1, 1]} : vector<3x18x4xbf16> to vector<1x16x4xbf16>
    %42 = vector.shape_cast %41 : vector<1x16x4xbf16> to vector<16x4xbf16>
    %c6 = arith.constant 6 : index
    %c0_21 = arith.constant 0 : index
    %c0_22 = arith.constant 0 : index
    %43 = vector.load %arg3[%c6, %c0_21, %c0_22] : memref<9x4x16xbf16, #tpu.memory_space<vmem>>, vector<1x4x16xbf16>
    %44 = vector.shape_cast %43 : vector<1x4x16xbf16> to vector<4x16xbf16>
    %cst_23 = arith.constant dense<0.000000e+00> : vector<16x16xf32>
    %45 = tpu.matmul %42, %44, %cst_23 {dimension_numbers = #tpu.dot_dimension_numbers<[1], [0], [0], [1], [0, 0, 1, 1], [], []>} : vector<16x4xbf16>, vector<4x16xbf16>, vector<16x16xf32> -> vector<16x16xf32>
    %46 = arith.addf %40, %45 : vector<16x16xf32>
    %47 = vector.extract_strided_slice %3 {offsets = [2, 1, 0], sizes = [1, 16, 4], strides = [1, 1, 1]} : vector<3x18x4xbf16> to vector<1x16x4xbf16>
    %48 = vector.shape_cast %47 : vector<1x16x4xbf16> to vector<16x4xbf16>
    %c7 = arith.constant 7 : index
    %c0_24 = arith.constant 0 : index
    %c0_25 = arith.constant 0 : index
    %49 = vector.load %arg3[%c7, %c0_24, %c0_25] : memref<9x4x16xbf16, #tpu.memory_space<vmem>>, vector<1x4x16xbf16>
    %50 = vector.shape_cast %49 : vector<1x4x16xbf16> to vector<4x16xbf16>
    %cst_26 = arith.constant dense<0.000000e+00> : vector<16x16xf32>
    %51 = tpu.matmul %48, %50, %cst_26 {dimension_numbers = #tpu.dot_dimension_numbers<[1], [0], [0], [1], [0, 0, 1, 1], [], []>} : vector<16x4xbf16>, vector<4x16xbf16>, vector<16x16xf32> -> vector<16x16xf32>
    %52 = arith.addf %46, %51 : vector<16x16xf32>
    %53 = vector.extract_strided_slice %3 {offsets = [2, 2, 0], sizes = [1, 16, 4], strides = [1, 1, 1]} : vector<3x18x4xbf16> to vector<1x16x4xbf16>
    %54 = vector.shape_cast %53 : vector<1x16x4xbf16> to vector<16x4xbf16>
    %c8 = arith.constant 8 : index
    %c0_27 = arith.constant 0 : index
    %c0_28 = arith.constant 0 : index
    %55 = vector.load %arg3[%c8, %c0_27, %c0_28] : memref<9x4x16xbf16, #tpu.memory_space<vmem>>, vector<1x4x16xbf16>
    %56 = vector.shape_cast %55 : vector<1x4x16xbf16> to vector<4x16xbf16>
    %cst_29 = arith.constant dense<0.000000e+00> : vector<16x16xf32>
    %57 = tpu.matmul %54, %56, %cst_29 {dimension_numbers = #tpu.dot_dimension_numbers<[1], [0], [0], [1], [0, 0, 1, 1], [], []>} : vector<16x4xbf16>, vector<4x16xbf16>, vector<16x16xf32> -> vector<16x16xf32>
    %58 = arith.addf %52, %57 : vector<16x16xf32>
    %c0_30 = arith.constant 0 : index
    %c0_31 = arith.constant 0 : index
    %59 = vector.load %arg4[%c0_30, %c0_31] : memref<1x16xf32, #tpu.memory_space<vmem>>, vector<1x16xf32>
    %60 = vector.broadcast %59 : vector<1x16xf32> to vector<16x16xf32>
    %61 = arith.addf %58, %60 : vector<16x16xf32>
    %c0_32 = arith.constant 0 : index
    %c0_33 = arith.constant 0 : index
    %c0_34 = arith.constant 0 : index
    %c0_35 = arith.constant 0 : index
    %62 = vector.load %arg5[%c0_32, %c0_33, %c0_34, %c0_35] : memref<1x1x16x16xf32, #tpu.memory_space<vmem>>, vector<1x1x16x16xf32>
    %63 = vector.shape_cast %62 : vector<1x1x16x16xf32> to vector<16x16xf32>
    %64 = vector.shape_cast %61 : vector<16x16xf32> to vector<1x1x16x16xf32>
    tpu.vector_store %arg5[%c0_32, %c0_33, %c0_34, %c0_35], %64 {strides = array<i32>} : memref<1x1x16x16xf32, #tpu.memory_space<vmem>>, vector<1x1x16x16xf32>,
    return
  }
  func.func @transform_0(%arg0: i32, %arg1: i32) -> (i32, i32, i32, i32) {
    %c0_i32 = arith.constant 0 : i32
    %c0_i32_0 = arith.constant 0 : i32
    %c0_i32_1 = arith.constant 0 : i32
    %c0_i32_2 = arith.constant 0 : i32
    return %arg0, %c0_i32, %c0_i32_0, %c0_i32_1 : i32, i32, i32, i32
  }
  func.func @transform_1(%arg0: i32, %arg1: i32) -> (i32, i32, i32) {
    %c0_i32 = arith.constant 0 : i32
    %c0_i32_0 = arith.constant 0 : i32
    %c0_i32_1 = arith.constant 0 : i32
    %c0_i32_2 = arith.constant 0 : i32
    return %c0_i32, %c0_i32_0, %c0_i32_1 : i32, i32, i32
  }
  func.func @transform_2(%arg0: i32, %arg1: i32) -> (i32, i32) {
    %c0_i32 = arith.constant 0 : i32
    %c0_i32_0 = arith.constant 0 : i32
    %c0_i32_1 = arith.constant 0 : i32
    return %c0_i32, %c0_i32_0 : i32, i32
  }
  func.func @transform_3(%arg0: i32, %arg1: i32) -> (i32, i32, i32, i32) {
    %c0_i32 = arith.constant 0 : i32
    %c0_i32_0 = arith.constant 0 : i32
    %c0_i32_1 = arith.constant 0 : i32
    return %arg0, %arg1, %c0_i32, %c0_i32_0 : i32, i32, i32, i32
  }
}

module attributes {stable_mosaic.version = 11 : i64} {
  func.func @kernel(%arg0: i32, %arg1: memref<1x256x16xf32, #tpu.memory_space<vmem>>, %arg2: memref<16x4xf32, #tpu.memory_space<vmem>>, %arg3: memref<4x16xf32, #tpu.memory_space<vmem>>, %arg4: memref<1x16xf32, #tpu.memory_space<vmem>>, %arg5: memref<1x16xf32, #tpu.memory_space<vmem>>, %arg6: memref<1x256x16xf32, #tpu.memory_space<vmem>>) attributes {dimension_semantics = [#tpu.dimension_semantics<parallel>], iteration_bounds = array<i64: 2>, scalar_prefetch = 0 : i64, scratch_operands = 0 : i64, tpu.core_type = #tpu.core_type<tc>, window_params = [{transform_indices = @transform_0, window_bounds = array<i64: 1, 256, 16>}, {pipeline_mode = #tpu.pipeline_mode<synchronous>, transform_indices = @transform_1, window_bounds = array<i64: 16, 4>}, {pipeline_mode = #tpu.pipeline_mode<synchronous>, transform_indices = @transform_2, window_bounds = array<i64: 4, 16>}, {pipeline_mode = #tpu.pipeline_mode<synchronous>, transform_indices = @transform_3, window_bounds = array<i64: 1, 16>}, {pipeline_mode = #tpu.pipeline_mode<synchronous>, transform_indices = @transform_4, window_bounds = array<i64: 1, 16>}, {transform_indices = @transform_5, window_bounds = array<i64: 1, 256, 16>}]} {
    %c0 = arith.constant 0 : index
    %c0_0 = arith.constant 0 : index
    %c0_1 = arith.constant 0 : index
    %0 = vector.load %arg1[%c0, %c0_0, %c0_1] : memref<1x256x16xf32, #tpu.memory_space<vmem>>, vector<1x256x16xf32>
    %1 = vector.shape_cast %0 : vector<1x256x16xf32> to vector<256x16xf32>
    %c0_2 = arith.constant 0 : index
    %c0_3 = arith.constant 0 : index
    %2 = vector.load %arg2[%c0_2, %c0_3] : memref<16x4xf32, #tpu.memory_space<vmem>>, vector<16x4xf32>
    %c0_4 = arith.constant 0 : index
    %c0_5 = arith.constant 0 : index
    %3 = vector.load %arg3[%c0_4, %c0_5] : memref<4x16xf32, #tpu.memory_space<vmem>>, vector<4x16xf32>
    %c0_6 = arith.constant 0 : index
    %c0_7 = arith.constant 0 : index
    %4 = vector.load %arg4[%c0_6, %c0_7] : memref<1x16xf32, #tpu.memory_space<vmem>>, vector<1x16xf32>
    %c0_8 = arith.constant 0 : index
    %c0_9 = arith.constant 0 : index
    %5 = vector.load %arg5[%c0_8, %c0_9] : memref<1x16xf32, #tpu.memory_space<vmem>>, vector<1x16xf32>
    %cst = arith.constant dense<0.000000e+00> : vector<16xf32>
    %6 = vector.multi_reduction <add>, %1, %cst [0] : vector<256x16xf32> to vector<16xf32>
    %7 = vector.shape_cast %6 : vector<16xf32> to vector<1x16xf32>
    %cst_10 = arith.constant dense<0.000000e+00> : vector<1x4xf32>
    %8 = tpu.matmul %7, %2, %cst_10 {dimension_numbers = #tpu.dot_dimension_numbers<[1], [0], [0], [1], [0, 0, 1, 1], [], []>} : vector<1x16xf32>, vector<16x4xf32>, vector<1x4xf32> -> vector<1x4xf32>
    %cst_11 = arith.constant 1.024000e+03 : f32
    %9 = vector.broadcast %cst_11 : f32 to vector<1x4xf32>
    %10 = arith.divf %8, %9 : vector<1x4xf32>
    %cst_12 = arith.constant dense<0.000000e+00> : vector<1x16xf32>
    %11 = tpu.matmul %10, %3, %cst_12 {dimension_numbers = #tpu.dot_dimension_numbers<[1], [0], [0], [1], [0, 0, 1, 1], [], []>} : vector<1x4xf32>, vector<4x16xf32>, vector<1x16xf32> -> vector<1x16xf32>
    %12 = vector.broadcast %11 : vector<1x16xf32> to vector<256x16xf32>
    %13 = arith.subf %1, %12 : vector<256x16xf32>
    %14 = arith.mulf %13, %13 : vector<256x16xf32>
    %cst_13 = arith.constant dense<0.000000e+00> : vector<16xf32>
    %15 = vector.multi_reduction <add>, %14, %cst_13 [0] : vector<256x16xf32> to vector<16xf32>
    %16 = vector.shape_cast %15 : vector<16xf32> to vector<1x16xf32>
    %cst_14 = arith.constant dense<0.000000e+00> : vector<1x4xf32>
    %17 = tpu.matmul %16, %2, %cst_14 {dimension_numbers = #tpu.dot_dimension_numbers<[1], [0], [0], [1], [0, 0, 1, 1], [], []>} : vector<1x16xf32>, vector<16x4xf32>, vector<1x4xf32> -> vector<1x4xf32>
    %cst_15 = arith.constant 1.024000e+03 : f32
    %18 = vector.broadcast %cst_15 : f32 to vector<1x4xf32>
    %19 = arith.divf %17, %18 : vector<1x4xf32>
    %cst_16 = arith.constant 9.99999974E-6 : f32
    %20 = vector.broadcast %cst_16 : f32 to vector<1x4xf32>
    %21 = arith.addf %19, %20 : vector<1x4xf32>
    %22 = math.rsqrt %21 : vector<1x4xf32>
    %cst_17 = arith.constant dense<0.000000e+00> : vector<1x16xf32>
    %23 = tpu.matmul %22, %3, %cst_17 {dimension_numbers = #tpu.dot_dimension_numbers<[1], [0], [0], [1], [0, 0, 1, 1], [], []>} : vector<1x4xf32>, vector<4x16xf32>, vector<1x16xf32> -> vector<1x16xf32>
    %24 = vector.broadcast %23 : vector<1x16xf32> to vector<256x16xf32>
    %25 = arith.mulf %13, %24 : vector<256x16xf32>
    %26 = vector.broadcast %4 : vector<1x16xf32> to vector<256x16xf32>
    %27 = arith.mulf %25, %26 : vector<256x16xf32>
    %28 = vector.broadcast %5 : vector<1x16xf32> to vector<256x16xf32>
    %29 = arith.addf %27, %28 : vector<256x16xf32>
    %30 = arith.negf %29 : vector<256x16xf32>
    %31 = math.exp %30 : vector<256x16xf32>
    %cst_18 = arith.constant 1.000000e+00 : f32
    %32 = vector.broadcast %cst_18 : f32 to vector<256x16xf32>
    %33 = arith.addf %32, %31 : vector<256x16xf32>
    %34 = arith.divf %32, %33 : vector<256x16xf32>
    %35 = arith.mulf %29, %34 : vector<256x16xf32>
    %c0_19 = arith.constant 0 : index
    %c0_20 = arith.constant 0 : index
    %c0_21 = arith.constant 0 : index
    %36 = vector.load %arg6[%c0_19, %c0_20, %c0_21] : memref<1x256x16xf32, #tpu.memory_space<vmem>>, vector<1x256x16xf32>
    %37 = vector.shape_cast %36 : vector<1x256x16xf32> to vector<256x16xf32>
    %38 = vector.shape_cast %35 : vector<256x16xf32> to vector<1x256x16xf32>
    tpu.vector_store %arg6[%c0_19, %c0_20, %c0_21], %38 {strides = array<i32>} : memref<1x256x16xf32, #tpu.memory_space<vmem>>, vector<1x256x16xf32>,
    return
  }
  func.func @transform_0(%arg0: i32) -> (i32, i32, i32) {
    %c0_i32 = arith.constant 0 : i32
    %c0_i32_0 = arith.constant 0 : i32
    %c0_i32_1 = arith.constant 0 : i32
    return %arg0, %c0_i32, %c0_i32_0 : i32, i32, i32
  }
  func.func @transform_1(%arg0: i32) -> (i32, i32) {
    %c0_i32 = arith.constant 0 : i32
    %c0_i32_0 = arith.constant 0 : i32
    %c0_i32_1 = arith.constant 0 : i32
    return %c0_i32, %c0_i32_0 : i32, i32
  }
  func.func @transform_2(%arg0: i32) -> (i32, i32) {
    %c0_i32 = arith.constant 0 : i32
    %c0_i32_0 = arith.constant 0 : i32
    %c0_i32_1 = arith.constant 0 : i32
    return %c0_i32, %c0_i32_0 : i32, i32
  }
  func.func @transform_3(%arg0: i32) -> (i32, i32) {
    %c0_i32 = arith.constant 0 : i32
    %c0_i32_0 = arith.constant 0 : i32
    %c0_i32_1 = arith.constant 0 : i32
    return %c0_i32, %c0_i32_0 : i32, i32
  }
  func.func @transform_4(%arg0: i32) -> (i32, i32) {
    %c0_i32 = arith.constant 0 : i32
    %c0_i32_0 = arith.constant 0 : i32
    %c0_i32_1 = arith.constant 0 : i32
    return %c0_i32, %c0_i32_0 : i32, i32
  }
  func.func @transform_5(%arg0: i32) -> (i32, i32, i32) {
    %c0_i32 = arith.constant 0 : i32
    %c0_i32_0 = arith.constant 0 : i32
    %c0_i32_1 = arith.constant 0 : i32
    return %arg0, %c0_i32, %c0_i32_0 : i32, i32, i32
  }
}

module attributes {stable_mosaic.version = 11 : i64} {
  func.func @kernel(%arg0: i32, %arg1: i32, %arg2: memref<1x18x18x16xbf16, #tpu.memory_space<vmem>>, %arg3: memref<9x16x16xbf16, #tpu.memory_space<vmem>>, %arg4: memref<1x16xf32, #tpu.memory_space<vmem>>, %arg5: memref<1x1x16x16xf32, #tpu.memory_space<vmem>>) attributes {dimension_semantics = [#tpu.dimension_semantics<parallel>, #tpu.dimension_semantics<arbitrary>], iteration_bounds = array<i64: 2, 16>, scalar_prefetch = 0 : i64, scratch_operands = 0 : i64, tpu.core_type = #tpu.core_type<tc>, window_params = [{transform_indices = @transform_0, window_bounds = array<i64: 1, 18, 18, 16>}, {pipeline_mode = #tpu.pipeline_mode<synchronous>, transform_indices = @transform_1, window_bounds = array<i64: 9, 16, 16>}, {pipeline_mode = #tpu.pipeline_mode<synchronous>, transform_indices = @transform_2, window_bounds = array<i64: 1, 16>}, {transform_indices = @transform_3, window_bounds = array<i64: 1, 1, 16, 16>}]} {
    %c1_i32 = arith.constant 1 : i32
    %0 = arith.muli %arg1, %c1_i32 : i32
    %c0 = arith.constant 0 : index
    %1 = arith.index_cast %0 : i32 to index
    %c0_0 = arith.constant 0 : index
    %c0_1 = arith.constant 0 : index
    %2 = vector.load %arg2[%c0, %1, %c0_0, %c0_1] : memref<1x18x18x16xbf16, #tpu.memory_space<vmem>>, vector<1x3x18x16xbf16>
    %3 = vector.shape_cast %2 : vector<1x3x18x16xbf16> to vector<3x18x16xbf16>
    %cst = arith.constant 0.000000e+00 : f32
    %4 = vector.broadcast %cst : f32 to vector<16x16xf32>
    %5 = vector.extract_strided_slice %3 {offsets = [0, 0, 0], sizes = [1, 16, 16], strides = [1, 1, 1]} : vector<3x18x16xbf16> to vector<1x16x16xbf16>
    %6 = vector.shape_cast %5 : vector<1x16x16xbf16> to vector<16x16xbf16>
    %c0_2 = arith.constant 0 : index
    %c0_3 = arith.constant 0 : index
    %c0_4 = arith.constant 0 : index
    %7 = vector.load %arg3[%c0_2, %c0_3, %c0_4] : memref<9x16x16xbf16, #tpu.memory_space<vmem>>, vector<1x16x16xbf16>
    %8 = vector.shape_cast %7 : vector<1x16x16xbf16> to vector<16x16xbf16>
    %cst_5 = arith.constant dense<0.000000e+00> : vector<16x16xf32>
    %9 = tpu.matmul %6, %8, %cst_5 {dimension_numbers = #tpu.dot_dimension_numbers<[1], [0], [0], [1], [0, 0, 1, 1], [], []>} : vector<16x16xbf16>, vector<16x16xbf16>, vector<16x16xf32> -> vector<16x16xf32>
    %10 = arith.addf %4, %9 : vector<16x16xf32>
    %11 = vector.extract_strided_slice %3 {offsets = [0, 1, 0], sizes = [1, 16, 16], strides = [1, 1, 1]} : vector<3x18x16xbf16> to vector<1x16x16xbf16>
    %12 = vector.shape_cast %11 : vector<1x16x16xbf16> to vector<16x16xbf16>
    %c1 = arith.constant 1 : index
    %c0_6 = arith.constant 0 : index
    %c0_7 = arith.constant 0 : index
    %13 = vector.load %arg3[%c1, %c0_6, %c0_7] : memref<9x16x16xbf16, #tpu.memory_space<vmem>>, vector<1x16x16xbf16>
    %14 = vector.shape_cast %13 : vector<1x16x16xbf16> to vector<16x16xbf16>
    %cst_8 = arith.constant dense<0.000000e+00> : vector<16x16xf32>
    %15 = tpu.matmul %12, %14, %cst_8 {dimension_numbers = #tpu.dot_dimension_numbers<[1], [0], [0], [1], [0, 0, 1, 1], [], []>} : vector<16x16xbf16>, vector<16x16xbf16>, vector<16x16xf32> -> vector<16x16xf32>
    %16 = arith.addf %10, %15 : vector<16x16xf32>
    %17 = vector.extract_strided_slice %3 {offsets = [0, 2, 0], sizes = [1, 16, 16], strides = [1, 1, 1]} : vector<3x18x16xbf16> to vector<1x16x16xbf16>
    %18 = vector.shape_cast %17 : vector<1x16x16xbf16> to vector<16x16xbf16>
    %c2 = arith.constant 2 : index
    %c0_9 = arith.constant 0 : index
    %c0_10 = arith.constant 0 : index
    %19 = vector.load %arg3[%c2, %c0_9, %c0_10] : memref<9x16x16xbf16, #tpu.memory_space<vmem>>, vector<1x16x16xbf16>
    %20 = vector.shape_cast %19 : vector<1x16x16xbf16> to vector<16x16xbf16>
    %cst_11 = arith.constant dense<0.000000e+00> : vector<16x16xf32>
    %21 = tpu.matmul %18, %20, %cst_11 {dimension_numbers = #tpu.dot_dimension_numbers<[1], [0], [0], [1], [0, 0, 1, 1], [], []>} : vector<16x16xbf16>, vector<16x16xbf16>, vector<16x16xf32> -> vector<16x16xf32>
    %22 = arith.addf %16, %21 : vector<16x16xf32>
    %23 = vector.extract_strided_slice %3 {offsets = [1, 0, 0], sizes = [1, 16, 16], strides = [1, 1, 1]} : vector<3x18x16xbf16> to vector<1x16x16xbf16>
    %24 = vector.shape_cast %23 : vector<1x16x16xbf16> to vector<16x16xbf16>
    %c3 = arith.constant 3 : index
    %c0_12 = arith.constant 0 : index
    %c0_13 = arith.constant 0 : index
    %25 = vector.load %arg3[%c3, %c0_12, %c0_13] : memref<9x16x16xbf16, #tpu.memory_space<vmem>>, vector<1x16x16xbf16>
    %26 = vector.shape_cast %25 : vector<1x16x16xbf16> to vector<16x16xbf16>
    %cst_14 = arith.constant dense<0.000000e+00> : vector<16x16xf32>
    %27 = tpu.matmul %24, %26, %cst_14 {dimension_numbers = #tpu.dot_dimension_numbers<[1], [0], [0], [1], [0, 0, 1, 1], [], []>} : vector<16x16xbf16>, vector<16x16xbf16>, vector<16x16xf32> -> vector<16x16xf32>
    %28 = arith.addf %22, %27 : vector<16x16xf32>
    %29 = vector.extract_strided_slice %3 {offsets = [1, 1, 0], sizes = [1, 16, 16], strides = [1, 1, 1]} : vector<3x18x16xbf16> to vector<1x16x16xbf16>
    %30 = vector.shape_cast %29 : vector<1x16x16xbf16> to vector<16x16xbf16>
    %c4 = arith.constant 4 : index
    %c0_15 = arith.constant 0 : index
    %c0_16 = arith.constant 0 : index
    %31 = vector.load %arg3[%c4, %c0_15, %c0_16] : memref<9x16x16xbf16, #tpu.memory_space<vmem>>, vector<1x16x16xbf16>
    %32 = vector.shape_cast %31 : vector<1x16x16xbf16> to vector<16x16xbf16>
    %cst_17 = arith.constant dense<0.000000e+00> : vector<16x16xf32>
    %33 = tpu.matmul %30, %32, %cst_17 {dimension_numbers = #tpu.dot_dimension_numbers<[1], [0], [0], [1], [0, 0, 1, 1], [], []>} : vector<16x16xbf16>, vector<16x16xbf16>, vector<16x16xf32> -> vector<16x16xf32>
    %34 = arith.addf %28, %33 : vector<16x16xf32>
    %35 = vector.extract_strided_slice %3 {offsets = [1, 2, 0], sizes = [1, 16, 16], strides = [1, 1, 1]} : vector<3x18x16xbf16> to vector<1x16x16xbf16>
    %36 = vector.shape_cast %35 : vector<1x16x16xbf16> to vector<16x16xbf16>
    %c5 = arith.constant 5 : index
    %c0_18 = arith.constant 0 : index
    %c0_19 = arith.constant 0 : index
    %37 = vector.load %arg3[%c5, %c0_18, %c0_19] : memref<9x16x16xbf16, #tpu.memory_space<vmem>>, vector<1x16x16xbf16>
    %38 = vector.shape_cast %37 : vector<1x16x16xbf16> to vector<16x16xbf16>
    %cst_20 = arith.constant dense<0.000000e+00> : vector<16x16xf32>
    %39 = tpu.matmul %36, %38, %cst_20 {dimension_numbers = #tpu.dot_dimension_numbers<[1], [0], [0], [1], [0, 0, 1, 1], [], []>} : vector<16x16xbf16>, vector<16x16xbf16>, vector<16x16xf32> -> vector<16x16xf32>
    %40 = arith.addf %34, %39 : vector<16x16xf32>
    %41 = vector.extract_strided_slice %3 {offsets = [2, 0, 0], sizes = [1, 16, 16], strides = [1, 1, 1]} : vector<3x18x16xbf16> to vector<1x16x16xbf16>
    %42 = vector.shape_cast %41 : vector<1x16x16xbf16> to vector<16x16xbf16>
    %c6 = arith.constant 6 : index
    %c0_21 = arith.constant 0 : index
    %c0_22 = arith.constant 0 : index
    %43 = vector.load %arg3[%c6, %c0_21, %c0_22] : memref<9x16x16xbf16, #tpu.memory_space<vmem>>, vector<1x16x16xbf16>
    %44 = vector.shape_cast %43 : vector<1x16x16xbf16> to vector<16x16xbf16>
    %cst_23 = arith.constant dense<0.000000e+00> : vector<16x16xf32>
    %45 = tpu.matmul %42, %44, %cst_23 {dimension_numbers = #tpu.dot_dimension_numbers<[1], [0], [0], [1], [0, 0, 1, 1], [], []>} : vector<16x16xbf16>, vector<16x16xbf16>, vector<16x16xf32> -> vector<16x16xf32>
    %46 = arith.addf %40, %45 : vector<16x16xf32>
    %47 = vector.extract_strided_slice %3 {offsets = [2, 1, 0], sizes = [1, 16, 16], strides = [1, 1, 1]} : vector<3x18x16xbf16> to vector<1x16x16xbf16>
    %48 = vector.shape_cast %47 : vector<1x16x16xbf16> to vector<16x16xbf16>
    %c7 = arith.constant 7 : index
    %c0_24 = arith.constant 0 : index
    %c0_25 = arith.constant 0 : index
    %49 = vector.load %arg3[%c7, %c0_24, %c0_25] : memref<9x16x16xbf16, #tpu.memory_space<vmem>>, vector<1x16x16xbf16>
    %50 = vector.shape_cast %49 : vector<1x16x16xbf16> to vector<16x16xbf16>
    %cst_26 = arith.constant dense<0.000000e+00> : vector<16x16xf32>
    %51 = tpu.matmul %48, %50, %cst_26 {dimension_numbers = #tpu.dot_dimension_numbers<[1], [0], [0], [1], [0, 0, 1, 1], [], []>} : vector<16x16xbf16>, vector<16x16xbf16>, vector<16x16xf32> -> vector<16x16xf32>
    %52 = arith.addf %46, %51 : vector<16x16xf32>
    %53 = vector.extract_strided_slice %3 {offsets = [2, 2, 0], sizes = [1, 16, 16], strides = [1, 1, 1]} : vector<3x18x16xbf16> to vector<1x16x16xbf16>
    %54 = vector.shape_cast %53 : vector<1x16x16xbf16> to vector<16x16xbf16>
    %c8 = arith.constant 8 : index
    %c0_27 = arith.constant 0 : index
    %c0_28 = arith.constant 0 : index
    %55 = vector.load %arg3[%c8, %c0_27, %c0_28] : memref<9x16x16xbf16, #tpu.memory_space<vmem>>, vector<1x16x16xbf16>
    %56 = vector.shape_cast %55 : vector<1x16x16xbf16> to vector<16x16xbf16>
    %cst_29 = arith.constant dense<0.000000e+00> : vector<16x16xf32>
    %57 = tpu.matmul %54, %56, %cst_29 {dimension_numbers = #tpu.dot_dimension_numbers<[1], [0], [0], [1], [0, 0, 1, 1], [], []>} : vector<16x16xbf16>, vector<16x16xbf16>, vector<16x16xf32> -> vector<16x16xf32>
    %58 = arith.addf %52, %57 : vector<16x16xf32>
    %c0_30 = arith.constant 0 : index
    %c0_31 = arith.constant 0 : index
    %59 = vector.load %arg4[%c0_30, %c0_31] : memref<1x16xf32, #tpu.memory_space<vmem>>, vector<1x16xf32>
    %60 = vector.broadcast %59 : vector<1x16xf32> to vector<16x16xf32>
    %61 = arith.addf %58, %60 : vector<16x16xf32>
    %c0_32 = arith.constant 0 : index
    %c0_33 = arith.constant 0 : index
    %c0_34 = arith.constant 0 : index
    %c0_35 = arith.constant 0 : index
    %62 = vector.load %arg5[%c0_32, %c0_33, %c0_34, %c0_35] : memref<1x1x16x16xf32, #tpu.memory_space<vmem>>, vector<1x1x16x16xf32>
    %63 = vector.shape_cast %62 : vector<1x1x16x16xf32> to vector<16x16xf32>
    %64 = vector.shape_cast %61 : vector<16x16xf32> to vector<1x1x16x16xf32>
    tpu.vector_store %arg5[%c0_32, %c0_33, %c0_34, %c0_35], %64 {strides = array<i32>} : memref<1x1x16x16xf32, #tpu.memory_space<vmem>>, vector<1x1x16x16xf32>,
    return
  }
  func.func @transform_0(%arg0: i32, %arg1: i32) -> (i32, i32, i32, i32) {
    %c0_i32 = arith.constant 0 : i32
    %c0_i32_0 = arith.constant 0 : i32
    %c0_i32_1 = arith.constant 0 : i32
    %c0_i32_2 = arith.constant 0 : i32
    return %arg0, %c0_i32, %c0_i32_0, %c0_i32_1 : i32, i32, i32, i32
  }
  func.func @transform_1(%arg0: i32, %arg1: i32) -> (i32, i32, i32) {
    %c0_i32 = arith.constant 0 : i32
    %c0_i32_0 = arith.constant 0 : i32
    %c0_i32_1 = arith.constant 0 : i32
    %c0_i32_2 = arith.constant 0 : i32
    return %c0_i32, %c0_i32_0, %c0_i32_1 : i32, i32, i32
  }
  func.func @transform_2(%arg0: i32, %arg1: i32) -> (i32, i32) {
    %c0_i32 = arith.constant 0 : i32
    %c0_i32_0 = arith.constant 0 : i32
    %c0_i32_1 = arith.constant 0 : i32
    return %c0_i32, %c0_i32_0 : i32, i32
  }
  func.func @transform_3(%arg0: i32, %arg1: i32) -> (i32, i32, i32, i32) {
    %c0_i32 = arith.constant 0 : i32
    %c0_i32_0 = arith.constant 0 : i32
    %c0_i32_1 = arith.constant 0 : i32
    return %arg0, %arg1, %c0_i32, %c0_i32_0 : i32, i32, i32, i32
  }
}

module attributes {stable_mosaic.version = 11 : i64} {
  func.func @_matmul_bias_kernel(%arg0: i32, %arg1: i32, %arg2: i32, %arg3: memref<256x4xbf16, #tpu.memory_space<vmem>>, %arg4: memref<4x16xbf16, #tpu.memory_space<vmem>>, %arg5: memref<1x16xf32, #tpu.memory_space<vmem>>, %arg6: memref<256x16xf32, #tpu.memory_space<vmem>>, %arg7: memref<256x16xf32, #tpu.memory_space<vmem>>) attributes {dimension_semantics = [#tpu.dimension_semantics<parallel>, #tpu.dimension_semantics<parallel>, #tpu.dimension_semantics<arbitrary>], iteration_bounds = array<i64: 2, 1, 1>, scalar_prefetch = 0 : i64, scratch_operands = 1 : i64, tpu.core_type = #tpu.core_type<tc>, window_params = [{transform_indices = @transform_0, window_bounds = array<i64: 256, 4>}, {transform_indices = @transform_1, window_bounds = array<i64: 4, 16>}, {transform_indices = @transform_2, window_bounds = array<i64: 1, 16>}, {transform_indices = @transform_3, window_bounds = array<i64: 256, 16>}]} {
    %c0_i32 = arith.constant 0 : i32
    %0 = arith.cmpi eq, %arg2, %c0_i32 : i32
    %1 = arith.extui %0 : i1 to i32
    %c0_i32_0 = arith.constant 0 : i32
    %2 = arith.cmpi ne, %1, %c0_i32_0 : i32
    scf.if %2 {
      %cst_10 = arith.constant 0.000000e+00 : f32
      %12 = vector.broadcast %cst_10 : f32 to vector<256x16xf32>
      %c0_11 = arith.constant 0 : index
      %c0_12 = arith.constant 0 : index
      %13 = vector.load %arg7[%c0_11, %c0_12] : memref<256x16xf32, #tpu.memory_space<vmem>>, vector<256x16xf32>
      tpu.vector_store %arg7[%c0_11, %c0_12], %12 {strides = array<i32>} : memref<256x16xf32, #tpu.memory_space<vmem>>, vector<256x16xf32>,
    } else {
    }
    %c0 = arith.constant 0 : index
    %c0_1 = arith.constant 0 : index
    %3 = vector.load %arg7[%c0, %c0_1] : memref<256x16xf32, #tpu.memory_space<vmem>>, vector<256x16xf32>
    %c0_2 = arith.constant 0 : index
    %c0_3 = arith.constant 0 : index
    %4 = vector.load %arg3[%c0_2, %c0_3] : memref<256x4xbf16, #tpu.memory_space<vmem>>, vector<256x4xbf16>
    %c0_4 = arith.constant 0 : index
    %c0_5 = arith.constant 0 : index
    %5 = vector.load %arg4[%c0_4, %c0_5] : memref<4x16xbf16, #tpu.memory_space<vmem>>, vector<4x16xbf16>
    %cst = arith.constant dense<0.000000e+00> : vector<256x16xf32>
    %6 = tpu.matmul %4, %5, %cst {dimension_numbers = #tpu.dot_dimension_numbers<[1], [0], [0], [1], [0, 0, 1, 1], [], []>} : vector<256x4xbf16>, vector<4x16xbf16>, vector<256x16xf32> -> vector<256x16xf32>
    %7 = arith.addf %3, %6 : vector<256x16xf32>
    %c0_6 = arith.constant 0 : index
    %c0_7 = arith.constant 0 : index
    %8 = vector.load %arg7[%c0_6, %c0_7] : memref<256x16xf32, #tpu.memory_space<vmem>>, vector<256x16xf32>
    tpu.vector_store %arg7[%c0_6, %c0_7], %7 {strides = array<i32>} : memref<256x16xf32, #tpu.memory_space<vmem>>, vector<256x16xf32>,
    %c0_i32_8 = arith.constant 0 : i32
    %9 = arith.cmpi eq, %arg2, %c0_i32_8 : i32
    %10 = arith.extui %9 : i1 to i32
    %c0_i32_9 = arith.constant 0 : i32
    %11 = arith.cmpi ne, %10, %c0_i32_9 : i32
    scf.if %11 {
      %c0_10 = arith.constant 0 : index
      %c0_11 = arith.constant 0 : index
      %12 = vector.load %arg7[%c0_10, %c0_11] : memref<256x16xf32, #tpu.memory_space<vmem>>, vector<256x16xf32>
      %c0_12 = arith.constant 0 : index
      %c0_13 = arith.constant 0 : index
      %13 = vector.load %arg5[%c0_12, %c0_13] : memref<1x16xf32, #tpu.memory_space<vmem>>, vector<1x16xf32>
      %14 = vector.broadcast %13 : vector<1x16xf32> to vector<256x16xf32>
      %15 = arith.addf %12, %14 : vector<256x16xf32>
      %c0_14 = arith.constant 0 : index
      %c0_15 = arith.constant 0 : index
      %16 = vector.load %arg6[%c0_14, %c0_15] : memref<256x16xf32, #tpu.memory_space<vmem>>, vector<256x16xf32>
      tpu.vector_store %arg6[%c0_14, %c0_15], %15 {strides = array<i32>} : memref<256x16xf32, #tpu.memory_space<vmem>>, vector<256x16xf32>,
    } else {
    }
    return
  }
  func.func @transform_0(%arg0: i32, %arg1: i32, %arg2: i32) -> (i32, i32) {
    %c0_i32 = arith.constant 0 : i32
    return %arg0, %arg2 : i32, i32
  }
  func.func @transform_1(%arg0: i32, %arg1: i32, %arg2: i32) -> (i32, i32) {
    %c0_i32 = arith.constant 0 : i32
    return %arg2, %arg1 : i32, i32
  }
  func.func @transform_2(%arg0: i32, %arg1: i32, %arg2: i32) -> (i32, i32) {
    %c0_i32 = arith.constant 0 : i32
    %c0_i32_0 = arith.constant 0 : i32
    return %c0_i32, %arg1 : i32, i32
  }
  func.func @transform_3(%arg0: i32, %arg1: i32, %arg2: i32) -> (i32, i32) {
    %c0_i32 = arith.constant 0 : i32
    return %arg0, %arg1 : i32, i32
  }
}

module attributes {stable_mosaic.version = 11 : i64} {
  func.func @kernel(%arg0: i32, %arg1: memref<1x256x16xf32, #tpu.memory_space<vmem>>, %arg2: memref<16x4xf32, #tpu.memory_space<vmem>>, %arg3: memref<4x16xf32, #tpu.memory_space<vmem>>, %arg4: memref<1x16xf32, #tpu.memory_space<vmem>>, %arg5: memref<1x16xf32, #tpu.memory_space<vmem>>, %arg6: memref<1x256x16xf32, #tpu.memory_space<vmem>>, %arg7: memref<1x256x16xf32, #tpu.memory_space<vmem>>) attributes {dimension_semantics = [#tpu.dimension_semantics<parallel>], iteration_bounds = array<i64: 2>, scalar_prefetch = 0 : i64, scratch_operands = 0 : i64, tpu.core_type = #tpu.core_type<tc>, window_params = [{transform_indices = @transform_0, window_bounds = array<i64: 1, 256, 16>}, {pipeline_mode = #tpu.pipeline_mode<synchronous>, transform_indices = @transform_1, window_bounds = array<i64: 16, 4>}, {pipeline_mode = #tpu.pipeline_mode<synchronous>, transform_indices = @transform_2, window_bounds = array<i64: 4, 16>}, {pipeline_mode = #tpu.pipeline_mode<synchronous>, transform_indices = @transform_3, window_bounds = array<i64: 1, 16>}, {pipeline_mode = #tpu.pipeline_mode<synchronous>, transform_indices = @transform_4, window_bounds = array<i64: 1, 16>}, {transform_indices = @transform_5, window_bounds = array<i64: 1, 256, 16>}, {transform_indices = @transform_6, window_bounds = array<i64: 1, 256, 16>}]} {
    %c0 = arith.constant 0 : index
    %c0_0 = arith.constant 0 : index
    %c0_1 = arith.constant 0 : index
    %0 = vector.load %arg1[%c0, %c0_0, %c0_1] : memref<1x256x16xf32, #tpu.memory_space<vmem>>, vector<1x256x16xf32>
    %1 = vector.shape_cast %0 : vector<1x256x16xf32> to vector<256x16xf32>
    %c0_2 = arith.constant 0 : index
    %c0_3 = arith.constant 0 : index
    %2 = vector.load %arg2[%c0_2, %c0_3] : memref<16x4xf32, #tpu.memory_space<vmem>>, vector<16x4xf32>
    %c0_4 = arith.constant 0 : index
    %c0_5 = arith.constant 0 : index
    %3 = vector.load %arg3[%c0_4, %c0_5] : memref<4x16xf32, #tpu.memory_space<vmem>>, vector<4x16xf32>
    %c0_6 = arith.constant 0 : index
    %c0_7 = arith.constant 0 : index
    %4 = vector.load %arg4[%c0_6, %c0_7] : memref<1x16xf32, #tpu.memory_space<vmem>>, vector<1x16xf32>
    %c0_8 = arith.constant 0 : index
    %c0_9 = arith.constant 0 : index
    %5 = vector.load %arg5[%c0_8, %c0_9] : memref<1x16xf32, #tpu.memory_space<vmem>>, vector<1x16xf32>
    %cst = arith.constant dense<0.000000e+00> : vector<16xf32>
    %6 = vector.multi_reduction <add>, %1, %cst [0] : vector<256x16xf32> to vector<16xf32>
    %7 = vector.shape_cast %6 : vector<16xf32> to vector<1x16xf32>
    %cst_10 = arith.constant dense<0.000000e+00> : vector<1x4xf32>
    %8 = tpu.matmul %7, %2, %cst_10 {dimension_numbers = #tpu.dot_dimension_numbers<[1], [0], [0], [1], [0, 0, 1, 1], [], []>} : vector<1x16xf32>, vector<16x4xf32>, vector<1x4xf32> -> vector<1x4xf32>
    %cst_11 = arith.constant 1.024000e+03 : f32
    %9 = vector.broadcast %cst_11 : f32 to vector<1x4xf32>
    %10 = arith.divf %8, %9 : vector<1x4xf32>
    %cst_12 = arith.constant dense<0.000000e+00> : vector<1x16xf32>
    %11 = tpu.matmul %10, %3, %cst_12 {dimension_numbers = #tpu.dot_dimension_numbers<[1], [0], [0], [1], [0, 0, 1, 1], [], []>} : vector<1x4xf32>, vector<4x16xf32>, vector<1x16xf32> -> vector<1x16xf32>
    %12 = vector.broadcast %11 : vector<1x16xf32> to vector<256x16xf32>
    %13 = arith.subf %1, %12 : vector<256x16xf32>
    %14 = arith.mulf %13, %13 : vector<256x16xf32>
    %cst_13 = arith.constant dense<0.000000e+00> : vector<16xf32>
    %15 = vector.multi_reduction <add>, %14, %cst_13 [0] : vector<256x16xf32> to vector<16xf32>
    %16 = vector.shape_cast %15 : vector<16xf32> to vector<1x16xf32>
    %cst_14 = arith.constant dense<0.000000e+00> : vector<1x4xf32>
    %17 = tpu.matmul %16, %2, %cst_14 {dimension_numbers = #tpu.dot_dimension_numbers<[1], [0], [0], [1], [0, 0, 1, 1], [], []>} : vector<1x16xf32>, vector<16x4xf32>, vector<1x4xf32> -> vector<1x4xf32>
    %cst_15 = arith.constant 1.024000e+03 : f32
    %18 = vector.broadcast %cst_15 : f32 to vector<1x4xf32>
    %19 = arith.divf %17, %18 : vector<1x4xf32>
    %cst_16 = arith.constant 9.99999974E-6 : f32
    %20 = vector.broadcast %cst_16 : f32 to vector<1x4xf32>
    %21 = arith.addf %19, %20 : vector<1x4xf32>
    %22 = math.rsqrt %21 : vector<1x4xf32>
    %cst_17 = arith.constant dense<0.000000e+00> : vector<1x16xf32>
    %23 = tpu.matmul %22, %3, %cst_17 {dimension_numbers = #tpu.dot_dimension_numbers<[1], [0], [0], [1], [0, 0, 1, 1], [], []>} : vector<1x4xf32>, vector<4x16xf32>, vector<1x16xf32> -> vector<1x16xf32>
    %24 = vector.broadcast %23 : vector<1x16xf32> to vector<256x16xf32>
    %25 = arith.mulf %13, %24 : vector<256x16xf32>
    %26 = vector.broadcast %4 : vector<1x16xf32> to vector<256x16xf32>
    %27 = arith.mulf %25, %26 : vector<256x16xf32>
    %28 = vector.broadcast %5 : vector<1x16xf32> to vector<256x16xf32>
    %29 = arith.addf %27, %28 : vector<256x16xf32>
    %c0_18 = arith.constant 0 : index
    %c0_19 = arith.constant 0 : index
    %c0_20 = arith.constant 0 : index
    %30 = vector.load %arg6[%c0_18, %c0_19, %c0_20] : memref<1x256x16xf32, #tpu.memory_space<vmem>>, vector<1x256x16xf32>
    %31 = vector.shape_cast %30 : vector<1x256x16xf32> to vector<256x16xf32>
    %32 = arith.addf %29, %31 : vector<256x16xf32>
    %c0_21 = arith.constant 0 : index
    %c0_22 = arith.constant 0 : index
    %c0_23 = arith.constant 0 : index
    %33 = vector.load %arg7[%c0_21, %c0_22, %c0_23] : memref<1x256x16xf32, #tpu.memory_space<vmem>>, vector<1x256x16xf32>
    %34 = vector.shape_cast %33 : vector<1x256x16xf32> to vector<256x16xf32>
    %35 = vector.shape_cast %32 : vector<256x16xf32> to vector<1x256x16xf32>
    tpu.vector_store %arg7[%c0_21, %c0_22, %c0_23], %35 {strides = array<i32>} : memref<1x256x16xf32, #tpu.memory_space<vmem>>, vector<1x256x16xf32>,
    return
  }
  func.func @transform_0(%arg0: i32) -> (i32, i32, i32) {
    %c0_i32 = arith.constant 0 : i32
    %c0_i32_0 = arith.constant 0 : i32
    %c0_i32_1 = arith.constant 0 : i32
    return %arg0, %c0_i32, %c0_i32_0 : i32, i32, i32
  }
  func.func @transform_1(%arg0: i32) -> (i32, i32) {
    %c0_i32 = arith.constant 0 : i32
    %c0_i32_0 = arith.constant 0 : i32
    %c0_i32_1 = arith.constant 0 : i32
    return %c0_i32, %c0_i32_0 : i32, i32
  }
  func.func @transform_2(%arg0: i32) -> (i32, i32) {
    %c0_i32 = arith.constant 0 : i32
    %c0_i32_0 = arith.constant 0 : i32
    %c0_i32_1 = arith.constant 0 : i32
    return %c0_i32, %c0_i32_0 : i32, i32
  }
  func.func @transform_3(%arg0: i32) -> (i32, i32) {
    %c0_i32 = arith.constant 0 : i32
    %c0_i32_0 = arith.constant 0 : i32
    %c0_i32_1 = arith.constant 0 : i32
    return %c0_i32, %c0_i32_0 : i32, i32
  }
  func.func @transform_4(%arg0: i32) -> (i32, i32) {
    %c0_i32 = arith.constant 0 : i32
    %c0_i32_0 = arith.constant 0 : i32
    %c0_i32_1 = arith.constant 0 : i32
    return %c0_i32, %c0_i32_0 : i32, i32
  }
  func.func @transform_5(%arg0: i32) -> (i32, i32, i32) {
    %c0_i32 = arith.constant 0 : i32
    %c0_i32_0 = arith.constant 0 : i32
    %c0_i32_1 = arith.constant 0 : i32
    return %arg0, %c0_i32, %c0_i32_0 : i32, i32, i32
  }
  func.func @transform_6(%arg0: i32) -> (i32, i32, i32) {
    %c0_i32 = arith.constant 0 : i32
    %c0_i32_0 = arith.constant 0 : i32
    %c0_i32_1 = arith.constant 0 : i32
    return %arg0, %c0_i32, %c0_i32_0 : i32, i32, i32
  }
}

module attributes {stable_mosaic.version = 11 : i64} {
  func.func @kernel(%arg0: i32, %arg1: i32, %arg2: memref<1x18x9x16xbf16, #tpu.memory_space<vmem>>, %arg3: memref<1x18x9x16xbf16, #tpu.memory_space<vmem>>, %arg4: memref<9x16x16xbf16, #tpu.memory_space<vmem>>, %arg5: memref<1x16xf32, #tpu.memory_space<vmem>>, %arg6: memref<1x1x8x16xf32, #tpu.memory_space<vmem>>) attributes {dimension_semantics = [#tpu.dimension_semantics<parallel>, #tpu.dimension_semantics<arbitrary>], iteration_bounds = array<i64: 2, 8>, scalar_prefetch = 0 : i64, scratch_operands = 0 : i64, tpu.core_type = #tpu.core_type<tc>, window_params = [{transform_indices = @transform_0, window_bounds = array<i64: 1, 18, 9, 16>}, {transform_indices = @transform_1, window_bounds = array<i64: 1, 18, 9, 16>}, {pipeline_mode = #tpu.pipeline_mode<synchronous>, transform_indices = @transform_2, window_bounds = array<i64: 9, 16, 16>}, {pipeline_mode = #tpu.pipeline_mode<synchronous>, transform_indices = @transform_3, window_bounds = array<i64: 1, 16>}, {transform_indices = @transform_4, window_bounds = array<i64: 1, 1, 8, 16>}]} {
    %c2_i32 = arith.constant 2 : i32
    %0 = arith.muli %arg1, %c2_i32 : i32
    %c0 = arith.constant 0 : index
    %1 = arith.index_cast %0 : i32 to index
    %c0_0 = arith.constant 0 : index
    %c0_1 = arith.constant 0 : index
    %2 = vector.load %arg2[%c0, %1, %c0_0, %c0_1] : memref<1x18x9x16xbf16, #tpu.memory_space<vmem>>, vector<1x3x9x16xbf16>
    %3 = vector.shape_cast %2 : vector<1x3x9x16xbf16> to vector<3x9x16xbf16>
    %c2_i32_2 = arith.constant 2 : i32
    %4 = arith.muli %arg1, %c2_i32_2 : i32
    %c0_3 = arith.constant 0 : index
    %5 = arith.index_cast %4 : i32 to index
    %c0_4 = arith.constant 0 : index
    %c0_5 = arith.constant 0 : index
    %6 = vector.load %arg3[%c0_3, %5, %c0_4, %c0_5] : memref<1x18x9x16xbf16, #tpu.memory_space<vmem>>, vector<1x3x9x16xbf16>
    %7 = vector.shape_cast %6 : vector<1x3x9x16xbf16> to vector<3x9x16xbf16>
    %cst = arith.constant 0.000000e+00 : f32
    %8 = vector.broadcast %cst : f32 to vector<8x16xf32>
    %9 = vector.extract_strided_slice %3 {offsets = [0, 0, 0], sizes = [1, 8, 16], strides = [1, 1, 1]} : vector<3x9x16xbf16> to vector<1x8x16xbf16>
    %10 = vector.shape_cast %9 : vector<1x8x16xbf16> to vector<8x16xbf16>
    %c0_6 = arith.constant 0 : index
    %c0_7 = arith.constant 0 : index
    %c0_8 = arith.constant 0 : index
    %11 = vector.load %arg4[%c0_6, %c0_7, %c0_8] : memref<9x16x16xbf16, #tpu.memory_space<vmem>>, vector<1x16x16xbf16>
    %12 = vector.shape_cast %11 : vector<1x16x16xbf16> to vector<16x16xbf16>
    %cst_9 = arith.constant dense<0.000000e+00> : vector<8x16xf32>
    %13 = tpu.matmul %10, %12, %cst_9 {dimension_numbers = #tpu.dot_dimension_numbers<[1], [0], [0], [1], [0, 0, 1, 1], [], []>} : vector<8x16xbf16>, vector<16x16xbf16>, vector<8x16xf32> -> vector<8x16xf32>
    %14 = arith.addf %8, %13 : vector<8x16xf32>
    %15 = vector.extract_strided_slice %7 {offsets = [0, 0, 0], sizes = [1, 8, 16], strides = [1, 1, 1]} : vector<3x9x16xbf16> to vector<1x8x16xbf16>
    %16 = vector.shape_cast %15 : vector<1x8x16xbf16> to vector<8x16xbf16>
    %c1 = arith.constant 1 : index
    %c0_10 = arith.constant 0 : index
    %c0_11 = arith.constant 0 : index
    %17 = vector.load %arg4[%c1, %c0_10, %c0_11] : memref<9x16x16xbf16, #tpu.memory_space<vmem>>, vector<1x16x16xbf16>
    %18 = vector.shape_cast %17 : vector<1x16x16xbf16> to vector<16x16xbf16>
    %cst_12 = arith.constant dense<0.000000e+00> : vector<8x16xf32>
    %19 = tpu.matmul %16, %18, %cst_12 {dimension_numbers = #tpu.dot_dimension_numbers<[1], [0], [0], [1], [0, 0, 1, 1], [], []>} : vector<8x16xbf16>, vector<16x16xbf16>, vector<8x16xf32> -> vector<8x16xf32>
    %20 = arith.addf %14, %19 : vector<8x16xf32>
    %21 = vector.extract_strided_slice %3 {offsets = [0, 1, 0], sizes = [1, 8, 16], strides = [1, 1, 1]} : vector<3x9x16xbf16> to vector<1x8x16xbf16>
    %22 = vector.shape_cast %21 : vector<1x8x16xbf16> to vector<8x16xbf16>
    %c2 = arith.constant 2 : index
    %c0_13 = arith.constant 0 : index
    %c0_14 = arith.constant 0 : index
    %23 = vector.load %arg4[%c2, %c0_13, %c0_14] : memref<9x16x16xbf16, #tpu.memory_space<vmem>>, vector<1x16x16xbf16>
    %24 = vector.shape_cast %23 : vector<1x16x16xbf16> to vector<16x16xbf16>
    %cst_15 = arith.constant dense<0.000000e+00> : vector<8x16xf32>
    %25 = tpu.matmul %22, %24, %cst_15 {dimension_numbers = #tpu.dot_dimension_numbers<[1], [0], [0], [1], [0, 0, 1, 1], [], []>} : vector<8x16xbf16>, vector<16x16xbf16>, vector<8x16xf32> -> vector<8x16xf32>
    %26 = arith.addf %20, %25 : vector<8x16xf32>
    %27 = vector.extract_strided_slice %3 {offsets = [1, 0, 0], sizes = [1, 8, 16], strides = [1, 1, 1]} : vector<3x9x16xbf16> to vector<1x8x16xbf16>
    %28 = vector.shape_cast %27 : vector<1x8x16xbf16> to vector<8x16xbf16>
    %c3 = arith.constant 3 : index
    %c0_16 = arith.constant 0 : index
    %c0_17 = arith.constant 0 : index
    %29 = vector.load %arg4[%c3, %c0_16, %c0_17] : memref<9x16x16xbf16, #tpu.memory_space<vmem>>, vector<1x16x16xbf16>
    %30 = vector.shape_cast %29 : vector<1x16x16xbf16> to vector<16x16xbf16>
    %cst_18 = arith.constant dense<0.000000e+00> : vector<8x16xf32>
    %31 = tpu.matmul %28, %30, %cst_18 {dimension_numbers = #tpu.dot_dimension_numbers<[1], [0], [0], [1], [0, 0, 1, 1], [], []>} : vector<8x16xbf16>, vector<16x16xbf16>, vector<8x16xf32> -> vector<8x16xf32>
    %32 = arith.addf %26, %31 : vector<8x16xf32>
    %33 = vector.extract_strided_slice %7 {offsets = [1, 0, 0], sizes = [1, 8, 16], strides = [1, 1, 1]} : vector<3x9x16xbf16> to vector<1x8x16xbf16>
    %34 = vector.shape_cast %33 : vector<1x8x16xbf16> to vector<8x16xbf16>
    %c4 = arith.constant 4 : index
    %c0_19 = arith.constant 0 : index
    %c0_20 = arith.constant 0 : index
    %35 = vector.load %arg4[%c4, %c0_19, %c0_20] : memref<9x16x16xbf16, #tpu.memory_space<vmem>>, vector<1x16x16xbf16>
    %36 = vector.shape_cast %35 : vector<1x16x16xbf16> to vector<16x16xbf16>
    %cst_21 = arith.constant dense<0.000000e+00> : vector<8x16xf32>
    %37 = tpu.matmul %34, %36, %cst_21 {dimension_numbers = #tpu.dot_dimension_numbers<[1], [0], [0], [1], [0, 0, 1, 1], [], []>} : vector<8x16xbf16>, vector<16x16xbf16>, vector<8x16xf32> -> vector<8x16xf32>
    %38 = arith.addf %32, %37 : vector<8x16xf32>
    %39 = vector.extract_strided_slice %3 {offsets = [1, 1, 0], sizes = [1, 8, 16], strides = [1, 1, 1]} : vector<3x9x16xbf16> to vector<1x8x16xbf16>
    %40 = vector.shape_cast %39 : vector<1x8x16xbf16> to vector<8x16xbf16>
    %c5 = arith.constant 5 : index
    %c0_22 = arith.constant 0 : index
    %c0_23 = arith.constant 0 : index
    %41 = vector.load %arg4[%c5, %c0_22, %c0_23] : memref<9x16x16xbf16, #tpu.memory_space<vmem>>, vector<1x16x16xbf16>
    %42 = vector.shape_cast %41 : vector<1x16x16xbf16> to vector<16x16xbf16>
    %cst_24 = arith.constant dense<0.000000e+00> : vector<8x16xf32>
    %43 = tpu.matmul %40, %42, %cst_24 {dimension_numbers = #tpu.dot_dimension_numbers<[1], [0], [0], [1], [0, 0, 1, 1], [], []>} : vector<8x16xbf16>, vector<16x16xbf16>, vector<8x16xf32> -> vector<8x16xf32>
    %44 = arith.addf %38, %43 : vector<8x16xf32>
    %45 = vector.extract_strided_slice %3 {offsets = [2, 0, 0], sizes = [1, 8, 16], strides = [1, 1, 1]} : vector<3x9x16xbf16> to vector<1x8x16xbf16>
    %46 = vector.shape_cast %45 : vector<1x8x16xbf16> to vector<8x16xbf16>
    %c6 = arith.constant 6 : index
    %c0_25 = arith.constant 0 : index
    %c0_26 = arith.constant 0 : index
    %47 = vector.load %arg4[%c6, %c0_25, %c0_26] : memref<9x16x16xbf16, #tpu.memory_space<vmem>>, vector<1x16x16xbf16>
    %48 = vector.shape_cast %47 : vector<1x16x16xbf16> to vector<16x16xbf16>
    %cst_27 = arith.constant dense<0.000000e+00> : vector<8x16xf32>
    %49 = tpu.matmul %46, %48, %cst_27 {dimension_numbers = #tpu.dot_dimension_numbers<[1], [0], [0], [1], [0, 0, 1, 1], [], []>} : vector<8x16xbf16>, vector<16x16xbf16>, vector<8x16xf32> -> vector<8x16xf32>
    %50 = arith.addf %44, %49 : vector<8x16xf32>
    %51 = vector.extract_strided_slice %7 {offsets = [2, 0, 0], sizes = [1, 8, 16], strides = [1, 1, 1]} : vector<3x9x16xbf16> to vector<1x8x16xbf16>
    %52 = vector.shape_cast %51 : vector<1x8x16xbf16> to vector<8x16xbf16>
    %c7 = arith.constant 7 : index
    %c0_28 = arith.constant 0 : index
    %c0_29 = arith.constant 0 : index
    %53 = vector.load %arg4[%c7, %c0_28, %c0_29] : memref<9x16x16xbf16, #tpu.memory_space<vmem>>, vector<1x16x16xbf16>
    %54 = vector.shape_cast %53 : vector<1x16x16xbf16> to vector<16x16xbf16>
    %cst_30 = arith.constant dense<0.000000e+00> : vector<8x16xf32>
    %55 = tpu.matmul %52, %54, %cst_30 {dimension_numbers = #tpu.dot_dimension_numbers<[1], [0], [0], [1], [0, 0, 1, 1], [], []>} : vector<8x16xbf16>, vector<16x16xbf16>, vector<8x16xf32> -> vector<8x16xf32>
    %56 = arith.addf %50, %55 : vector<8x16xf32>
    %57 = vector.extract_strided_slice %3 {offsets = [2, 1, 0], sizes = [1, 8, 16], strides = [1, 1, 1]} : vector<3x9x16xbf16> to vector<1x8x16xbf16>
    %58 = vector.shape_cast %57 : vector<1x8x16xbf16> to vector<8x16xbf16>
    %c8 = arith.constant 8 : index
    %c0_31 = arith.constant 0 : index
    %c0_32 = arith.constant 0 : index
    %59 = vector.load %arg4[%c8, %c0_31, %c0_32] : memref<9x16x16xbf16, #tpu.memory_space<vmem>>, vector<1x16x16xbf16>
    %60 = vector.shape_cast %59 : vector<1x16x16xbf16> to vector<16x16xbf16>
    %cst_33 = arith.constant dense<0.000000e+00> : vector<8x16xf32>
    %61 = tpu.matmul %58, %60, %cst_33 {dimension_numbers = #tpu.dot_dimension_numbers<[1], [0], [0], [1], [0, 0, 1, 1], [], []>} : vector<8x16xbf16>, vector<16x16xbf16>, vector<8x16xf32> -> vector<8x16xf32>
    %62 = arith.addf %56, %61 : vector<8x16xf32>
    %c0_34 = arith.constant 0 : index
    %c0_35 = arith.constant 0 : index
    %63 = vector.load %arg5[%c0_34, %c0_35] : memref<1x16xf32, #tpu.memory_space<vmem>>, vector<1x16xf32>
    %64 = vector.broadcast %63 : vector<1x16xf32> to vector<8x16xf32>
    %65 = arith.addf %62, %64 : vector<8x16xf32>
    %c0_36 = arith.constant 0 : index
    %c0_37 = arith.constant 0 : index
    %c0_38 = arith.constant 0 : index
    %c0_39 = arith.constant 0 : index
    %66 = vector.load %arg6[%c0_36, %c0_37, %c0_38, %c0_39] : memref<1x1x8x16xf32, #tpu.memory_space<vmem>>, vector<1x1x8x16xf32>
    %67 = vector.shape_cast %66 : vector<1x1x8x16xf32> to vector<8x16xf32>
    %68 = vector.shape_cast %65 : vector<8x16xf32> to vector<1x1x8x16xf32>
    tpu.vector_store %arg6[%c0_36, %c0_37, %c0_38, %c0_39], %68 {strides = array<i32>} : memref<1x1x8x16xf32, #tpu.memory_space<vmem>>, vector<1x1x8x16xf32>,
    return
  }
  func.func @transform_0(%arg0: i32, %arg1: i32) -> (i32, i32, i32, i32) {
    %c0_i32 = arith.constant 0 : i32
    %c0_i32_0 = arith.constant 0 : i32
    %c0_i32_1 = arith.constant 0 : i32
    %c0_i32_2 = arith.constant 0 : i32
    return %arg0, %c0_i32, %c0_i32_0, %c0_i32_1 : i32, i32, i32, i32
  }
  func.func @transform_1(%arg0: i32, %arg1: i32) -> (i32, i32, i32, i32) {
    %c0_i32 = arith.constant 0 : i32
    %c0_i32_0 = arith.constant 0 : i32
    %c0_i32_1 = arith.constant 0 : i32
    %c0_i32_2 = arith.constant 0 : i32
    return %arg0, %c0_i32, %c0_i32_0, %c0_i32_1 : i32, i32, i32, i32
  }
  func.func @transform_2(%arg0: i32, %arg1: i32) -> (i32, i32, i32) {
    %c0_i32 = arith.constant 0 : i32
    %c0_i32_0 = arith.constant 0 : i32
    %c0_i32_1 = arith.constant 0 : i32
    %c0_i32_2 = arith.constant 0 : i32
    return %c0_i32, %c0_i32_0, %c0_i32_1 : i32, i32, i32
  }
  func.func @transform_3(%arg0: i32, %arg1: i32) -> (i32, i32) {
    %c0_i32 = arith.constant 0 : i32
    %c0_i32_0 = arith.constant 0 : i32
    %c0_i32_1 = arith.constant 0 : i32
    return %c0_i32, %c0_i32_0 : i32, i32
  }
  func.func @transform_4(%arg0: i32, %arg1: i32) -> (i32, i32, i32, i32) {
    %c0_i32 = arith.constant 0 : i32
    %c0_i32_0 = arith.constant 0 : i32
    %c0_i32_1 = arith.constant 0 : i32
    return %arg0, %arg1, %c0_i32, %c0_i32_0 : i32, i32, i32, i32
  }
}

</mosaic_0001>

<bundles_post_ra>
// kernel: down_block_forward.12
= control target key start
LH: loop header
LB: loop body
LE: loop exit
PB: predicated region body
PF: predicated region fallthrough
CT: control target
= control target key end

     0   :  { %s1461_s18 = smov 0   ;;  %s2266_s0 = inlined_call_operand.vmem [shape: f32[2,256,16], index: 0, kind: input, shape index: {}]   ;;  %s2267_s1 = inlined_call_operand.vmem [shape: f32[16,4], index: 1, kind: input, shape index: {}]   ;;  %s2268_s2 = inlined_call_operand.vmem [shape: f32[4,16], index: 2, kind: input, shape index: {}]   ;;  %s2269_s3 = inlined_call_operand.vmem [shape: f32[1,16], index: 3, kind: input, shape index: {}]   ;;  %s2270_s4 = inlined_call_operand.vmem [shape: f32[1,16], index: 4, kind: input, shape index: {}]   ;;  %s2271_s5 = inlined_call_operand.vmem [shape: f32[2,256,16], index: 5, kind: output, shape index: {}]  }
   0x1 LB: > { %s1194_s19 = sadd.s32 4294967295, %s1427_s18   ;;  %p1198_p0 = scmp.ge.s32.totalorder %s1427_s18, 1  ;;  %s1427_s18 = sphi %s1461_s18, %s15_s18  }
   0x2   : > { %p187_p1 = scmp.lt.s32.totalorder %s1427_s18, 3 }
   0x4   : > { %p188_p2 = pnand %p1198_p0, %p187_p1 }
   0x6   : > { %191 = sbr.rel (%p188_p2) target bundleno = 1061 (0x425), region = 40 }
   0xb   : > { %v1472_v0 = vld [vmem:[%s2267_s1 + $0x8] sm:$0xff]  ;;  %p215_p3 = scmp.lt.s32.totalorder %s1194_s19, 1  ;;  %v1429_v1 = vmov 0.0   ;;  %v1478_v2 = vld [vmem:[%s2267_s1] sm:$0xff]  ;;  %vm1430_vm0 = vmmov 0   ;;  %vm262_vm1 = vcmask 130048  }
   0xc   : > { %1257 = vmatprep.subr.mxu0 %v1429_v1  ;;  %1261 = vmatprep.mubr.msk.f32.mxu0 %vm1430_vm0, %v1429_v1  ;;  %vm411_vm2 = vcmask 1043456   ;;  %vm407_vm3 = vcmask 31744  }
   0xd   : > { %1258 = vmatpush3.msra.mxu0 %v1472_v0  ;;  %s2276_s19 = smov (!%p215_p3, %s1194_s19), 1  ;;  %1264 = vmatprep.subr.mxu1 %v1429_v1 }
   0xe   : > { %1259 = vmatprep.subr.mxu0 %v1429_v1  ;;  %1266 = vmatprep.mubr.msk.f32.mxu1 %vm1430_vm0, %v1429_v1  ;;  %s1245_s24 = sshll.u32 %s2276_s19, 8 }
   0xf   : > { %1260 = vmatpush3.msra.mxu0 %v1478_v2  ;;  %s1496_s27 = scalar_lea.vmem %s2266_s0, %s1245_s24  ;;  %s2161_s11 = scalar_lea.vmem %s2271_s5, %s1245_s24 }
  0x10   : > { %1276 = vmatprep.subr.mxu0 %v1429_v1  ;;  %v1500_v3 = vld [vmem:[%s1496_s27] sm:$0xff]  ;;  %v1503_v4 = vld [vmem:[%s1496_s27 + $0x8] sm:$0xff]  ;;  %v1506_v5 = vld [vmem:[%s1496_s27 + $0x10] sm:$0xff] }
  0x11   : > { %v1509_v6 = vld [vmem:[%s1496_s27 + $0x18] sm:$0xff]  ;;  %v263_v7 = vsel %vm262_vm1, %v1500_v3, 0.0  ;;  %v264_v8 = vsel %vm262_vm1, %v1503_v4, 0.0  ;;  %v266_v9 = vsel %vm262_vm1, %v1506_v5, 0.0  ;;  %v1518_v10 = vld [vmem:[%s1496_s27 + $0x20] sm:$0xff]  ;;  %v1523_v13 = vld [vmem:[%s1496_s27 + $0x28] sm:$0xff] }
  0x12   : > { %v265_v11 = vadd.f32 %v264_v8, %v263_v7  ;;  %v268_v12 = vsel %vm262_vm1, %v1509_v6, 0.0  ;;  %v270_v15 = vsel %vm262_vm1, %v1518_v10, 0.0  ;;  %v1528_v16 = vld [vmem:[%s1496_s27 + $0x30] sm:$0xff]  ;;  %v272_v18 = vsel %vm262_vm1, %v1523_v13, 0.0  ;;  %v1533_v19 = vld [vmem:[%s1496_s27 + $0x38] sm:$0xff]  ;;  %v1538_v22 = vld [vmem:[%s1496_s27 + $0x40] sm:$0xff] }
  0x13   : > { %v274_v21 = vsel %vm262_vm1, %v1528_v16, 0.0  ;;  %v276_v24 = vsel %vm262_vm1, %v1533_v19, 0.0  ;;  %v1543_v25 = vld [vmem:[%s1496_s27 + $0x48] sm:$0xff]  ;;  %v278_v27 = vsel %vm262_vm1, %v1538_v22, 0.0  ;;  %v1548_v28 = vld [vmem:[%s1496_s27 + $0x50] sm:$0xff]  ;;  %v1553_v31 = vld [vmem:[%s1496_s27 + $0x58] sm:$0xff] }
  0x14   : > { %v267_v14 = vadd.f32 %v266_v9, %v265_v11  ;;  %v280_v30 = vsel %vm262_vm1, %v1543_v25, 0.0  ;;  %v282_v33 = vsel %vm262_vm1, %v1548_v28, 0.0  ;;  %v1558_v34 = vld [vmem:[%s1496_s27 + $0x60] sm:$0xff]  ;;  %v284_v36 = vsel %vm262_vm1, %v1553_v31, 0.0  ;;  %v1563_v37 = vld [vmem:[%s1496_s27 + $0x68] sm:$0xff]  ;;  %v1568_v40 = vld [vmem:[%s1496_s27 + $0x70] sm:$0xff] }
  0x15   : > { %v286_v39 = vsel %vm262_vm1, %v1558_v34, 0.0  ;;  %v288_v42 = vsel %vm262_vm1, %v1563_v37, 0.0  ;;  %v1573_v43 = vld [vmem:[%s1496_s27 + $0x78] sm:$0xff]  ;;  %v290_v45 = vsel %vm262_vm1, %v1568_v40, 0.0  ;;  %v1578_v46 = vld [vmem:[%s1496_s27 + $0x80] sm:$0xff]  ;;  %v1583_v49 = vld [vmem:[%s1496_s27 + $0x88] sm:$0xff] }
  0x16   : > { %v269_v17 = vadd.f32 %v268_v12, %v267_v14  ;;  %v292_v48 = vsel %vm262_vm1, %v1573_v43, 0.0  ;;  %v294_v51 = vsel %vm262_vm1, %v1578_v46, 0.0  ;;  %v1588_v52 = vld [vmem:[%s1496_s27 + $0x90] sm:$0xff]  ;;  %v296_v54 = vsel %vm262_vm1, %v1583_v49, 0.0  ;;  %v1593_v55 = vld [vmem:[%s1496_s27 + $0x98] sm:$0xff]  ;;  %v1598_v58 = vld [vmem:[%s1496_s27 + $0xa0] sm:$0xff] }
  0x17   : > { %v298_v57 = vsel %vm262_vm1, %v1588_v52, 0.0  ;;  %v300_v60 = vsel %vm262_vm1, %v1593_v55, 0.0  ;;  %v1603_v61 = vld [vmem:[%s1496_s27 + $0xa8] sm:$0xff]  ;;  %v302_v63 = vsel %vm262_vm1, %v1598_v58, 0.0  ;;  %v1608_v7 = vld [vmem:[%s1496_s27 + $0xb0] sm:$0xff]  ;;  %v1613_v11 = vld [vmem:[%s1496_s27 + $0xb8] sm:$0xff] }
  0x18   : > { %v271_v20 = vadd.f32 %v270_v15, %v269_v17  ;;  %v304_v9 = vsel %vm262_vm1, %v1603_v61, 0.0  ;;  %v306_v14 = vsel %vm262_vm1, %v1608_v7, 0.0  ;;  %v1618_v15 = vld [vmem:[%s1496_s27 + $0xc0] sm:$0xff] }
  0x1a   : > { %v273_v23 = vadd.f32 %v272_v18, %v271_v20  ;;  %v308_v18 = vsel %vm262_vm1, %v1613_v11, 0.0  ;;  %v1623_v20 = vld [vmem:[%s1496_s27 + $0xc8] sm:$0xff] }
  0x1c   : > { %v275_v26 = vadd.f32 %v274_v21, %v273_v23  ;;  %v310_v23 = vsel %vm262_vm1, %v1618_v15, 0.0 }
  0x1e   : > { %v277_v29 = vadd.f32 %v276_v24, %v275_v26  ;;  %v1628_v24 = vld [vmem:[%s1496_s27 + $0xd0] sm:$0xff] }
  0x20   : > { %v279_v32 = vadd.f32 %v278_v27, %v277_v29  ;;  %v312_v27 = vsel %vm262_vm1, %v1623_v20, 0.0  ;;  %v1633_v29 = vld [vmem:[%s1496_s27 + $0xd8] sm:$0xff] }
  0x22   : > { %v281_v35 = vadd.f32 %v280_v30, %v279_v32  ;;  %v314_v32 = vsel %vm262_vm1, %v1628_v24, 0.0 }
  0x24   : > { %v283_v38 = vadd.f32 %v282_v33, %v281_v35  ;;  %v1638_v33 = vld [vmem:[%s1496_s27 + $0xe0] sm:$0xff] }
  0x26   : > { %v285_v41 = vadd.f32 %v284_v36, %v283_v38  ;;  %v316_v36 = vsel %vm262_vm1, %v1633_v29, 0.0  ;;  %v1643_v38 = vld [vmem:[%s1496_s27 + $0xe8] sm:$0xff] }
  0x28   : > { %v287_v44 = vadd.f32 %v286_v39, %v285_v41  ;;  %v318_v41 = vsel %vm262_vm1, %v1638_v33, 0.0 }
  0x2a   : > { %v289_v47 = vadd.f32 %v288_v42, %v287_v44  ;;  %v1648_v42 = vld [vmem:[%s1496_s27 + $0xf0] sm:$0xff] }
  0x2c   : > { %v291_v50 = vadd.f32 %v290_v45, %v289_v47  ;;  %v320_v45 = vsel %vm262_vm1, %v1643_v38, 0.0  ;;  %v1653_v47 = vld [vmem:[%s1496_s27 + $0xf8] sm:$0xff] }
  0x2e   : > { %v293_v53 = vadd.f32 %v292_v48, %v291_v50  ;;  %v322_v50 = vsel %vm262_vm1, %v1648_v42, 0.0 }
  0x30   : > { %v295_v56 = vadd.f32 %v294_v51, %v293_v53  ;;  %v324_v53 = vsel %vm262_vm1, %v1653_v47, 0.0 }
  0x32   : > { %v297_v59 = vadd.f32 %v296_v54, %v295_v56 }
  0x34   : > { %v299_v62 = vadd.f32 %v298_v57, %v297_v59 }
  0x36   : > { %v301_v8 = vadd.f32 %v300_v60, %v299_v62 }
  0x38   : > { %v303_v12 = vadd.f32 %v302_v63, %v301_v8 }
  0x3a   : > { %v305_v17 = vadd.f32 %v304_v9, %v303_v12  ;;  %v259_v9 = vld [vmem:[%s2268_s2] sm:$0xf] }
  0x3b   : > { %1265 = vmatpush3.msk.msra.mxu1 %vm411_vm2, %v259_v9 }
  0x3c   : > { %v307_v21 = vadd.f32 %v306_v14, %v305_v17  ;;  %1269 = vmatprep.subr.mxu1 %v1429_v1 }
  0x3e   : > { %v309_v26 = vadd.f32 %v308_v18, %v307_v21  ;;  %v485_v18 = vlaneseq }
  0x40   : > { %v311_v30 = vadd.f32 %v310_v23, %v309_v26  ;;  %v1672_v21 = vshrl.u32 %v485_v18, 7 }
  0x42   : > { %v313_v35 = vadd.f32 %v312_v27, %v311_v30  ;;  %v487_v27 = vsub.s32 0, %v1672_v21 }
  0x44   : > { %v315_v39 = vadd.f32 %v314_v32, %v313_v35 }
  0x46   : > { %v317_v44 = vadd.f32 %v316_v36, %v315_v39 }
  0x48   : > { %v319_v48 = vadd.f32 %v318_v41, %v317_v44 }
  0x4a   : > { %v321_v51 = vadd.f32 %v320_v45, %v319_v48 }
  0x4c   : > { %v323_v54 = vadd.f32 %v322_v50, %v321_v51 }
  0x4e   : > { %v325_v56 = vadd.f32 %v324_v53, %v323_v54 }
  0x50   : > { %v326_v57 = vrot.slane %v325_v56, 4 }
  0x52   : > { %v327_v59 = vadd.f32 %v326_v57, %v325_v56 }
  0x54   : > { %v328_v60 = vrot.slane %v327_v59, 2 }
  0x56   : > { %v329_v62 = vadd.f32 %v328_v60, %v327_v59 }
  0x58   : > { %v330_v63 = vrot.slane %v329_v62, 1 }
  0x5a   : > { %v331_v8 = vadd.f32 %v330_v63, %v329_v62 }
  0x5c   : > { %1262 = vmatmul.mubr.msk.f32.vlgmr.msra.gmra.mxu0 %vm262_vm1, %v331_v8 }
  0x5d   : > { %1278 = vmatprep.mubr.msk.f32.mxu0 %vm1430_vm0, %v1429_v1  ;;  %1277 = vmatpush3.msk.msra.mxu0 %vm411_vm2, %v259_v9 }
 0x11c   : > { %v401_v12 = vpop.f32.mrf.mxu0 }
 0x11d   : > { %v406_v14 = vmul.f32 0.0009765625, %v401_v12 }
 0x11e   : > { %v1263_v17 = vpop.f32.mrf.mxu0 }
 0x11f   : > { %1267 = vmatmul.mubr.msk.f32.vlgmr.msra.gmra.mxu1 %vm407_vm3, %v406_v14 }
 0x120   : > { %1270 = vmatpush3.msra.mxu1 %v1472_v0  ;;  %1273 = vmatprep.mubr.msk.f32.mxu1 %vm1430_vm0, %v1429_v1 }
 0x121   : > { %1271 = vmatprep.subr.mxu1 %v1429_v1 }
 0x122   : > { %1272 = vmatpush3.msra.mxu1 %v1478_v2 }
 0x1df   : > { %v481_v23 = vpop.f32.mrf.mxu1 }
 0x1e0   : > { %v1677_v30 = vrot.slane %v481_v23, %v487_v27 }
 0x1e1   : > { %v1268_v26 = vpop.f32.mrf.mxu1 }
 0x1e2   : > { %v1681_v0 = vsub.f32 %v1500_v3, %v1677_v30  ;;  %v1685_v1 = vsub.f32 %v1503_v4, %v1677_v30  ;;  %v1689_v2 = vsub.f32 %v1506_v5, %v1677_v30  ;;  %v1693_v32 = vsub.f32 %v1509_v6, %v1677_v30 }
 0x1e3   : > { %v1701_v3 = vsub.f32 %v1518_v10, %v1677_v30  ;;  %v1707_v5 = vsub.f32 %v1523_v13, %v1677_v30  ;;  %v1715_v45 = vsub.f32 %v1528_v16, %v1677_v30  ;;  %v1722_v13 = vsub.f32 %v1533_v19, %v1677_v30 }
 0x1e4   : > { %v521_v35 = vmul.f32 %v1681_v0, %v1681_v0  ;;  %v522_v36 = vmul.f32 %v1685_v1, %v1685_v1  ;;  %v523_v4 = vmul.f32 %v1689_v2, %v1689_v2  ;;  %v524_v6 = vmul.f32 %v1693_v32, %v1693_v32 }
 0x1e5   : > { %v525_v10 = vmul.f32 %v1701_v3, %v1701_v3  ;;  %v526_v51 = vmul.f32 %v1707_v5, %v1707_v5  ;;  %v1729_v16 = vsub.f32 %v1538_v22, %v1677_v30  ;;  %v527_v56 = vmul.f32 %v1715_v45, %v1715_v45 }
 0x1e6   : > { %v553_v39 = vsel %vm262_vm1, %v521_v35, 0.0  ;;  %v554_v41 = vsel %vm262_vm1, %v522_v36, 0.0  ;;  %v556_v48 = vsel %vm262_vm1, %v523_v4, 0.0  ;;  %v558_v53 = vsel %vm262_vm1, %v524_v6, 0.0 }
 0x1e7   : > { %v555_v44 = vadd.f32 %v554_v41, %v553_v39  ;;  %v560_v57 = vsel %vm262_vm1, %v525_v10, 0.0  ;;  %v1736_v19 = vsub.f32 %v1543_v25, %v1677_v30  ;;  %v528_v60 = vmul.f32 %v1722_v13, %v1722_v13 }
 0x1e8   : > { %v562_v62 = vsel %vm262_vm1, %v526_v51, 0.0  ;;  %v1743_v22 = vsub.f32 %v1548_v28, %v1677_v30  ;;  %v529_v8 = vmul.f32 %v1729_v16, %v1729_v16  ;;  %v564_v9 = vsel %vm262_vm1, %v527_v56, 0.0 }
 0x1e9   : > { %v557_v50 = vadd.f32 %v556_v48, %v555_v44  ;;  %v1750_v25 = vsub.f32 %v1553_v31, %v1677_v30  ;;  %v530_v14 = vmul.f32 %v1736_v19, %v1736_v19  ;;  %v566_v17 = vsel %vm262_vm1, %v528_v60, 0.0 }
 0x1ea   : > { %v1757_v28 = vsub.f32 %v1558_v34, %v1677_v30  ;;  %v531_v23 = vmul.f32 %v1743_v22, %v1743_v22  ;;  %v568_v26 = vsel %vm262_vm1, %v529_v8, 0.0  ;;  %v1764_v31 = vsub.f32 %v1563_v37, %v1677_v30 }
 0x1eb   : > { %v559_v54 = vadd.f32 %v558_v53, %v557_v50  ;;  %v532_v36 = vmul.f32 %v1750_v25, %v1750_v25  ;;  %v570_v4 = vsel %vm262_vm1, %v530_v14, 0.0  ;;  %v1771_v34 = vsub.f32 %v1568_v40, %v1677_v30 }
 0x1ec   : > { %v533_v39 = vmul.f32 %v1757_v28, %v1757_v28  ;;  %v572_v41 = vsel %vm262_vm1, %v531_v23, 0.0  ;;  %v1778_v37 = vsub.f32 %v1573_v43, %v1677_v30  ;;  %v534_v10 = vmul.f32 %v1764_v31, %v1764_v31 }
 0x1ed   : > { %v561_v59 = vadd.f32 %v560_v57, %v559_v54  ;;  %v574_v48 = vsel %vm262_vm1, %v532_v36, 0.0  ;;  %v1785_v40 = vsub.f32 %v1578_v46, %v1677_v30  ;;  %v535_v51 = vmul.f32 %v1771_v34, %v1771_v34 }
 0x1ee   : > { %v576_v53 = vsel %vm262_vm1, %v533_v39, 0.0  ;;  %v1792_v43 = vsub.f32 %v1583_v49, %v1677_v30  ;;  %v536_v56 = vmul.f32 %v1778_v37, %v1778_v37  ;;  %v578_v57 = vsel %vm262_vm1, %v534_v10, 0.0 }
 0x1ef   : > { %v563_v63 = vadd.f32 %v562_v62, %v561_v59  ;;  %v1799_v46 = vsub.f32 %v1588_v52, %v1677_v30  ;;  %v537_v60 = vmul.f32 %v1785_v40, %v1785_v40  ;;  %v580_v62 = vsel %vm262_vm1, %v535_v51, 0.0 }
 0x1f0   : > { %v1806_v49 = vsub.f32 %v1593_v55, %v1677_v30  ;;  %v538_v8 = vmul.f32 %v1792_v43, %v1792_v43  ;;  %v1813_v52 = vsub.f32 %v1598_v58, %v1677_v30  ;;  %v1820_v55 = vsub.f32 %v1603_v61, %v1677_v30 }
 0x1f1   : > { %v565_v12 = vadd.f32 %v564_v9, %v563_v63  ;;  %v582_v9 = vsel %vm262_vm1, %v536_v56, 0.0  ;;  %v539_v14 = vmul.f32 %v1799_v46, %v1799_v46  ;;  %v1827_v58 = vsub.f32 %v1608_v7, %v1677_v30 }
 0x1f2   : > { %v540_v23 = vmul.f32 %v1806_v49, %v1806_v49  ;;  %v541_v36 = vmul.f32 %v1813_v52, %v1813_v52  ;;  %v1834_v61 = vsub.f32 %v1613_v11, %v1677_v30  ;;  %v542_v39 = vmul.f32 %v1820_v55, %v1820_v55 }
 0x1f3   : > { %v567_v18 = vadd.f32 %v566_v17, %v565_v12  ;;  %v584_v17 = vsel %vm262_vm1, %v537_v60, 0.0  ;;  %v1841_v7 = vsub.f32 %v1618_v15, %v1677_v30  ;;  %v543_v10 = vmul.f32 %v1827_v58, %v1827_v58 }
 0x1f4   : > { %v1848_v11 = vsub.f32 %v1623_v20, %v1677_v30  ;;  %v544_v51 = vmul.f32 %v1834_v61, %v1834_v61  ;;  %v1855_v15 = vsub.f32 %v1628_v24, %v1677_v30  ;;  %v1862_v20 = vsub.f32 %v1633_v29, %v1677_v30 }
 0x1f5   : > { %v569_v35 = vadd.f32 %v568_v26, %v567_v18  ;;  %v586_v26 = vsel %vm262_vm1, %v538_v8, 0.0  ;;  %v545_v56 = vmul.f32 %v1841_v7, %v1841_v7  ;;  %v1869_v24 = vsub.f32 %v1638_v33, %v1677_v30 }
 0x1f6   : > { %v546_v60 = vmul.f32 %v1848_v11, %v1848_v11  ;;  %v547_v8 = vmul.f32 %v1855_v15, %v1855_v15  ;;  %v1876_v29 = vsub.f32 %v1643_v38, %v1677_v30  ;;  %v1883_v33 = vsub.f32 %v1648_v42, %v1677_v30 }
 0x1f7   : > { %v571_v6 = vadd.f32 %v570_v4, %v569_v35  ;;  %v588_v4 = vsel %vm262_vm1, %v539_v14, 0.0  ;;  %v548_v14 = vmul.f32 %v1862_v20, %v1862_v20  ;;  %v1890_v38 = vsub.f32 %v1653_v47, %v1677_v30 }
 0x1f8   : > { %v551_v42 = vmul.f32 %v1883_v33, %v1883_v33 }
 0x1f9   : > { %v573_v44 = vadd.f32 %v572_v41, %v571_v6  ;;  %v590_v41 = vsel %vm262_vm1, %v540_v23, 0.0  ;;  %v549_v23 = vmul.f32 %v1869_v24, %v1869_v24 }
 0x1fa   : > { %v612_v47 = vsel %vm262_vm1, %v551_v42, 0.0 }
 0x1fb   : > { %v575_v50 = vadd.f32 %v574_v48, %v573_v44  ;;  %v592_v48 = vsel %vm262_vm1, %v541_v36, 0.0  ;;  %v550_v36 = vmul.f32 %v1876_v29, %v1876_v29 }
 0x1fd   : > { %v577_v54 = vadd.f32 %v576_v53, %v575_v50  ;;  %v594_v53 = vsel %vm262_vm1, %v542_v39, 0.0  ;;  %v608_v39 = vsel %vm262_vm1, %v549_v23, 0.0 }
 0x1ff   : > { %v579_v59 = vadd.f32 %v578_v57, %v577_v54  ;;  %v596_v57 = vsel %vm262_vm1, %v543_v10, 0.0  ;;  %v610_v10 = vsel %vm262_vm1, %v550_v36, 0.0 }
 0x201   : > { %v581_v63 = vadd.f32 %v580_v62, %v579_v59  ;;  %v598_v62 = vsel %vm262_vm1, %v544_v51, 0.0 }
 0x203   : > { %v583_v12 = vadd.f32 %v582_v9, %v581_v63  ;;  %v600_v9 = vsel %vm262_vm1, %v545_v56, 0.0 }
 0x205   : > { %v585_v18 = vadd.f32 %v584_v17, %v583_v12  ;;  %v602_v17 = vsel %vm262_vm1, %v546_v60, 0.0 }
 0x207   : > { %v587_v35 = vadd.f32 %v586_v26, %v585_v18  ;;  %v604_v26 = vsel %vm262_vm1, %v547_v8, 0.0 }
 0x209   : > { %v589_v6 = vadd.f32 %v588_v4, %v587_v35  ;;  %v606_v4 = vsel %vm262_vm1, %v548_v14, 0.0 }
 0x20b   : > { %v591_v44 = vadd.f32 %v590_v41, %v589_v6 }
 0x20d   : > { %v593_v50 = vadd.f32 %v592_v48, %v591_v44  ;;  %v552_v44 = vmul.f32 %v1890_v38, %v1890_v38 }
 0x20f   : > { %v595_v54 = vadd.f32 %v594_v53, %v593_v50  ;;  %v614_v50 = vsel %vm262_vm1, %v552_v44, 0.0 }
 0x211   : > { %v597_v59 = vadd.f32 %v596_v57, %v595_v54 }
 0x213   : > { %v599_v63 = vadd.f32 %v598_v62, %v597_v59 }
 0x215   : > { %v601_v12 = vadd.f32 %v600_v9, %v599_v63 }
 0x217   : > { %v603_v18 = vadd.f32 %v602_v17, %v601_v12 }
 0x219   : > { %v605_v35 = vadd.f32 %v604_v26, %v603_v18 }
 0x21b   : > { %v607_v6 = vadd.f32 %v606_v4, %v605_v35  ;;  %v1914_v4 = vld [vmem:[%s2269_s3] ss:$0 sm:$0xff] }
 0x21d   : > { %v609_v41 = vadd.f32 %v608_v39, %v607_v6 }
 0x21f   : > { %v611_v48 = vadd.f32 %v610_v10, %v609_v41 }
 0x221   : > { %v613_v30 = vadd.f32 %v612_v47, %v611_v48 }
 0x223   : > { %v615_v51 = vadd.f32 %v614_v50, %v613_v30 }
 0x225   : > { %v616_v53 = vrot.slane %v615_v51, 4 }
 0x227   : > { %v617_v54 = vadd.f32 %v616_v53, %v615_v51 }
 0x229   : > { %v618_v56 = vrot.slane %v617_v54, 2 }
 0x22b   : > { %v619_v57 = vadd.f32 %v618_v56, %v617_v54 }
 0x22d   : > { %v620_v59 = vrot.slane %v619_v57, 1 }
 0x22f   : > { %v621_v60 = vadd.f32 %v620_v59, %v619_v57 }
 0x231   : > { %1274 = vmatmul.mubr.msk.f32.vlgmr.msra.gmra.mxu1 %vm262_vm1, %v621_v60 }
 0x2f1   : > { %v691_v62 = vpop.f32.mrf.mxu1 }
 0x2f2   : > { %v695_v63 = vmul.f32 0.0009765625, %v691_v62 }
 0x2f3   : > { %v1275_v8 = vpop.f32.mrf.mxu1 }
 0x2f4   : > { %v696_v9 = vadd.f32 1e-05, %v695_v63 }
 0x2f6   : > { %1291 = vrsqrt.f32 %v696_v9 }
 0x303   : > { %v1292_v12 = vpop.eup %1291 }
 0x304   : > { %1279 = vmatmul.mubr.msk.f32.vlgmr.msra.gmra.mxu0 %vm407_vm3, %v1292_v12 }
 0x3c4   : > { %v767_v14 = vpop.f32.mrf.mxu0 }
 0x3c5   : > { %v774_v18 = vrot.slane %v767_v14, %v487_v27 }
 0x3c6   : > { %v1280_v17 = vpop.f32.mrf.mxu0 }
 0x3c7   : > { %v775_v23 = vmul.f32 %v774_v18, %v1681_v0  ;;  %v776_v26 = vmul.f32 %v774_v18, %v1685_v1  ;;  %v777_v35 = vmul.f32 %v774_v18, %v1689_v2  ;;  %v778_v36 = vmul.f32 %v774_v18, %v1693_v32 }
 0x3c8   : > { %v779_v6 = vmul.f32 %v774_v18, %v1701_v3  ;;  %v780_v42 = vmul.f32 %v774_v18, %v1707_v5  ;;  %v781_v21 = vmul.f32 %v774_v18, %v1715_v45  ;;  %v782_v27 = vmul.f32 %v774_v18, %v1722_v13 }
 0x3c9   : > { %v783_v0 = vmul.f32 %v774_v18, %v1729_v16  ;;  %v784_v1 = vmul.f32 %v774_v18, %v1736_v19  ;;  %v785_v2 = vmul.f32 %v774_v18, %v1743_v22  ;;  %v786_v32 = vmul.f32 %v774_v18, %v1750_v25  ;;  %v1935_v22 = vld [vmem:[%s2270_s4] ss:$0 sm:$0xff] }
 0x3ca   : > { %v787_v39 = vmul.f32 %v774_v18, %v1757_v28  ;;  %v788_v41 = vmul.f32 %v774_v18, %v1764_v31  ;;  %v789_v3 = vmul.f32 %v774_v18, %v1771_v34  ;;  %v790_v5 = vmul.f32 %v774_v18, %v1778_v37 }
 0x3cb   : > { %v791_v45 = vmul.f32 %v774_v18, %v1785_v40  ;;  %v813_v13 = vmul.f32 %v1914_v4, %v775_v23  ;;  %v814_v16 = vmul.f32 %v1914_v4, %v776_v26  ;;  %v815_v19 = vmul.f32 %v1914_v4, %v777_v35 }
 0x3cc   : > { %v792_v25 = vmul.f32 %v774_v18, %v1792_v43  ;;  %v793_v28 = vmul.f32 %v774_v18, %v1799_v46  ;;  %v794_v31 = vmul.f32 %v774_v18, %v1806_v49  ;;  %v816_v34 = vmul.f32 %v1914_v4, %v778_v36 }
 0x3cd   : > { %v1942_v37 = vmul.f32 %v774_v18, %v1813_v52  ;;  %v1945_v40 = vmul.f32 %v774_v18, %v1820_v55  ;;  %v1948_v44 = vmul.f32 %v774_v18, %v1827_v58  ;;  %v817_v10 = vmul.f32 %v1914_v4, %v779_v6 }
 0x3ce   : > { %v1952_v48 = vmul.f32 %v774_v18, %v1834_v61  ;;  %v1955_v43 = vmul.f32 %v774_v18, %v1841_v7  ;;  %v1958_v46 = vmul.f32 %v774_v18, %v1848_v11  ;;  %v818_v49 = vmul.f32 %v1914_v4, %v780_v42 }
 0x3cf   : > { %v819_v52 = vmul.f32 %v1914_v4, %v781_v21  ;;  %v1963_v55 = vadd.f32 %v1935_v22, %v813_v13  ;;  %v1966_v58 = vadd.f32 %v1935_v22, %v814_v16  ;;  %v1969_v47 = vadd.f32 %v1935_v22, %v815_v19 }
 0x3d0   : > { %v1972_v61 = vmul.f32 %v774_v18, %v1855_v15  ;;  %v1975_v7 = vmul.f32 %v774_v18, %v1862_v20  ;;  %v820_v11 = vmul.f32 %v1914_v4, %v782_v27  ;;  %v1979_v30 = vadd.f32 %v1935_v22, %v816_v34 }
 0x3d1   : > { %v1982_v50 = vmul.f32 %v774_v18, %v1869_v24  ;;  %v1985_v51 = vmul.f32 %v774_v18, %v1876_v29  ;;  %v821_v53 = vmul.f32 %v1914_v4, %v783_v0  ;;  %v1989_v54 = vadd.f32 %v1935_v22, %v817_v10 }
 0x3d2   : > { %v1992_v15 = vmul.f32 %v774_v18, %v1883_v33  ;;  %v822_v20 = vmul.f32 %v1914_v4, %v784_v1  ;;  %v823_v56 = vmul.f32 %v1914_v4, %v785_v2  ;;  %v1997_v57 = vadd.f32 %v1935_v22, %v818_v49 }
 0x3d3   : > { %v2000_v24 = vadd.f32 %v1935_v22, %v819_v52  ;;  %v1211_v29 = vmul.f32 -1.442695, %v1963_v55  ;;  %v1212_v59 = vmul.f32 -1.442695, %v1966_v58  ;;  %v1213_v60 = vmul.f32 -1.442695, %v1969_v47 }
 0x3d4   : > { %v2006_v62 = vmul.f32 %v774_v18, %v1890_v38  ;;  %v824_v33 = vmul.f32 %v1914_v4, %v786_v32  ;;  %v2010_v63 = vadd.f32 %v1935_v22, %v820_v11  ;;  %v1214_v8 = vmul.f32 -1.442695, %v1979_v30 }
 0x3d5   : > { %v825_v9 = vmul.f32 %v1914_v4, %v787_v39  ;;  %v2015_v12 = vadd.f32 %v1935_v22, %v821_v53  ;;  %1293 = vpow2.f32 %v1211_v29  ;;  %v1215_v14 = vmul.f32 -1.442695, %v1989_v54 }
 0x3d6   : > { %v826_v17 = vmul.f32 %v1914_v4, %v788_v41  ;;  %v2020_v38 = vadd.f32 %v1935_v22, %v822_v20  ;;  %1295 = vpow2.f32 %v1212_v59  ;;  %v1216_v18 = vmul.f32 -1.442695, %v1997_v57 }
 0x3d7   : > { %v827_v23 = vmul.f32 %v1914_v4, %v789_v3  ;;  %v2025_v26 = vadd.f32 %v1935_v22, %v823_v56  ;;  %1297 = vpow2.f32 %v1213_v60  ;;  %v1217_v35 = vmul.f32 -1.442695, %v2000_v24 }
 0x3d8   : > { %v828_v36 = vmul.f32 %v1914_v4, %v790_v5  ;;  %v2030_v6 = vadd.f32 %v1935_v22, %v824_v33  ;;  %1299 = vpow2.f32 %v1214_v8  ;;  %v1218_v42 = vmul.f32 -1.442695, %v2010_v63 }
 0x3d9   : > { %v829_v21 = vmul.f32 %v1914_v4, %v791_v45  ;;  %v2035_v27 = vadd.f32 %v1935_v22, %v825_v9  ;;  %1301 = vpow2.f32 %v1215_v14  ;;  %v1219_v0 = vmul.f32 -1.442695, %v2015_v12 }
 0x3da   : > { %v830_v1 = vmul.f32 %v1914_v4, %v792_v25  ;;  %v2040_v2 = vadd.f32 %v1935_v22, %v826_v17  ;;  %1303 = vpow2.f32 %v1216_v18  ;;  %v1220_v32 = vmul.f32 -1.442695, %v2020_v38 }
 0x3db   : > { %v831_v39 = vmul.f32 %v1914_v4, %v793_v28  ;;  %v2045_v41 = vadd.f32 %v1935_v22, %v827_v23  ;;  %1305 = vpow2.f32 %v1217_v35  ;;  %v1221_v3 = vmul.f32 -1.442695, %v2025_v26 }
 0x3dc   : > { %v832_v5 = vmul.f32 %v1914_v4, %v794_v31  ;;  %v2050_v45 = vadd.f32 %v1935_v22, %v828_v36  ;;  %1307 = vpow2.f32 %v1218_v42  ;;  %v1222_v13 = vmul.f32 -1.442695, %v2030_v6 }
 0x3dd   : > { %v833_v16 = vmul.f32 %v1914_v4, %v1942_v37  ;;  %v2056_v19 = vadd.f32 %v1935_v22, %v829_v21  ;;  %1309 = vpow2.f32 %v1219_v0  ;;  %v1223_v25 = vmul.f32 -1.442695, %v2035_v27 }
 0x3de   : > { %v834_v28 = vmul.f32 %v1914_v4, %v1945_v40  ;;  %v2062_v31 = vadd.f32 %v1935_v22, %v830_v1  ;;  %1311 = vpow2.f32 %v1220_v32  ;;  %v1224_v34 = vmul.f32 -1.442695, %v2040_v2 }
 0x3df   : > { %v835_v10 = vmul.f32 %v1914_v4, %v1948_v44  ;;  %v2068_v37 = vadd.f32 %v1935_v22, %v831_v39  ;;  %1313 = vpow2.f32 %v1221_v3  ;;  %v1225_v49 = vmul.f32 -1.442695, %v2045_v41 }
 0x3e0   : > { %v836_v52 = vmul.f32 %v1914_v4, %v1952_v48  ;;  %v2074_v40 = vadd.f32 %v1935_v22, %v832_v5  ;;  %1315 = vpow2.f32 %v1222_v13  ;;  %v1226_v11 = vmul.f32 -1.442695, %v2050_v45 }
 0x3e1   : > { %v837_v53 = vmul.f32 %v1914_v4, %v1955_v43  ;;  %v2080_v44 = vadd.f32 %v1935_v22, %v833_v16  ;;  %1317 = vpow2.f32 %v1223_v25  ;;  %v1227_v20 = vmul.f32 -1.442695, %v2056_v19 }
 0x3e2   : > { %v2083_v56 = vpop.eup %1293  ;;  %v838_v48 = vmul.f32 %v1914_v4, %v1958_v46  ;;  %v2088_v29 = vadd.f32 %v1935_v22, %v834_v28  ;;  %1319 = vpow2.f32 %v1224_v34  ;;  %v1228_v59 = vmul.f32 -1.442695, %v2062_v31 }
 0x3e3   : > { %v1296_v60 = vpop.eup %1295  ;;  %v839_v43 = vmul.f32 %v1914_v4, %v1972_v61  ;;  %v2094_v33 = vadd.f32 %v1935_v22, %v835_v10  ;;  %1321 = vpow2.f32 %v1225_v49  ;;  %v1229_v8 = vmul.f32 -1.442695, %v2068_v37 }
 0x3e4   : > { %v1298_v9 = vpop.eup %1297  ;;  %v840_v46 = vmul.f32 %v1914_v4, %v1975_v7  ;;  %v2100_v14 = vadd.f32 %v1935_v22, %v836_v52  ;;  %1323 = vpow2.f32 %v1226_v11  ;;  %v1230_v17 = vmul.f32 -1.442695, %v2074_v40 }
 0x3e5   : > { %v1300_v18 = vpop.eup %1299  ;;  %v841_v61 = vmul.f32 %v1914_v4, %v1982_v50  ;;  %v2106_v23 = vadd.f32 %v1935_v22, %v837_v53  ;;  %1325 = vpow2.f32 %v1227_v20  ;;  %v1231_v35 = vmul.f32 -1.442695, %v2080_v44 }
 0x3e6   : > { %v1302_v36 = vpop.eup %1301  ;;  %v842_v7 = vmul.f32 %v1914_v4, %v1985_v51  ;;  %v2112_v42 = vadd.f32 %v1935_v22, %v838_v48  ;;  %1327 = vpow2.f32 %v1228_v59  ;;  %v1232_v21 = vmul.f32 -1.442695, %v2088_v29 }
 0x3e7   : > { %v1304_v0 = vpop.eup %1303  ;;  %v843_v50 = vmul.f32 %v1914_v4, %v1992_v15  ;;  %v2118_v1 = vadd.f32 %v1935_v22, %v839_v43  ;;  %1329 = vpow2.f32 %v1229_v8  ;;  %v1233_v32 = vmul.f32 -1.442695, %v2094_v33 }
 0x3e8   : > { %v1306_v39 = vpop.eup %1305  ;;  %v844_v51 = vmul.f32 %v1914_v4, %v2006_v62  ;;  %v2124_v3 = vadd.f32 %v1935_v22, %v840_v46  ;;  %1331 = vpow2.f32 %v1230_v17  ;;  %v1234_v5 = vmul.f32 -1.442695, %v2100_v14 }
 0x3e9   : > { %v1308_v13 = vpop.eup %1307  ;;  %v2128_v16 = vadd.f32 %v1935_v22, %v841_v61  ;;  %1333 = vpow2.f32 %v1231_v35  ;;  %v1235_v15 = vmul.f32 -1.442695, %v2106_v23  ;;  %v2132_v28 = vadd.f32 %v1935_v22, %v842_v7 }
 0x3ea   : > { %v1310_v25 = vpop.eup %1309  ;;  %1335 = vpow2.f32 %v1232_v21  ;;  %v1236_v4 = vmul.f32 -1.442695, %v2112_v42  ;;  %v2136_v34 = vadd.f32 %v1935_v22, %v843_v50  ;;  %v1237_v10 = vmul.f32 -1.442695, %v2118_v1 }
 0x3eb   : > { %v1312_v62 = vpop.eup %1311  ;;  %1337 = vpow2.f32 %v1233_v32  ;;  %v2140_v52 = vadd.f32 %v1935_v22, %v844_v51  ;;  %v1238_v11 = vmul.f32 -1.442695, %v2124_v3  ;;  %v1239_v20 = vmul.f32 -1.442695, %v2128_v16 }
 0x3ec   : > { %v1314_v49 = vpop.eup %1313  ;;  %1339 = vpow2.f32 %v1234_v5  ;;  %v1240_v59 = vmul.f32 -1.442695, %v2132_v28  ;;  %v1241_v8 = vmul.f32 -1.442695, %v2136_v34  ;;  %v979_v61 = vadd.f32 1.0, %v2083_v56 }
 0x3ed   : > { %2273 = vst [vmem:[#allocation2_spill] sm:$0xff] %v2140_v52  ;;  %v1316_v53 = vpop.eup %1315  ;;  %1341 = vpow2.f32 %v1235_v15  ;;  %v1242_v22 = vmul.f32 -1.442695, %v2140_v52  ;;  %v980_v7 = vadd.f32 1.0, %v1296_v60  ;;  %v981_v50 = vadd.f32 1.0, %v1298_v9 }
 0x3ee   : > { %v1318_v48 = vpop.eup %1317  ;;  %1343 = vpow2.f32 %v1236_v4  ;;  %v982_v51 = vadd.f32 1.0, %v1300_v18  ;;  %v983_v15 = vadd.f32 1.0, %v1302_v36  ;;  %v985_v52 = vadd.f32 1.0, %v1306_v39 }
 0x3ef   : > { %v1320_v43 = vpop.eup %1319  ;;  %1345 = vpow2.f32 %v1237_v10  ;;  %v984_v10 = vadd.f32 1.0, %v1304_v0  ;;  %v986_v56 = vadd.f32 1.0, %v1308_v13  ;;  %v987_v60 = vadd.f32 1.0, %v1310_v25 }
 0x3f0   : > { %v1322_v46 = vpop.eup %1321  ;;  %1347 = vpow2.f32 %v1238_v11  ;;  %v988_v9 = vadd.f32 1.0, %v1312_v62  ;;  %v989_v18 = vadd.f32 1.0, %v1314_v49  ;;  %v992_v13 = vadd.f32 1.0, %v1320_v43 }
 0x3f1   : > { %v1324_v17 = vpop.eup %1323  ;;  %1349 = vpow2.f32 %v1239_v20  ;;  %v993_v25 = vadd.f32 1.0, %v1322_v46 }
 0x3f2   : > { %v1326_v35 = vpop.eup %1325  ;;  %1351 = vpow2.f32 %v1240_v59 }
 0x3f3   : > { %v1328_v21 = vpop.eup %1327  ;;  %1353 = vpow2.f32 %v1241_v8 }
 0x3f4   : > { %v1330_v32 = vpop.eup %1329  ;;  %1355 = vpow2.f32 %v1242_v22 }
 0x3f5   : > { %v1332_v5 = vpop.eup %1331  ;;  %1357 = vrcp.f32 %v979_v61  ;;  %v990_v61 = vadd.f32 1.0, %v1316_v53  ;;  %v997_v46 = vadd.f32 1.0, %v1330_v32 }
 0x3f6   : > { %v1334_v4 = vpop.eup %1333  ;;  %1359 = vrcp.f32 %v980_v7  ;;  %v991_v7 = vadd.f32 1.0, %v1318_v48  ;;  %v996_v48 = vadd.f32 1.0, %v1328_v21 }
 0x3f7   : > { %v1336_v11 = vpop.eup %1335  ;;  %1361 = vrcp.f32 %v981_v50 }
 0x3f8   : > { %v1338_v20 = vpop.eup %1337  ;;  %1363 = vrcp.f32 %v982_v51  ;;  %v994_v51 = vadd.f32 1.0, %v1324_v17  ;;  %v1000_v32 = vadd.f32 1.0, %v1336_v11 }
 0x3f9   : > { %v1340_v59 = vpop.eup %1339  ;;  %1365 = vrcp.f32 %v983_v15 }
 0x3fa   : > { %v1342_v8 = vpop.eup %1341  ;;  %1367 = vrcp.f32 %v984_v10  ;;  %v998_v10 = vadd.f32 1.0, %v1332_v5  ;;  %v1001_v5 = vadd.f32 1.0, %v1338_v20 }
 0x3fb   : > { %v1344_v22 = vpop.eup %1343  ;;  %1369 = vrcp.f32 %v985_v52  ;;  %v995_v52 = vadd.f32 1.0, %v1326_v35  ;;  %v1003_v11 = vadd.f32 1.0, %v1342_v8 }
 0x3fc   : > { %v1346_v36 = vpop.eup %1345  ;;  %1371 = vrcp.f32 %v986_v56  ;;  %v1004_v20 = vadd.f32 1.0, %v1344_v22 }
 0x3fd   : > { %v1348_v0 = vpop.eup %1347  ;;  %1373 = vrcp.f32 %v987_v60  ;;  %v999_v60 = vadd.f32 1.0, %v1334_v4  ;;  %v1002_v4 = vadd.f32 1.0, %v1340_v59  ;;  %v1005_v59 = vadd.f32 1.0, %v1346_v36 }
 0x3fe   : > { %v2148_v39 = vpop.eup %1349  ;;  %1375 = vrcp.f32 %v988_v9  ;;  %v1006_v8 = vadd.f32 1.0, %v1348_v0 }
 0x3ff   : > { %v2150_v50 = vpop.eup %1351  ;;  %1377 = vrcp.f32 %v989_v18  ;;  %v1007_v22 = vadd.f32 1.0, %v2148_v39 }
 0x400   : > { %v2152_v62 = vpop.eup %1353  ;;  %1379 = vrcp.f32 %v990_v61 }
 0x401   : > { %v2154_v49 = vpop.eup %1355  ;;  %1381 = vrcp.f32 %v991_v7 }
 0x402   : > { %v1358_v53 = vpop.eup %1357  ;;  %1383 = vrcp.f32 %v992_v13 }
 0x403   : > { %v1360_v43 = vpop.eup %1359  ;;  %1385 = vrcp.f32 %v993_v25  ;;  %v1075_v17 = vmul.f32 %v1358_v53, %v1963_v55  ;;  %v1009_v53 = vadd.f32 1.0, %v2152_v62 }
 0x404   : > { %v1362_v15 = vpop.eup %1361  ;;  %1387 = vrcp.f32 %v994_v51  ;;  %v1076_v35 = vmul.f32 %v1360_v43, %v1966_v58 }
 0x405   : > { %v1364_v56 = vpop.eup %1363  ;;  %1389 = vrcp.f32 %v995_v52  ;;  %v1077_v9 = vmul.f32 %v1362_v15, %v1969_v47  ;;  %1107 = vst.msk [vmem:[%s2161_s11] sm:$0xff] %vm262_vm1, %v1075_v17  ;;  %v1008_v52 = vadd.f32 1.0, %v2150_v50 }
 0x406   : > { %v1366_v21 = vpop.eup %1365  ;;  %1391 = vrcp.f32 %v996_v48  ;;  %v1078_v18 = vmul.f32 %v1364_v56, %v1979_v30  ;;  %1108 = vst.msk [vmem:[%s2161_s11 + $0x8] sm:$0xff] %vm262_vm1, %v1076_v35  ;;  %v1010_v48 = vadd.f32 1.0, %v2154_v49 }
 0x407   : > { %v1368_v55 = vpop.eup %1367  ;;  %1393 = vrcp.f32 %v997_v46  ;;  %v1079_v58 = vmul.f32 %v1366_v21, %v1989_v54  ;;  %1109 = vst.msk [vmem:[%s2161_s11 + $0x10] sm:$0xff] %vm262_vm1, %v1077_v9 }
 0x408   : > { %v1370_v47 = vpop.eup %1369  ;;  %1395 = vrcp.f32 %v998_v10  ;;  %v1080_v61 = vmul.f32 %v1368_v55, %v1997_v57  ;;  %1110 = vst.msk [vmem:[%s2161_s11 + $0x18] sm:$0xff] %vm262_vm1, %v1078_v18 }
 0x409   : > { %v1372_v30 = vpop.eup %1371  ;;  %1397 = vrcp.f32 %v999_v60  ;;  %v1081_v7 = vmul.f32 %v1370_v47, %v2000_v24  ;;  %1111 = vst.msk [vmem:[%s2161_s11 + $0x20] sm:$0xff] %vm262_vm1, %v1079_v58 }
 0x40a   : > { %v1374_v54 = vpop.eup %1373  ;;  %1399 = vrcp.f32 %v1000_v32  ;;  %v1082_v13 = vmul.f32 %v1372_v30, %v2010_v63  ;;  %1112 = vst.msk [vmem:[%s2161_s11 + $0x28] sm:$0xff] %vm262_vm1, %v1080_v61 }
 0x40b   : > { %v1376_v57 = vpop.eup %1375  ;;  %1401 = vrcp.f32 %v1001_v5  ;;  %v1083_v25 = vmul.f32 %v1374_v54, %v2015_v12  ;;  %1113 = vst.msk [vmem:[%s2161_s11 + $0x30] sm:$0xff] %vm262_vm1, %v1081_v7 }
 0x40c   : > { %v1378_v24 = vpop.eup %1377  ;;  %1403 = vrcp.f32 %v1002_v4  ;;  %v1084_v51 = vmul.f32 %v1376_v57, %v2020_v38  ;;  %1114 = vst.msk [vmem:[%s2161_s11 + $0x38] sm:$0xff] %vm262_vm1, %v1082_v13  ;;  %v2274_v4 = vld [vmem:[#allocation2_spill] sm:$0xff] }
 0x40d   : > { %v1380_v63 = vpop.eup %1379  ;;  %1405 = vrcp.f32 %v1003_v11  ;;  %v1085_v36 = vmul.f32 %v1378_v24, %v2025_v26  ;;  %1115 = vst.msk [vmem:[%s2161_s11 + $0x40] sm:$0xff] %vm262_vm1, %v1083_v25 }
 0x40e   : > { %v1382_v12 = vpop.eup %1381  ;;  %1407 = vrcp.f32 %v1004_v20  ;;  %v1086_v0 = vmul.f32 %v1380_v63, %v2030_v6  ;;  %1116 = vst.msk [vmem:[%s2161_s11 + $0x48] sm:$0xff] %vm262_vm1, %v1084_v51 }
 0x40f   : > { %v1384_v38 = vpop.eup %1383  ;;  %1409 = vrcp.f32 %v1005_v59  ;;  %v1087_v39 = vmul.f32 %v1382_v12, %v2035_v27  ;;  %1117 = vst.msk [vmem:[%s2161_s11 + $0x50] sm:$0xff] %vm262_vm1, %v1085_v36 }
 0x410   : > { %v1386_v26 = vpop.eup %1385  ;;  %1411 = vrcp.f32 %v1006_v8  ;;  %v1088_v50 = vmul.f32 %v1384_v38, %v2040_v2  ;;  %1118 = vst.msk [vmem:[%s2161_s11 + $0x58] sm:$0xff] %vm262_vm1, %v1086_v0 }
 0x411   : > { %v1388_v6 = vpop.eup %1387  ;;  %1413 = vrcp.f32 %v1007_v22  ;;  %v1089_v62 = vmul.f32 %v1386_v26, %v2045_v41  ;;  %1119 = vst.msk [vmem:[%s2161_s11 + $0x60] sm:$0xff] %vm262_vm1, %v1087_v39 }
 0x412   : > { %v1390_v27 = vpop.eup %1389  ;;  %1415 = vrcp.f32 %v1008_v52  ;;  %v1090_v43 = vmul.f32 %v1388_v6, %v2050_v45  ;;  %1120 = vst.msk [vmem:[%s2161_s11 + $0x68] sm:$0xff] %vm262_vm1, %v1088_v50 }
 0x413   : > { %v1392_v49 = vpop.eup %1391  ;;  %1417 = vrcp.f32 %v1009_v53  ;;  %v1091_v2 = vmul.f32 %v1390_v27, %v2056_v19  ;;  %1121 = vst.msk [vmem:[%s2161_s11 + $0x70] sm:$0xff] %vm262_vm1, %v1089_v62 }
 0x414   : > { %v1394_v46 = vpop.eup %1393  ;;  %1419 = vrcp.f32 %v1010_v48  ;;  %v1092_v41 = vmul.f32 %v1392_v49, %v2062_v31  ;;  %1122 = vst.msk [vmem:[%s2161_s11 + $0x78] sm:$0xff] %vm262_vm1, %v1090_v43 }
 0x415   : > { %v1396_v17 = vpop.eup %1395  ;;  %v1093_v45 = vmul.f32 %v1394_v46, %v2068_v37  ;;  %1123 = vst.msk [vmem:[%s2161_s11 + $0x80] sm:$0xff] %vm262_vm1, %v1091_v2 }
 0x416   : > { %v1398_v15 = vpop.eup %1397  ;;  %v1094_v10 = vmul.f32 %v1396_v17, %v2074_v40  ;;  %1124 = vst.msk [vmem:[%s2161_s11 + $0x88] sm:$0xff] %vm262_vm1, %v1092_v41 }
 0x417   : > { %v1400_v19 = vpop.eup %1399  ;;  %v1095_v35 = vmul.f32 %v1398_v15, %v2080_v44  ;;  %1125 = vst.msk [vmem:[%s2161_s11 + $0x90] sm:$0xff] %vm262_vm1, %v1093_v45 }
 0x418   : > { %v1402_v31 = vpop.eup %1401  ;;  %v1096_v56 = vmul.f32 %v1400_v19, %v2088_v29  ;;  %1126 = vst.msk [vmem:[%s2161_s11 + $0x98] sm:$0xff] %vm262_vm1, %v1094_v10 }
 0x419   : > { %v1404_v37 = vpop.eup %1403  ;;  %v1097_v60 = vmul.f32 %v1402_v31, %v2094_v33  ;;  %1127 = vst.msk [vmem:[%s2161_s11 + $0xa0] sm:$0xff] %vm262_vm1, %v1095_v35 }
 0x41a   : > { %v1406_v40 = vpop.eup %1405  ;;  %v1098_v9 = vmul.f32 %v1404_v37, %v2100_v14  ;;  %1128 = vst.msk [vmem:[%s2161_s11 + $0xa8] sm:$0xff] %vm262_vm1, %v1096_v56 }
 0x41b   : > { %v1408_v44 = vpop.eup %1407  ;;  %v1099_v21 = vmul.f32 %v1406_v40, %v2106_v23  ;;  %1129 = vst.msk [vmem:[%s2161_s11 + $0xb0] sm:$0xff] %vm262_vm1, %v1097_v60 }
 0x41c   : > { %v1410_v29 = vpop.eup %1409  ;;  %v1100_v32 = vmul.f32 %v1408_v44, %v2112_v42  ;;  %1130 = vst.msk [vmem:[%s2161_s11 + $0xb8] sm:$0xff] %vm262_vm1, %v1098_v9 }
 0x41d   : > { %v1412_v33 = vpop.eup %1411  ;;  %v1101_v18 = vmul.f32 %v1410_v29, %v2118_v1  ;;  %1131 = vst.msk [vmem:[%s2161_s11 + $0xc0] sm:$0xff] %vm262_vm1, %v1099_v21 }
 0x41e   : > { %v1414_v14 = vpop.eup %1413  ;;  %v1102_v23 = vmul.f32 %v1412_v33, %v2124_v3  ;;  %1132 = vst.msk [vmem:[%s2161_s11 + $0xc8] sm:$0xff] %vm262_vm1, %v1100_v32 }
 0x41f   : > { %v1416_v55 = vpop.eup %1415  ;;  %v1103_v5 = vmul.f32 %v1414_v14, %v2128_v16  ;;  %1133 = vst.msk [vmem:[%s2161_s11 + $0xd0] sm:$0xff] %vm262_vm1, %v1101_v18 }
 0x420   : > { %v1418_v42 = vpop.eup %1417  ;;  %v1104_v58 = vmul.f32 %v1416_v55, %v2132_v28  ;;  %1134 = vst.msk [vmem:[%s2161_s11 + $0xd8] sm:$0xff] %vm262_vm1, %v1102_v23 }
 0x421   : > { %v1420_v1 = vpop.eup %1419  ;;  %v1105_v47 = vmul.f32 %v1418_v42, %v2136_v34  ;;  %1135 = vst.msk [vmem:[%s2161_s11 + $0xe0] sm:$0xff] %vm262_vm1, %v1103_v5 }
 0x422   : > { %v1106_v61 = vmul.f32 %v1420_v1, %v2274_v4  ;;  %1136 = vst.msk [vmem:[%s2161_s11 + $0xe8] sm:$0xff] %vm262_vm1, %v1104_v58 }
 0x423   : > { %1137 = vst.msk [vmem:[%s2161_s11 + $0xf0] sm:$0xff] %vm262_vm1, %v1105_v47 }
 0x424   : > { %1138 = vst.msk [vmem:[%s2161_s11 + $0xf8] sm:$0xff] %vm262_vm1, %v1106_v61 }
 0x425 PF: > { %s15_s18 = sadd.s32 1, %s1427_s18  }
 0x426   : > { %p12_p4 = scmp.ge.s32.totalorder %s15_s18, 4  }
 0x428   :  { %14 = sbr.rel (!%p12_p4) target bundleno = 1 (0x1), region = 70 }

// kernel: down_block_forward.11
= control target key start
LH: loop header
LB: loop body
LE: loop exit
PB: predicated region body
PF: predicated region fallthrough
CT: control target
= control target key end

     0   :  { %s1050_s12 = smov 0   ;;  %s1052_s13 = smov 0   ;;  %s1199_s0 = inlined_call_operand.vmem [shape: bf16[2,18,18,4], index: 0, kind: input, shape index: {}]   ;;  %s1200_s1 = inlined_call_operand.vmem [shape: bf16[9,4,16], index: 1, kind: input, shape index: {}]   ;;  %s1201_s2 = inlined_call_operand.vmem [shape: f32[1,16], index: 2, kind: input, shape index: {}]   ;;  %s1202_s3 = inlined_call_operand.vmem [shape: f32[2,16,16,16], index: 3, kind: output, shape index: {}]  }
   0x1   :  { %s1054_s14 = smov 0   ;;  %s1056_s15 = smov 0  }
   0x2   :  { %s1058_s16 = smov 0  }
   0x3 LB: > { %s22_s17 = sadd.s32 1, %s1018_s14  ;;  %s25_s18 = sadd.s32 1, %s1022_s15  ;;  %s1026_s16 = sphi %s1058_s16, %s13_s16   ;;  %s1022_s15 = sphi %s1056_s15, %s1206_s15   ;;  %s1018_s14 = sphi %s1054_s14, %s1205_s14   ;;  %s1014_s13 = sphi %s1052_s13, %s1204_s13   ;;  %s1010_s12 = sphi %s1050_s12, %s1203_s12  }
   0x4   : > { %p23_p0 = scmp.ge.s32.totalorder %s22_s17, 16  ;;  %p834_p1 = scmp.ge.s32.totalorder %s1026_s16, 1 }
   0x5   : > { %p151_p2 = scmp.lt.s32.totalorder %s1026_s16, 33 }
   0x6   : > { %s1208_s17 = smov (%p23_p0, %s22_s17), 0  ;;  %s1210_s18 = smov (!%p23_p0, %s25_s18), %s1022_s15 }
   0x7   : > { %p152_p3 = pnand %p834_p1, %p151_p2  ;;  %p27_p4 = scmp.ge.s32.totalorder %s1210_s18, 2 }
   0x8   : > { %p179_p5 = scmp.lt.s32.totalorder (!%p152_p3), %s1014_s13, 1  ;;  %s866_s23 = smul.u32 (!%p152_p3), 12, %s1010_s12 }
   0x9   : > { %s1212_s18 = smov (%p27_p4, %s1210_s18), 0  ;;  %155 = sbr.rel (%p152_p3) target bundleno = 262 (0x106), region = 32 }
   0xa   : > { %p186_p6 = scmp.lt.s32.totalorder (!%p152_p3), %s1010_s12, 15 }
   0xe   : > { %v840_v0 = vld [vmem:[%s1200_s1 + $0x2] sm:$0x3]  ;;  %vm234_vm0 = vcmask 1041408   ;;  %v206_v1 = vld [vmem:[%s1200_s1] sm:$0x3]  ;;  %v1028_v2 = vmov 0.0  }
   0xf   : > { %885 = vmatprep.subr.bf16.mxu0 %v1028_v2  ;;  %v236_v3 = vsel %vm234_vm0, %v840_v0, 0  ;;  %891 = vmatprep.subr.bf16.mxu1 %v1028_v2  ;;  %v282_v4 = vsel %vm234_vm0, %v206_v1, 0  ;;  %vm1029_vm1 = vmmov 0   ;;  %s1214_s13 = smov (!%p179_p5, %s1014_s13), 1  ;;  %v847_v5 = vld [vmem:[%s1200_s1 + $0x6] sm:$0x3] }
  0x10   : > { %886 = vmatpush3.bf16.msra.mxu0 %v236_v3  ;;  %892 = vmatpush3.bf16.msra.mxu1 %v282_v4  ;;  %s939_s24 = smul.u32 216, %s1214_s13  ;;  %vm230_vm2 = vcmask 31744   ;;  %v391_v6 = vsel %vm234_vm0, %v847_v5, 0  ;;  %v845_v14 = vld [vmem:[%s1200_s1 + $0x4] sm:$0x3]  ;;  %vm327_vm4 = vcmask 1046528  }
  0x11   : > { %887 = vmatprep.mubr.msk.bf16.mxu0 %vm1029_vm1, %v1028_v2  ;;  %893 = vmatprep.mubr.msk.bf16.mxu1 %vm1029_vm1, %v1028_v2  ;;  %vm217_vm3 = vsmask.f32 7424  ;;  %v853_v17 = vld [vmem:[%s1200_s1 + $0xa] sm:$0x3]  ;;  %v335_v18 = vsel %vm234_vm0, %v845_v14, 0  ;;  %s1216_s12 = smov (!%p186_p6, %s1010_s12), 15 }
  0x12   : > { %897 = vmatprep.subr.bf16.mxu0 %v1028_v2  ;;  %903 = vmatprep.subr.bf16.mxu1 %v1028_v2  ;;  %s183_s29 = scalar_lea.vmem %s1199_s0, %s939_s24  ;;  %v510_v21 = vsel %vm234_vm0, %v853_v17, 0  ;;  %v850_v26 = vld [vmem:[%s1200_s1 + $0x8] sm:$0x3]  ;;  %v858_v35 = vld [vmem:[%s1200_s1 + $0xe] sm:$0x3]  ;;  %s837_s24 = sshll.u32 %s1214_s13, 5 }
  0x13   : > { %s1108_s30 = scalar_lea.vmem %s183_s29, %s866_s23  ;;  %v456_v36 = vsel %vm234_vm0, %v850_v26, 0  ;;  %v631_v41 = vsel %vm234_vm0, %v858_v35, 0  ;;  %v855_v44 = vld [vmem:[%s1200_s1 + $0xc] sm:$0x3]  ;;  %v861_v50 = vld [vmem:[%s1200_s1 + $0x10] sm:$0x3] }
  0x14   : > { %v982_v7 = vld [vmem:[%s1108_s30] sm:$0xff]   ;;  %v983_v8 = vld [vmem:[%s1108_s30 + $0x8] ss:$0 sps:$4 sm:$0x11]   ;;  %v984_v16 = vld [vmem:[%s1108_s30 + $0xc] sm:$0xff]   ;;  %v566_v48 = vsel %vm234_vm0, %v855_v44, 0 }
  0x15   : > { %v219_v9 = vshrl.u32 %v982_v7, 16  ;;  %v221_v10 = vshll.u32 %v982_v7, 16  ;;  %v226_v11 = vshll.u32 %v983_v8, 16  ;;  %894 = vmatmul.mubr.msk.bf16.vlgmr.msra.gmra.mxu1 %vm230_vm2, %v982_v7  ;;  %v986_v20 = vld [vmem:[%s1108_s30 + $0x18] sm:$0xff]   ;;  %v328_v22 = vrot.slane %v982_v7, 1  ;;  %s836_s23 = sshll.u32 %s1216_s12, 1 }
  0x16   : > { %904 = vmatpush3.bf16.msra.mxu1 %v391_v6  ;;  %905 = vmatprep.mubr.msk.bf16.mxu1 %vm1029_vm1, %v1028_v2  ;;  %v329_v23 = vrot.slane %v983_v8, 1  ;;  %v985_v24 = vld [vmem:[%s1108_s30 + $0x14] ss:$0 sps:$4 sm:$0x11]   ;;  %v443_v25 = vshll.u32 %v984_v16, 16  ;;  %v503_v27 = vrot.slane %v984_v16, 1  ;;  %s190_s25 = sadd.s32 %s837_s24, %s836_s23 }
  0x17   : > { %v223_v12 = vrot.slane %v221_v10, 1  ;;  %v228_v13 = vrot.slane %v226_v11, 1  ;;  %915 = vmatprep.subr.bf16.mxu1 %v1028_v2  ;;  %v504_v28 = vrot.slane %v985_v24, 1  ;;  %v987_v29 = vld [vmem:[%s1108_s30 + $0x20] ss:$0 sps:$4 sm:$0x11]  }
  0x18   : > { %v618_v30 = vshll.u32 %v986_v20, 16  ;;  %v330_v31 = vsel %vm327_vm4, %v328_v22, %v329_v23  ;;  %v441_v32 = vshrl.u32 %v984_v16, 16  ;;  %v445_v33 = vrot.slane %v443_v25, 1  ;;  %s838_s26 = sshll.u32 %s190_s25, 3 }
  0x19   : > { %v224_v15 = vor.u32 %v223_v12, %v219_v9  ;;  %v448_v34 = vshll.u32 %v985_v24, 16  ;;  %v505_v37 = vsel %vm327_vm4, %v503_v27, %v504_v28  ;;  %v616_v38 = vshrl.u32 %v986_v20, 16  ;;  %s192_s12 = scalar_lea.vmem %s1202_s3, %s838_s26 }
  0x1a   : > { %v620_v39 = vrot.slane %v618_v30, 1  ;;  %v623_v40 = vshll.u32 %v987_v29, 16  ;;  %v446_v42 = vor.u32 %v445_v33, %v441_v32  ;;  %v685_v51 = vsel %vm234_vm0, %v861_v50, 0 }
  0x1b   : > { %v229_v19 = vsel %vm217_vm3, %v224_v15, %v228_v13  ;;  %v450_v43 = vrot.slane %v448_v34, 1  ;;  %v678_v52 = vrot.slane %v986_v20, 1  ;;  %v679_v53 = vrot.slane %v987_v29, 1 }
  0x1c   : > { %888 = vmatmul.mubr.msk.bf16.vlgmr.msra.gmra.mxu0 %vm230_vm2, %v229_v19  ;;  %v621_v45 = vor.u32 %v620_v39, %v616_v38  ;;  %v625_v46 = vrot.slane %v623_v40, 1  ;;  %vm739_vm5 = vcmask 130048  }
  0x1d   : > { %898 = vmatpush3.bf16.msra.mxu0 %v335_v18  ;;  %899 = vmatprep.mubr.msk.bf16.mxu0 %vm1029_vm1, %v1028_v2  ;;  %v451_v47 = vsel %vm217_vm3, %v446_v42, %v450_v43  ;;  %v680_v54 = vsel %vm327_vm4, %v678_v52, %v679_v53 }
  0x1e   : > { %909 = vmatprep.subr.bf16.mxu0 %v1028_v2  ;;  %906 = vmatmul.mubr.msk.bf16.vlgmr.msra.gmra.mxu1 %vm230_vm2, %v984_v16  ;;  %v626_v49 = vsel %vm217_vm3, %v621_v45, %v625_v46 }
  0x1f   : > { %916 = vmatpush3.bf16.msra.mxu1 %v510_v21  ;;  %917 = vmatprep.mubr.msk.bf16.mxu1 %vm1029_vm1, %v1028_v2 }
  0x20   : > { %927 = vmatprep.subr.bf16.mxu1 %v1028_v2 }
  0x24   : > { %900 = vmatmul.mubr.msk.bf16.vlgmr.msra.gmra.mxu0 %vm230_vm2, %v330_v31 }
  0x25   : > { %910 = vmatpush3.bf16.msra.mxu0 %v456_v36  ;;  %911 = vmatprep.mubr.msk.bf16.mxu0 %vm1029_vm1, %v1028_v2 }
  0x26   : > { %921 = vmatprep.subr.bf16.mxu0 %v1028_v2  ;;  %918 = vmatmul.mubr.msk.bf16.vlgmr.msra.gmra.mxu1 %vm230_vm2, %v505_v37  ;;  %v863_v37 = vld [vmem:[%s1201_s2] ss:$0 sm:$0xff] }
  0x27   : > { %928 = vmatpush3.bf16.msra.mxu1 %v631_v41  ;;  %929 = vmatprep.mubr.msk.bf16.mxu1 %vm1029_vm1, %v1028_v2 }
  0x2c   : > { %912 = vmatmul.mubr.msk.bf16.vlgmr.msra.gmra.mxu0 %vm230_vm2, %v451_v47 }
  0x2d   : > { %922 = vmatpush3.bf16.msra.mxu0 %v566_v48  ;;  %923 = vmatprep.mubr.msk.bf16.mxu0 %vm1029_vm1, %v1028_v2 }
  0x2e   : > { %933 = vmatprep.subr.bf16.mxu0 %v1028_v2  ;;  %930 = vmatmul.mubr.msk.bf16.vlgmr.msra.gmra.mxu1 %vm230_vm2, %v626_v49 }
  0x34   : > { %924 = vmatmul.mubr.msk.bf16.vlgmr.msra.gmra.mxu0 %vm230_vm2, %v986_v20 }
  0x35   : > { %934 = vmatpush3.bf16.msra.mxu0 %v685_v51  ;;  %935 = vmatprep.mubr.msk.bf16.mxu0 %vm1029_vm1, %v1028_v2 }
  0x3c   : > { %936 = vmatmul.mubr.msk.bf16.vlgmr.msra.gmra.mxu0 %vm230_vm2, %v680_v54 }
  0xd5   : > { %v318_v55 = vpop.f32.mrf.mxu1 }
  0xd7   : > { %v895_v56 = vpop.f32.mrf.mxu1 }
  0xd9   : > { %v321_v57 = vpop.f32.mrf.mxu1 }
  0xdb   : > { %v896_v58 = vpop.f32.mrf.mxu1 }
  0xdc   : > { %v272_v59 = vpop.f32.mrf.mxu0 }
  0xdd   : > { %v319_v8 = vadd.f32 %v318_v55, %v272_v59 }
  0xde   : > { %v889_v60 = vpop.f32.mrf.mxu0  ;;  %v427_v61 = vpop.f32.mrf.mxu1 }
  0xe0   : > { %v275_v62 = vpop.f32.mrf.mxu0  ;;  %v907_v63 = vpop.f32.mrf.mxu1 }
  0xe1   : > { %v322_v14 = vadd.f32 %v321_v57, %v275_v62 }
  0xe2   : > { %v890_v0 = vpop.f32.mrf.mxu0  ;;  %v430_v1 = vpop.f32.mrf.mxu1 }
  0xe4   : > { %v371_v3 = vpop.f32.mrf.mxu0  ;;  %v908_v2 = vpop.f32.mrf.mxu1 }
  0xe5   : > { %v378_v11 = vadd.f32 %v371_v3, %v319_v8 }
  0xe6   : > { %v901_v4 = vpop.f32.mrf.mxu0  ;;  %v546_v5 = vpop.f32.mrf.mxu1 }
  0xe7   : > { %v434_v17 = vadd.f32 %v427_v61, %v378_v11 }
  0xe8   : > { %v374_v6 = vpop.f32.mrf.mxu0  ;;  %v919_v7 = vpop.f32.mrf.mxu1 }
  0xe9   : > { %v379_v18 = vadd.f32 %v374_v6, %v322_v14 }
  0xea   : > { %v902_v9 = vpop.f32.mrf.mxu0  ;;  %v549_v10 = vpop.f32.mrf.mxu1 }
  0xeb   : > { %v435_v24 = vadd.f32 %v430_v1, %v379_v18 }
  0xec   : > { %v492_v12 = vpop.f32.mrf.mxu0  ;;  %v920_v13 = vpop.f32.mrf.mxu1 }
  0xed   : > { %v499_v21 = vadd.f32 %v492_v12, %v434_v17 }
  0xee   : > { %v913_v15 = vpop.f32.mrf.mxu0  ;;  %v667_v16 = vpop.f32.mrf.mxu1 }
  0xef   : > { %v553_v27 = vadd.f32 %v546_v5, %v499_v21 }
  0xf0   : > { %v495_v19 = vpop.f32.mrf.mxu0  ;;  %v931_v20 = vpop.f32.mrf.mxu1 }
  0xf1   : > { %v500_v28 = vadd.f32 %v495_v19, %v435_v24 }
  0xf2   : > { %v914_v22 = vpop.f32.mrf.mxu0  ;;  %v670_v23 = vpop.f32.mrf.mxu1 }
  0xf3   : > { %v554_v32 = vadd.f32 %v549_v10, %v500_v28 }
  0xf4   : > { %v602_v25 = vpop.f32.mrf.mxu0  ;;  %v932_v26 = vpop.f32.mrf.mxu1 }
  0xf5   : > { %v609_v30 = vadd.f32 %v602_v25, %v553_v27 }
  0xf6   : > { %v925_v29 = vpop.f32.mrf.mxu0 }
  0xf7   : > { %v674_v34 = vadd.f32 %v667_v16, %v609_v30 }
  0xf8   : > { %v605_v31 = vpop.f32.mrf.mxu0 }
  0xf9   : > { %v610_v35 = vadd.f32 %v605_v31, %v554_v32 }
  0xfa   : > { %v926_v33 = vpop.f32.mrf.mxu0 }
  0xfb   : > { %v675_v40 = vadd.f32 %v670_v23, %v610_v35 }
  0xfc   : > { %v721_v36 = vpop.f32.mrf.mxu0 }
  0xfd   : > { %v728_v38 = vadd.f32 %v721_v36, %v674_v34 }
  0xfe   : > { %v937_v39 = vpop.f32.mrf.mxu0 }
  0xff   : > { %v737_v41 = vadd.f32 %v863_v37, %v728_v38 }
 0x100   : > { %v724_v42 = vpop.f32.mrf.mxu0 }
 0x101   : > { %740 = vst.msk [vmem:[%s192_s12] sm:$0xff] %vm739_vm5, %v737_v41  ;;  %v729_v43 = vadd.f32 %v724_v42, %v675_v40 }
 0x102   : > { %v938_v44 = vpop.f32.mrf.mxu0 }
 0x103   : > { %v738_v45 = vadd.f32 %v863_v37, %v729_v43 }
 0x105   : > { %741 = vst.msk [vmem:[%s192_s12 + $0x8] sm:$0xff] %vm739_vm5, %v738_v45 }
 0x106 PF: > { %s13_s16 = sadd.s32 1, %s1026_s16   ;;  %s1203_s12 = smov %s1018_s14 }
 0x107   : > { %p10_p7 = scmp.ge.s32.totalorder %s13_s16, 34   ;;  %s1204_s13 = smov %s1022_s15 }
 0x108   : > { %s1205_s14 = smov %s1208_s17  ;;  %s1206_s15 = smov %s1212_s18 }
 0x109   :  { %12 = sbr.rel (!%p10_p7) target bundleno = 3 (0x3), region = 71 }

// kernel: down_block_forward.13
= control target key start
LH: loop header
LB: loop body
LE: loop exit
PB: predicated region body
PF: predicated region fallthrough
CT: control target
= control target key end

     0   :  { %s1110_s12 = smov 0   ;;  %s1112_s13 = smov 0   ;;  %s1252_s0 = inlined_call_operand.vmem [shape: bf16[2,18,18,16], index: 0, kind: input, shape index: {}]   ;;  %s1253_s1 = inlined_call_operand.vmem [shape: bf16[9,16,16], index: 1, kind: input, shape index: {}]   ;;  %s1254_s2 = inlined_call_operand.vmem [shape: f32[1,16], index: 2, kind: input, shape index: {}]   ;;  %s1255_s3 = inlined_call_operand.vmem [shape: f32[2,16,16,16], index: 3, kind: output, shape index: {}]  }
   0x1   :  { %s1114_s14 = smov 0   ;;  %s1116_s15 = smov 0  }
   0x2   :  { %s1118_s16 = smov 0  }
   0x3 LB: > { %s22_s17 = sadd.s32 1, %s1078_s14  ;;  %s25_s18 = sadd.s32 1, %s1082_s15  ;;  %s1086_s16 = sphi %s1118_s16, %s13_s16   ;;  %s1082_s15 = sphi %s1116_s15, %s1259_s15   ;;  %s1078_s14 = sphi %s1114_s14, %s1258_s14   ;;  %s1074_s13 = sphi %s1112_s13, %s1257_s13   ;;  %s1070_s12 = sphi %s1110_s12, %s1256_s12  }
   0x4   : > { %p23_p0 = scmp.ge.s32.totalorder %s22_s17, 16  ;;  %p868_p1 = scmp.ge.s32.totalorder %s1086_s16, 1 }
   0x5   : > { %p151_p2 = scmp.lt.s32.totalorder %s1086_s16, 33 }
   0x6   : > { %s1261_s17 = smov (%p23_p0, %s22_s17), 0  ;;  %s1263_s18 = smov (!%p23_p0, %s25_s18), %s1082_s15 }
   0x7   : > { %p152_p3 = pnand %p868_p1, %p151_p2  ;;  %p27_p4 = scmp.ge.s32.totalorder %s1263_s18, 2 }
   0x8   : > { %p179_p5 = scmp.lt.s32.totalorder (!%p152_p3), %s1074_s13, 1  ;;  %s917_s23 = smul.u32 (!%p152_p3), 12, %s1070_s12 }
   0x9   : > { %s1265_s18 = smov (%p27_p4, %s1263_s18), 0  ;;  %155 = sbr.rel (%p152_p3) target bundleno = 261 (0x105), region = 32 }
   0xa   : > { %p186_p6 = scmp.lt.s32.totalorder (!%p152_p3), %s1070_s12, 15 }
   0xe   : > { %v1033_v0 = vld [vmem:[%s1253_s1 + $0x8] sm:$0xff]   ;;  %v1088_v1 = vmov 0.0   ;;  %v1034_v2 = vld [vmem:[%s1253_s1] sm:$0xff]   ;;  %vm1089_vm0 = vmmov 0   ;;  %s1267_s13 = smov (!%p179_p5, %s1074_s13), 1  ;;  %vm238_vm1 = vcmask 130048  }
   0xf   : > { %936 = vmatprep.subr.bf16.mxu0 %v1088_v1  ;;  %942 = vmatprep.subr.bf16.mxu1 %v1088_v1  ;;  %s990_s24 = smul.u32 216, %s1267_s13  ;;  %v1038_v3 = vld [vmem:[%s1253_s1 + $0x18] sm:$0xff]   ;;  %vm219_vm2 = vsmask.f32 7424  ;;  %v1037_v12 = vld [vmem:[%s1253_s1 + $0x10] sm:$0xff]   ;;  %v1041_v15 = vld [vmem:[%s1253_s1 + $0x28] sm:$0xff]  }
  0x10   : > { %937 = vmatpush3.bf16.msra.mxu0 %v1033_v0  ;;  %938 = vmatprep.mubr.msk.bf16.mxu0 %vm1089_vm0, %v1088_v1  ;;  %vm335_vm3 = vcmask 1046528   ;;  %v1040_v26 = vld [vmem:[%s1253_s1 + $0x20] sm:$0xff]   ;;  %v1044_v31 = vld [vmem:[%s1253_s1 + $0x38] sm:$0xff]   ;;  %v1043_v40 = vld [vmem:[%s1253_s1 + $0x30] sm:$0xff]   ;;  %s1269_s12 = smov (!%p186_p6, %s1070_s12), 15 }
  0x11   : > { %943 = vmatpush3.bf16.msra.mxu1 %v1034_v2  ;;  %944 = vmatprep.mubr.msk.bf16.mxu1 %vm1089_vm0, %v1088_v1  ;;  %s183_s27 = scalar_lea.vmem %s1252_s0, %s990_s24  ;;  %v1047_v42 = vld [vmem:[%s1253_s1 + $0x40] sm:$0xff]   ;;  %s871_s24 = sshll.u32 %s1267_s13, 5 }
  0x12   : > { %948 = vmatprep.subr.bf16.mxu0 %v1088_v1  ;;  %954 = vmatprep.subr.bf16.mxu1 %v1088_v1  ;;  %s1163_s28 = scalar_lea.vmem %s183_s27, %s917_s23  ;;  %s870_s23 = sshll.u32 %s1269_s12, 1 }
  0x13   : > { %v1035_v4 = vld [vmem:[%s1163_s28] sm:$0xff]   ;;  %v1036_v5 = vld [vmem:[%s1163_s28 + $0x8] ss:$0 sps:$4 sm:$0x11]   ;;  %v1039_v13 = vld [vmem:[%s1163_s28 + $0xc] sm:$0xff]   ;;  %s190_s25 = sadd.s32 %s871_s24, %s870_s23 }
  0x14   : > { %v221_v6 = vshrl.u32 %v1035_v4, 16  ;;  %v223_v7 = vshll.u32 %v1035_v4, 16  ;;  %v228_v8 = vshll.u32 %v1036_v5, 16  ;;  %945 = vmatmul.mubr.msk.bf16.vlgmr.msra.gmra.mxu1 %vm238_vm1, %v1035_v4  ;;  %v1045_v16 = vld [vmem:[%s1163_s28 + $0x18] sm:$0xff]   ;;  %v336_v17 = vrot.slane %v1035_v4, 1  ;;  %s872_s26 = sshll.u32 %s190_s25, 3 }
  0x15   : > { %955 = vmatpush3.bf16.msra.mxu1 %v1038_v3  ;;  %956 = vmatprep.mubr.msk.bf16.mxu1 %vm1089_vm0, %v1088_v1  ;;  %v337_v18 = vrot.slane %v1036_v5, 1  ;;  %v1042_v19 = vld [vmem:[%s1163_s28 + $0x14] ss:$0 sps:$4 sm:$0x11]   ;;  %v459_v20 = vshll.u32 %v1039_v13, 16  ;;  %v523_v21 = vrot.slane %v1039_v13, 1  ;;  %s192_s12 = scalar_lea.vmem %s1255_s3, %s872_s26 }
  0x16   : > { %v225_v9 = vrot.slane %v223_v7, 1  ;;  %v230_v10 = vrot.slane %v228_v8, 1  ;;  %966 = vmatprep.subr.bf16.mxu1 %v1088_v1  ;;  %v524_v22 = vrot.slane %v1042_v19, 1  ;;  %v1046_v23 = vld [vmem:[%s1163_s28 + $0x20] ss:$0 sps:$4 sm:$0x11]  }
  0x17   : > { %v646_v24 = vshll.u32 %v1045_v16, 16  ;;  %v338_v25 = vsel %vm335_vm3, %v336_v17, %v337_v18  ;;  %v457_v27 = vshrl.u32 %v1039_v13, 16  ;;  %v461_v28 = vrot.slane %v459_v20, 1 }
  0x18   : > { %v226_v11 = vor.u32 %v225_v9, %v221_v6  ;;  %v464_v29 = vshll.u32 %v1042_v19, 16  ;;  %v525_v30 = vsel %vm335_vm3, %v523_v21, %v524_v22  ;;  %v644_v32 = vshrl.u32 %v1045_v16, 16 }
  0x19   : > { %v648_v33 = vrot.slane %v646_v24, 1  ;;  %v651_v34 = vshll.u32 %v1046_v23, 16  ;;  %v462_v35 = vor.u32 %v461_v28, %v457_v27  ;;  %v710_v43 = vrot.slane %v1045_v16, 1  ;;  %v914_v28 = vld [vmem:[%s1254_s2] ss:$0 sm:$0xff] }
  0x1a   : > { %v231_v14 = vsel %vm219_vm2, %v226_v11, %v230_v10  ;;  %v466_v36 = vrot.slane %v464_v29, 1  ;;  %v711_v44 = vrot.slane %v1046_v23, 1 }
  0x1b   : > { %939 = vmatmul.mubr.msk.bf16.vlgmr.msra.gmra.mxu0 %vm238_vm1, %v231_v14  ;;  %v649_v37 = vor.u32 %v648_v33, %v644_v32  ;;  %v653_v38 = vrot.slane %v651_v34, 1 }
  0x1c   : > { %949 = vmatpush3.bf16.msra.mxu0 %v1037_v12  ;;  %950 = vmatprep.mubr.msk.bf16.mxu0 %vm1089_vm0, %v1088_v1  ;;  %v467_v39 = vsel %vm219_vm2, %v462_v35, %v466_v36  ;;  %v712_v45 = vsel %vm335_vm3, %v710_v43, %v711_v44 }
  0x1d   : > { %960 = vmatprep.subr.bf16.mxu0 %v1088_v1  ;;  %957 = vmatmul.mubr.msk.bf16.vlgmr.msra.gmra.mxu1 %vm238_vm1, %v1039_v13  ;;  %v654_v41 = vsel %vm219_vm2, %v649_v37, %v653_v38 }
  0x1e   : > { %967 = vmatpush3.bf16.msra.mxu1 %v1041_v15  ;;  %968 = vmatprep.mubr.msk.bf16.mxu1 %vm1089_vm0, %v1088_v1 }
  0x1f   : > { %978 = vmatprep.subr.bf16.mxu1 %v1088_v1 }
  0x23   : > { %951 = vmatmul.mubr.msk.bf16.vlgmr.msra.gmra.mxu0 %vm238_vm1, %v338_v25 }
  0x24   : > { %961 = vmatpush3.bf16.msra.mxu0 %v1040_v26  ;;  %962 = vmatprep.mubr.msk.bf16.mxu0 %vm1089_vm0, %v1088_v1 }
  0x25   : > { %972 = vmatprep.subr.bf16.mxu0 %v1088_v1  ;;  %969 = vmatmul.mubr.msk.bf16.vlgmr.msra.gmra.mxu1 %vm238_vm1, %v525_v30 }
  0x26   : > { %979 = vmatpush3.bf16.msra.mxu1 %v1044_v31  ;;  %980 = vmatprep.mubr.msk.bf16.mxu1 %vm1089_vm0, %v1088_v1 }
  0x2b   : > { %963 = vmatmul.mubr.msk.bf16.vlgmr.msra.gmra.mxu0 %vm238_vm1, %v467_v39 }
  0x2c   : > { %973 = vmatpush3.bf16.msra.mxu0 %v1043_v40  ;;  %974 = vmatprep.mubr.msk.bf16.mxu0 %vm1089_vm0, %v1088_v1 }
  0x2d   : > { %984 = vmatprep.subr.bf16.mxu0 %v1088_v1  ;;  %981 = vmatmul.mubr.msk.bf16.vlgmr.msra.gmra.mxu1 %vm238_vm1, %v654_v41 }
  0x33   : > { %975 = vmatmul.mubr.msk.bf16.vlgmr.msra.gmra.mxu0 %vm238_vm1, %v1045_v16 }
  0x34   : > { %985 = vmatpush3.bf16.msra.mxu0 %v1047_v42  ;;  %986 = vmatprep.mubr.msk.bf16.mxu0 %vm1089_vm0, %v1088_v1 }
  0x3b   : > { %987 = vmatmul.mubr.msk.bf16.vlgmr.msra.gmra.mxu0 %vm238_vm1, %v712_v45 }
  0xd4   : > { %v325_v46 = vpop.f32.mrf.mxu1 }
  0xd6   : > { %v946_v47 = vpop.f32.mrf.mxu1 }
  0xd8   : > { %v328_v48 = vpop.f32.mrf.mxu1 }
  0xda   : > { %v947_v49 = vpop.f32.mrf.mxu1 }
  0xdb   : > { %v276_v50 = vpop.f32.mrf.mxu0 }
  0xdc   : > { %v326_v63 = vadd.f32 %v325_v46, %v276_v50 }
  0xdd   : > { %v940_v51 = vpop.f32.mrf.mxu0  ;;  %v442_v52 = vpop.f32.mrf.mxu1 }
  0xdf   : > { %v279_v53 = vpop.f32.mrf.mxu0  ;;  %v958_v54 = vpop.f32.mrf.mxu1 }
  0xe0   : > { %v329_v5 = vadd.f32 %v328_v48, %v279_v53 }
  0xe1   : > { %v941_v55 = vpop.f32.mrf.mxu0  ;;  %v445_v56 = vpop.f32.mrf.mxu1 }
  0xe3   : > { %v382_v57 = vpop.f32.mrf.mxu0  ;;  %v959_v58 = vpop.f32.mrf.mxu1 }
  0xe4   : > { %v389_v2 = vadd.f32 %v382_v57, %v326_v63 }
  0xe5   : > { %v952_v59 = vpop.f32.mrf.mxu0  ;;  %v569_v60 = vpop.f32.mrf.mxu1 }
  0xe6   : > { %v449_v8 = vadd.f32 %v442_v52, %v389_v2 }
  0xe7   : > { %v385_v61 = vpop.f32.mrf.mxu0  ;;  %v970_v62 = vpop.f32.mrf.mxu1 }
  0xe8   : > { %v390_v9 = vadd.f32 %v385_v61, %v329_v5 }
  0xe9   : > { %v953_v0 = vpop.f32.mrf.mxu0  ;;  %v572_v1 = vpop.f32.mrf.mxu1 }
  0xea   : > { %v450_v15 = vadd.f32 %v445_v56, %v390_v9 }
  0xeb   : > { %v511_v3 = vpop.f32.mrf.mxu0  ;;  %v971_v4 = vpop.f32.mrf.mxu1 }
  0xec   : > { %v518_v12 = vadd.f32 %v511_v3, %v449_v8 }
  0xed   : > { %v964_v6 = vpop.f32.mrf.mxu0  ;;  %v698_v7 = vpop.f32.mrf.mxu1 }
  0xee   : > { %v576_v18 = vadd.f32 %v569_v60, %v518_v12 }
  0xef   : > { %v514_v10 = vpop.f32.mrf.mxu0  ;;  %v982_v11 = vpop.f32.mrf.mxu1 }
  0xf0   : > { %v519_v19 = vadd.f32 %v514_v10, %v450_v15 }
  0xf1   : > { %v965_v13 = vpop.f32.mrf.mxu0  ;;  %v701_v14 = vpop.f32.mrf.mxu1 }
  0xf2   : > { %v577_v23 = vadd.f32 %v572_v1, %v519_v19 }
  0xf3   : > { %v629_v16 = vpop.f32.mrf.mxu0  ;;  %v983_v17 = vpop.f32.mrf.mxu1 }
  0xf4   : > { %v636_v21 = vadd.f32 %v629_v16, %v576_v18 }
  0xf5   : > { %v976_v20 = vpop.f32.mrf.mxu0 }
  0xf6   : > { %v705_v25 = vadd.f32 %v698_v7, %v636_v21 }
  0xf7   : > { %v632_v22 = vpop.f32.mrf.mxu0 }
  0xf8   : > { %v637_v26 = vadd.f32 %v632_v22, %v577_v23 }
  0xf9   : > { %v977_v24 = vpop.f32.mrf.mxu0 }
  0xfa   : > { %v706_v31 = vadd.f32 %v701_v14, %v637_v26 }
  0xfb   : > { %v756_v27 = vpop.f32.mrf.mxu0 }
  0xfc   : > { %v763_v29 = vadd.f32 %v756_v27, %v705_v25 }
  0xfd   : > { %v988_v30 = vpop.f32.mrf.mxu0 }
  0xfe   : > { %v772_v32 = vadd.f32 %v914_v28, %v763_v29 }
  0xff   : > { %v759_v33 = vpop.f32.mrf.mxu0 }
 0x100   : > { %774 = vst.msk [vmem:[%s192_s12] sm:$0xff] %vm238_vm1, %v772_v32  ;;  %v764_v34 = vadd.f32 %v759_v33, %v706_v31 }
 0x101   : > { %v989_v35 = vpop.f32.mrf.mxu0 }
 0x102   : > { %v773_v36 = vadd.f32 %v914_v28, %v764_v34 }
 0x104   : > { %775 = vst.msk [vmem:[%s192_s12 + $0x8] sm:$0xff] %vm238_vm1, %v773_v36 }
 0x105 PF: > { %s13_s16 = sadd.s32 1, %s1086_s16   ;;  %s1256_s12 = smov %s1078_s14 }
 0x106   : > { %p10_p7 = scmp.ge.s32.totalorder %s13_s16, 34   ;;  %s1257_s13 = smov %s1082_s15 }
 0x107   : > { %s1258_s14 = smov %s1261_s17  ;;  %s1259_s15 = smov %s1265_s18 }
 0x108   :  { %12 = sbr.rel (!%p10_p7) target bundleno = 3 (0x3), region = 71 }

// kernel: down_block_forward.10
= control target key start
LH: loop header
LB: loop body
LE: loop exit
PB: predicated region body
PF: predicated region fallthrough
CT: control target
= control target key end

     0   :  { %s1120_s12 = smov 0   ;;  %s1122_s13 = smov 0   ;;  %s1374_s0 = inlined_call_operand.vmem [shape: bf16[512,4], index: 0, kind: input, shape index: {}]   ;;  %s1375_s1 = inlined_call_operand.vmem [shape: bf16[4,16], index: 1, kind: input, shape index: {}]   ;;  %s1376_s2 = inlined_call_operand.vmem [shape: f32[1,16], index: 2, kind: input, shape index: {}]   ;;  %s1377_s3 = inlined_call_operand.vmem [shape: f32[512,16], index: 3, kind: output, shape index: {}]  }
   0x1   :  { %s1124_s14 = smov 0  }
   0x2 LB: > { %s32_s15 = sadd.s32 1, %s1093_s13  ;;  %p939_p0 = scmp.ge.s32.totalorder %s1097_s14, 1  ;;  %s1097_s14 = sphi %s1124_s14, %s13_s14   ;;  %s1093_s13 = sphi %s1122_s13, %s1380_s13   ;;  %s1089_s12 = sphi %s1120_s12, %s1379_s12  }
   0x3   : > { %p34_p1 = scmp.ge.s32.totalorder %s32_s15, 2  ;;  %p186_p2 = scmp.lt.s32.totalorder %s1097_s14, 3 }
   0x5   : > { %s1382_s15 = smov (%p34_p1, %s32_s15), 0  ;;  %p187_p3 = pnand %p939_p0, %p186_p2 }
   0x6   : > { %s940_s18 = sshll.u32 (!%p187_p3), %s1089_s12, 5 }
   0x7   : > { %190 = sbr.rel (%p187_p3) target bundleno = 254 (0xfe), region = 32  ;;  %p1146_p4 = scmp.lt.s32.totalorder (!%p187_p3), %s940_s18, 63 }
   0xc   : > { %v356_v0 = vld [vmem:[%s1375_s1] sm:$0x3]  ;;  %vm486_vm0 = vcmask 1041408   ;;  %vm259_vm1 = vcmask 130048   ;;  %v1099_v2 = vmov 0.0   ;;  %s1384_s18 = smov (!%p1146_p4, %s940_s18), 63 }
   0xd   : > { %1032 = vmatprep.subr.msk.bf16.mxu0 %vm486_vm0, %v356_v0  ;;  %1033 = vmatprep.subr.msk.bf16.mxu1 %vm486_vm0, %v356_v0  ;;  %v488_v1 = vsel %vm486_vm0, %v356_v0, 0  ;;  %262 = vst.msk [vmem:[#allocation2 + $0x10] sm:$0xff] %vm259_vm1, %v1099_v2  ;;  %260 = vst.msk [vmem:[#allocation2] sm:$0xff] %vm259_vm1, %v1099_v2  ;;  %s941_s20 = sshll.u32 %s1384_s18, 2  ;;  %vm437_vm2 = vcmask 31744   ;;  %s943_s24 = sshll.u32 %s1384_s18, 3 }
   0xe   : > { %997 = vmatpush3.bf16.msra.mxu0 %v488_v1  ;;  %1031 = vmatpush3.bf16.msra.mxu1 %v488_v1  ;;  %261 = vst.msk [vmem:[#allocation2 + $0x8] sm:$0xff] %vm259_vm1, %v1099_v2  ;;  %263 = vst.msk [vmem:[#allocation2 + $0x18] sm:$0xff] %vm259_vm1, %v1099_v2  ;;  %s1192_s23 = scalar_lea.vmem %s1374_s0, %s941_s20  ;;  %v1235_v44 = vld [vmem:[%s1376_s2] ss:$0 sm:$0xff]  ;;  %s1242_s29 = scalar_lea.vmem %s1377_s3, %s943_s24 }
   0xf   : > { %264 = vst.msk [vmem:[#allocation2 + $0x20] sm:$0xff] %vm259_vm1, %v1099_v2  ;;  %265 = vst.msk [vmem:[#allocation2 + $0x28] sm:$0xff] %vm259_vm1, %v1099_v2  ;;  %v1059_v3 = vld [vmem:[%s1192_s23] sm:$0xff]   ;;  %v1061_v5 = vld [vmem:[%s1192_s23 + $0x8] sm:$0xff]  }
  0x10   : > { %266 = vst.msk [vmem:[#allocation2 + $0x30] sm:$0xff] %vm259_vm1, %v1099_v2  ;;  %267 = vst.msk [vmem:[#allocation2 + $0x38] sm:$0xff] %vm259_vm1, %v1099_v2  ;;  %v1060_v4 = vld [vmem:[%s1192_s23 + $0x40] sm:$0xff]   ;;  %998 = vmatprep.mubr.msk.bf16.mxu0 %vm437_vm2, %v1059_v3  ;;  %v1062_v6 = vld [vmem:[%s1192_s23 + $0x48] sm:$0xff]  }
  0x11   : > { %268 = vst.msk [vmem:[#allocation2 + $0x40] sm:$0xff] %vm259_vm1, %v1099_v2  ;;  %269 = vst.msk [vmem:[#allocation2 + $0x48] sm:$0xff] %vm259_vm1, %v1099_v2  ;;  %1014 = vmatprep.mubr.msk.bf16.mxu1 %vm437_vm2, %v1060_v4  ;;  %999 = vmatmul.mubr.msk.bf16.vlgmr.msra.gmra.mxu0 %vm437_vm2, %v1061_v5  ;;  %v1063_v7 = vld [vmem:[%s1192_s23 + $0x10] sm:$0xff]   ;;  %v1065_v9 = vld [vmem:[%s1192_s23 + $0x18] sm:$0xff]  }
  0x12   : > { %270 = vst.msk [vmem:[#allocation2 + $0x50] sm:$0xff] %vm259_vm1, %v1099_v2  ;;  %271 = vst.msk [vmem:[#allocation2 + $0x58] sm:$0xff] %vm259_vm1, %v1099_v2  ;;  %1015 = vmatmul.mubr.msk.bf16.vlgmr.msra.gmra.mxu1 %vm437_vm2, %v1062_v6  ;;  %v1064_v8 = vld [vmem:[%s1192_s23 + $0x50] sm:$0xff]   ;;  %1002 = vmatprep.mubr.msk.bf16.mxu0 %vm437_vm2, %v1063_v7  ;;  %v1066_v10 = vld [vmem:[%s1192_s23 + $0x58] sm:$0xff]  }
  0x13   : > { %272 = vst.msk [vmem:[#allocation2 + $0x60] sm:$0xff] %vm259_vm1, %v1099_v2  ;;  %273 = vst.msk [vmem:[#allocation2 + $0x68] sm:$0xff] %vm259_vm1, %v1099_v2  ;;  %1018 = vmatprep.mubr.msk.bf16.mxu1 %vm437_vm2, %v1064_v8  ;;  %v1067_v11 = vld [vmem:[%s1192_s23 + $0x20] sm:$0xff]   ;;  %v1069_v13 = vld [vmem:[%s1192_s23 + $0x28] sm:$0xff]  }
  0x14   : > { %274 = vst.msk [vmem:[#allocation2 + $0x70] sm:$0xff] %vm259_vm1, %v1099_v2  ;;  %275 = vst.msk [vmem:[#allocation2 + $0x78] sm:$0xff] %vm259_vm1, %v1099_v2  ;;  %v1068_v12 = vld [vmem:[%s1192_s23 + $0x60] sm:$0xff]   ;;  %v1070_v14 = vld [vmem:[%s1192_s23 + $0x68] sm:$0xff]  }
  0x15   : > { %276 = vst.msk [vmem:[#allocation2 + $0x80] sm:$0xff] %vm259_vm1, %v1099_v2  ;;  %277 = vst.msk [vmem:[#allocation2 + $0x88] sm:$0xff] %vm259_vm1, %v1099_v2  ;;  %v1071_v15 = vld [vmem:[%s1192_s23 + $0x30] sm:$0xff]   ;;  %v1073_v17 = vld [vmem:[%s1192_s23 + $0x38] sm:$0xff]  }
  0x16   : > { %278 = vst.msk [vmem:[#allocation2 + $0x90] sm:$0xff] %vm259_vm1, %v1099_v2  ;;  %279 = vst.msk [vmem:[#allocation2 + $0x98] sm:$0xff] %vm259_vm1, %v1099_v2  ;;  %v1072_v16 = vld [vmem:[%s1192_s23 + $0x70] sm:$0xff]   ;;  %v1074_v18 = vld [vmem:[%s1192_s23 + $0x78] sm:$0xff]  }
  0x17   : > { %280 = vst.msk [vmem:[#allocation2 + $0xa0] sm:$0xff] %vm259_vm1, %v1099_v2  ;;  %281 = vst.msk [vmem:[#allocation2 + $0xa8] sm:$0xff] %vm259_vm1, %v1099_v2  ;;  %v294_v19 = vld [vmem:[#allocation2 + $0x10] sm:$0xff]  ;;  %v292_v22 = vld [vmem:[#allocation2] sm:$0xff] }
  0x18   : > { %282 = vst.msk [vmem:[#allocation2 + $0xb0] sm:$0xff] %vm259_vm1, %v1099_v2  ;;  %283 = vst.msk [vmem:[#allocation2 + $0xb8] sm:$0xff] %vm259_vm1, %v1099_v2  ;;  %v295_v28 = vld [vmem:[#allocation2 + $0x18] sm:$0xff]  ;;  %v293_v34 = vld [vmem:[#allocation2 + $0x8] sm:$0xff] }
  0x19   : > { %284 = vst.msk [vmem:[#allocation2 + $0xc0] sm:$0xff] %vm259_vm1, %v1099_v2  ;;  %285 = vst.msk [vmem:[#allocation2 + $0xc8] sm:$0xff] %vm259_vm1, %v1099_v2  ;;  %1003 = vmatmul.mubr.msk.bf16.gmra.mxu0 %vm437_vm2, %v1065_v9  ;;  %v298_v40 = vld [vmem:[#allocation2 + $0x30] sm:$0xff]  ;;  %v296_v47 = vld [vmem:[#allocation2 + $0x20] sm:$0xff] }
  0x1a   : > { %286 = vst.msk [vmem:[#allocation2 + $0xd0] sm:$0xff] %vm259_vm1, %v1099_v2  ;;  %287 = vst.msk [vmem:[#allocation2 + $0xd8] sm:$0xff] %vm259_vm1, %v1099_v2  ;;  %1019 = vmatmul.mubr.msk.bf16.gmra.mxu1 %vm437_vm2, %v1066_v10  ;;  %1006 = vmatprep.mubr.msk.bf16.mxu0 %vm437_vm2, %v1067_v11  ;;  %v299_v54 = vld [vmem:[#allocation2 + $0x38] sm:$0xff]  ;;  %v297_v0 = vld [vmem:[#allocation2 + $0x28] sm:$0xff] }
  0x1b   : > { %288 = vst.msk [vmem:[#allocation2 + $0xe0] sm:$0xff] %vm259_vm1, %v1099_v2  ;;  %289 = vst.msk [vmem:[#allocation2 + $0xe8] sm:$0xff] %vm259_vm1, %v1099_v2  ;;  %1022 = vmatprep.mubr.msk.bf16.mxu1 %vm437_vm2, %v1068_v12  ;;  %v302_v10 = vld [vmem:[#allocation2 + $0x50] sm:$0xff] }
  0x1c   : > { %290 = vst.msk [vmem:[#allocation2 + $0xf0] sm:$0xff] %vm259_vm1, %v1099_v2  ;;  %291 = vst.msk [vmem:[#allocation2 + $0xf8] sm:$0xff] %vm259_vm1, %v1099_v2  ;;  %v308_v25 = vld [vmem:[#allocation2 + $0x80] sm:$0xff]  ;;  %v309_v37 = vld [vmem:[#allocation2 + $0x88] sm:$0xff] }
  0x1d   : > { %v310_v20 = vld [vmem:[#allocation2 + $0x90] sm:$0xff]  ;;  %v311_v31 = vld [vmem:[#allocation2 + $0x98] sm:$0xff] }
  0x1e   : > { %v312_v50 = vld [vmem:[#allocation2 + $0xa0] sm:$0xff]  ;;  %v313_v5 = vld [vmem:[#allocation2 + $0xa8] sm:$0xff] }
  0x1f   : > { %v314_v43 = vld [vmem:[#allocation2 + $0xb0] sm:$0xff]  ;;  %v315_v59 = vld [vmem:[#allocation2 + $0xb8] sm:$0xff] }
  0x21   : > { %1007 = vmatmul.mubr.msk.bf16.gmra.mxu0 %vm437_vm2, %v1069_v13 }
  0x22   : > { %1023 = vmatmul.mubr.msk.bf16.gmra.mxu1 %vm437_vm2, %v1070_v14  ;;  %1010 = vmatprep.mubr.msk.bf16.mxu0 %vm437_vm2, %v1071_v15  ;;  %v318_v15 = vld [vmem:[#allocation2 + $0xd0] sm:$0xff] }
  0x23   : > { %1026 = vmatprep.mubr.msk.bf16.mxu1 %vm437_vm2, %v1072_v16 }
  0x29   : > { %1011 = vmatmul.mubr.msk.bf16.gmra.mxu0 %vm437_vm2, %v1073_v17 }
  0x2a   : > { %1027 = vmatmul.mubr.msk.bf16.gmra.mxu1 %vm437_vm2, %v1074_v18 }
  0xd1   : > { %v1000_v21 = vpop.f32.mrf.mxu0 }
  0xd2   : > { %v653_v23 = vadd.f32 %v1000_v21, %v294_v19  ;;  %v1016_v24 = vpop.f32.mrf.mxu1 }
  0xd3   : > { %v669_v26 = vadd.f32 %v1016_v24, %v310_v20  ;;  %v524_v27 = vpop.f32.mrf.mxu0  ;;  %v300_v20 = vld [vmem:[#allocation2 + $0x40] sm:$0xff] }
  0xd4   : > { %686 = vst.msk [vmem:[#allocation2 + $0x10] sm:$0xff] %vm259_vm1, %v653_v23  ;;  %v651_v29 = vadd.f32 %v524_v27, %v292_v22  ;;  %v588_v30 = vpop.f32.mrf.mxu1 }
  0xd5   : > { %702 = vst.msk [vmem:[#allocation2 + $0x90] sm:$0xff] %vm259_vm1, %v669_v26  ;;  %v667_v32 = vadd.f32 %v588_v30, %v308_v25  ;;  %v1001_v33 = vpop.f32.mrf.mxu0  ;;  %v316_v25 = vld [vmem:[#allocation2 + $0xc0] sm:$0xff]  ;;  %v303_v30 = vld [vmem:[#allocation2 + $0x58] sm:$0xff] }
  0xd6   : > { %684 = vst.msk [vmem:[#allocation2] sm:$0xff] %vm259_vm1, %v651_v29  ;;  %v654_v35 = vadd.f32 %v1001_v33, %v295_v28  ;;  %v1017_v36 = vpop.f32.mrf.mxu1 }
  0xd7   : > { %700 = vst.msk [vmem:[#allocation2 + $0x80] sm:$0xff] %vm259_vm1, %v667_v32  ;;  %v670_v38 = vadd.f32 %v1017_v36, %v311_v31  ;;  %v527_v39 = vpop.f32.mrf.mxu0 }
  0xd8   : > { %687 = vst.msk [vmem:[#allocation2 + $0x18] sm:$0xff] %vm259_vm1, %v654_v35  ;;  %v652_v41 = vadd.f32 %v527_v39, %v293_v34  ;;  %v591_v42 = vpop.f32.mrf.mxu1  ;;  %v319_v35 = vld [vmem:[#allocation2 + $0xd8] sm:$0xff] }
  0xd9   : > { %703 = vst.msk [vmem:[#allocation2 + $0x98] sm:$0xff] %vm259_vm1, %v670_v38  ;;  %v668_v45 = vadd.f32 %v591_v42, %v309_v37  ;;  %v1004_v46 = vpop.f32.mrf.mxu0 }
  0xda   : > { %685 = vst.msk [vmem:[#allocation2 + $0x8] sm:$0xff] %vm259_vm1, %v652_v41  ;;  %v657_v48 = vadd.f32 %v1004_v46, %v298_v40  ;;  %v1020_v49 = vpop.f32.mrf.mxu1  ;;  %v301_v40 = vld [vmem:[#allocation2 + $0x48] sm:$0xff] }
  0xdb   : > { %v721_v51 = vld [vmem:[#allocation2 + $0x10] sm:$0xff]  ;;  %701 = vst.msk [vmem:[#allocation2 + $0x88] sm:$0xff] %vm259_vm1, %v668_v45  ;;  %v673_v52 = vadd.f32 %v1020_v49, %v314_v43  ;;  %v540_v53 = vpop.f32.mrf.mxu0  ;;  %v317_v46 = vld [vmem:[#allocation2 + $0xc8] sm:$0xff] }
  0xdc   : > { %v760_v55 = vadd.f32 %v1235_v44, %v721_v51  ;;  %v737_v56 = vld [vmem:[#allocation2 + $0x90] sm:$0xff]  ;;  %690 = vst.msk [vmem:[#allocation2 + $0x30] sm:$0xff] %vm259_vm1, %v657_v48  ;;  %v655_v57 = vadd.f32 %v540_v53, %v296_v47  ;;  %v604_v58 = vpop.f32.mrf.mxu1 }
  0xdd   : > { %v776_v60 = vadd.f32 %v1235_v44, %v737_v56  ;;  %v719_v61 = vld [vmem:[#allocation2] sm:$0xff]  ;;  %706 = vst.msk [vmem:[#allocation2 + $0xb0] sm:$0xff] %vm259_vm1, %v673_v52  ;;  %v671_v62 = vadd.f32 %v604_v58, %v312_v50  ;;  %v1005_v63 = vpop.f32.mrf.mxu0  ;;  %v306_v51 = vld [vmem:[#allocation2 + $0x70] sm:$0xff] }
  0xde   : > { %792 = vst.msk [vmem:[%s1242_s29 + $0x10] sm:$0xff] %vm259_vm1, %v760_v55  ;;  %v758_v1 = vadd.f32 %v1235_v44, %v719_v61  ;;  %v735_v2 = vld [vmem:[#allocation2 + $0x80] sm:$0xff]  ;;  %688 = vst.msk [vmem:[#allocation2 + $0x20] sm:$0xff] %vm259_vm1, %v655_v57  ;;  %v658_v3 = vadd.f32 %v1005_v63, %v299_v54  ;;  %v1021_v4 = vpop.f32.mrf.mxu1  ;;  %v322_v56 = vld [vmem:[#allocation2 + $0xf0] sm:$0xff] }
  0xdf   : > { %808 = vst.msk [vmem:[%s1242_s29 + $0x90] sm:$0xff] %vm259_vm1, %v776_v60  ;;  %v774_v6 = vadd.f32 %v1235_v44, %v735_v2  ;;  %v722_v7 = vld [vmem:[#allocation2 + $0x18] sm:$0xff]  ;;  %704 = vst.msk [vmem:[#allocation2 + $0xa0] sm:$0xff] %vm259_vm1, %v671_v62  ;;  %v674_v8 = vadd.f32 %v1021_v4, %v315_v59  ;;  %v543_v9 = vpop.f32.mrf.mxu0  ;;  %v304_v61 = vld [vmem:[#allocation2 + $0x60] sm:$0xff] }
  0xe0   : > { %790 = vst.msk [vmem:[%s1242_s29] sm:$0xff] %vm259_vm1, %v758_v1  ;;  %v761_v11 = vadd.f32 %v1235_v44, %v722_v7  ;;  %v738_v12 = vld [vmem:[#allocation2 + $0x98] sm:$0xff]  ;;  %691 = vst.msk [vmem:[#allocation2 + $0x38] sm:$0xff] %vm259_vm1, %v658_v3  ;;  %v656_v13 = vadd.f32 %v543_v9, %v297_v0  ;;  %v607_v14 = vpop.f32.mrf.mxu1  ;;  %v320_v2 = vld [vmem:[#allocation2 + $0xe0] sm:$0xff] }
  0xe1   : > { %806 = vst.msk [vmem:[%s1242_s29 + $0x80] sm:$0xff] %vm259_vm1, %v774_v6  ;;  %v777_v16 = vadd.f32 %v1235_v44, %v738_v12  ;;  %v720_v17 = vld [vmem:[#allocation2 + $0x8] sm:$0xff]  ;;  %707 = vst.msk [vmem:[#allocation2 + $0xb8] sm:$0xff] %vm259_vm1, %v674_v8  ;;  %v672_v18 = vadd.f32 %v607_v14, %v313_v5  ;;  %v1008_v19 = vpop.f32.mrf.mxu0  ;;  %v307_v7 = vld [vmem:[#allocation2 + $0x78] sm:$0xff] }
  0xe2   : > { %793 = vst.msk [vmem:[%s1242_s29 + $0x18] sm:$0xff] %vm259_vm1, %v761_v11  ;;  %v759_v21 = vadd.f32 %v1235_v44, %v720_v17  ;;  %v736_v22 = vld [vmem:[#allocation2 + $0x88] sm:$0xff]  ;;  %689 = vst.msk [vmem:[#allocation2 + $0x28] sm:$0xff] %vm259_vm1, %v656_v13  ;;  %v661_v23 = vadd.f32 %v1008_v19, %v302_v10  ;;  %v1024_v24 = vpop.f32.mrf.mxu1  ;;  %v323_v12 = vld [vmem:[#allocation2 + $0xf8] sm:$0xff] }
  0xe3   : > { %809 = vst.msk [vmem:[%s1242_s29 + $0x98] sm:$0xff] %vm259_vm1, %v777_v16  ;;  %v775_v26 = vadd.f32 %v1235_v44, %v736_v22  ;;  %v725_v27 = vld [vmem:[#allocation2 + $0x30] sm:$0xff]  ;;  %705 = vst.msk [vmem:[#allocation2 + $0xa8] sm:$0xff] %vm259_vm1, %v672_v18  ;;  %v677_v28 = vadd.f32 %v1024_v24, %v318_v15  ;;  %v556_v29 = vpop.f32.mrf.mxu0  ;;  %v305_v17 = vld [vmem:[#allocation2 + $0x68] sm:$0xff] }
  0xe4   : > { %791 = vst.msk [vmem:[%s1242_s29 + $0x8] sm:$0xff] %vm259_vm1, %v759_v21  ;;  %v764_v31 = vadd.f32 %v1235_v44, %v725_v27  ;;  %v741_v32 = vld [vmem:[#allocation2 + $0xb0] sm:$0xff]  ;;  %694 = vst.msk [vmem:[#allocation2 + $0x50] sm:$0xff] %vm259_vm1, %v661_v23  ;;  %v659_v33 = vadd.f32 %v556_v29, %v300_v20  ;;  %v620_v34 = vpop.f32.mrf.mxu1  ;;  %v321_v22 = vld [vmem:[#allocation2 + $0xe8] sm:$0xff] }
  0xe5   : > { %807 = vst.msk [vmem:[%s1242_s29 + $0x88] sm:$0xff] %vm259_vm1, %v775_v26  ;;  %v780_v36 = vadd.f32 %v1235_v44, %v741_v32  ;;  %v723_v37 = vld [vmem:[#allocation2 + $0x20] sm:$0xff]  ;;  %710 = vst.msk [vmem:[#allocation2 + $0xd0] sm:$0xff] %vm259_vm1, %v677_v28  ;;  %v675_v38 = vadd.f32 %v620_v34, %v316_v25  ;;  %v1009_v39 = vpop.f32.mrf.mxu0 }
  0xe6   : > { %796 = vst.msk [vmem:[%s1242_s29 + $0x30] sm:$0xff] %vm259_vm1, %v764_v31  ;;  %v762_v41 = vadd.f32 %v1235_v44, %v723_v37  ;;  %v739_v42 = vld [vmem:[#allocation2 + $0xa0] sm:$0xff]  ;;  %692 = vst.msk [vmem:[#allocation2 + $0x40] sm:$0xff] %vm259_vm1, %v659_v33  ;;  %v662_v43 = vadd.f32 %v1009_v39, %v303_v30  ;;  %v1025_v45 = vpop.f32.mrf.mxu1 }
  0xe7   : > { %812 = vst.msk [vmem:[%s1242_s29 + $0xb0] sm:$0xff] %vm259_vm1, %v780_v36  ;;  %v778_v47 = vadd.f32 %v1235_v44, %v739_v42  ;;  %v726_v48 = vld [vmem:[#allocation2 + $0x38] sm:$0xff]  ;;  %708 = vst.msk [vmem:[#allocation2 + $0xc0] sm:$0xff] %vm259_vm1, %v675_v38  ;;  %v678_v49 = vadd.f32 %v1025_v45, %v319_v35  ;;  %v559_v50 = vpop.f32.mrf.mxu0 }
  0xe8   : > { %794 = vst.msk [vmem:[%s1242_s29 + $0x20] sm:$0xff] %vm259_vm1, %v762_v41  ;;  %v765_v52 = vadd.f32 %v1235_v44, %v726_v48  ;;  %v742_v53 = vld [vmem:[#allocation2 + $0xb8] sm:$0xff]  ;;  %695 = vst.msk [vmem:[#allocation2 + $0x58] sm:$0xff] %vm259_vm1, %v662_v43  ;;  %v660_v54 = vadd.f32 %v559_v50, %v301_v40  ;;  %v623_v55 = vpop.f32.mrf.mxu1 }
  0xe9   : > { %810 = vst.msk [vmem:[%s1242_s29 + $0xa0] sm:$0xff] %vm259_vm1, %v778_v47  ;;  %v781_v57 = vadd.f32 %v1235_v44, %v742_v53  ;;  %v724_v58 = vld [vmem:[#allocation2 + $0x28] sm:$0xff]  ;;  %711 = vst.msk [vmem:[#allocation2 + $0xd8] sm:$0xff] %vm259_vm1, %v678_v49  ;;  %v676_v59 = vadd.f32 %v623_v55, %v317_v46  ;;  %v1012_v60 = vpop.f32.mrf.mxu0 }
  0xea   : > { %797 = vst.msk [vmem:[%s1242_s29 + $0x38] sm:$0xff] %vm259_vm1, %v765_v52  ;;  %v763_v62 = vadd.f32 %v1235_v44, %v724_v58  ;;  %v740_v63 = vld [vmem:[#allocation2 + $0xa8] sm:$0xff]  ;;  %693 = vst.msk [vmem:[#allocation2 + $0x48] sm:$0xff] %vm259_vm1, %v660_v54  ;;  %v665_v0 = vadd.f32 %v1012_v60, %v306_v51  ;;  %v1028_v1 = vpop.f32.mrf.mxu1 }
  0xeb   : > { %813 = vst.msk [vmem:[%s1242_s29 + $0xb8] sm:$0xff] %vm259_vm1, %v781_v57  ;;  %v779_v3 = vadd.f32 %v1235_v44, %v740_v63  ;;  %v729_v4 = vld [vmem:[#allocation2 + $0x50] sm:$0xff]  ;;  %709 = vst.msk [vmem:[#allocation2 + $0xc8] sm:$0xff] %vm259_vm1, %v676_v59  ;;  %v681_v5 = vadd.f32 %v1028_v1, %v322_v56  ;;  %v572_v6 = vpop.f32.mrf.mxu0 }
  0xec   : > { %795 = vst.msk [vmem:[%s1242_s29 + $0x28] sm:$0xff] %vm259_vm1, %v763_v62  ;;  %v768_v8 = vadd.f32 %v1235_v44, %v729_v4  ;;  %v745_v9 = vld [vmem:[#allocation2 + $0xd0] sm:$0xff]  ;;  %698 = vst.msk [vmem:[#allocation2 + $0x70] sm:$0xff] %vm259_vm1, %v665_v0  ;;  %v663_v10 = vadd.f32 %v572_v6, %v304_v61  ;;  %v636_v11 = vpop.f32.mrf.mxu1 }
  0xed   : > { %811 = vst.msk [vmem:[%s1242_s29 + $0xa8] sm:$0xff] %vm259_vm1, %v779_v3  ;;  %v784_v13 = vadd.f32 %v1235_v44, %v745_v9  ;;  %v727_v14 = vld [vmem:[#allocation2 + $0x40] sm:$0xff]  ;;  %714 = vst.msk [vmem:[#allocation2 + $0xf0] sm:$0xff] %vm259_vm1, %v681_v5  ;;  %v679_v15 = vadd.f32 %v636_v11, %v320_v2  ;;  %v1013_v16 = vpop.f32.mrf.mxu0 }
  0xee   : > { %800 = vst.msk [vmem:[%s1242_s29 + $0x50] sm:$0xff] %vm259_vm1, %v768_v8  ;;  %v766_v18 = vadd.f32 %v1235_v44, %v727_v14  ;;  %v743_v19 = vld [vmem:[#allocation2 + $0xc0] sm:$0xff]  ;;  %696 = vst.msk [vmem:[#allocation2 + $0x60] sm:$0xff] %vm259_vm1, %v663_v10  ;;  %v666_v20 = vadd.f32 %v1013_v16, %v307_v7  ;;  %v1029_v21 = vpop.f32.mrf.mxu1 }
  0xef   : > { %816 = vst.msk [vmem:[%s1242_s29 + $0xd0] sm:$0xff] %vm259_vm1, %v784_v13  ;;  %v782_v23 = vadd.f32 %v1235_v44, %v743_v19  ;;  %v730_v24 = vld [vmem:[#allocation2 + $0x58] sm:$0xff]  ;;  %712 = vst.msk [vmem:[#allocation2 + $0xe0] sm:$0xff] %vm259_vm1, %v679_v15  ;;  %v682_v25 = vadd.f32 %v1029_v21, %v323_v12  ;;  %v575_v26 = vpop.f32.mrf.mxu0 }
  0xf0   : > { %798 = vst.msk [vmem:[%s1242_s29 + $0x40] sm:$0xff] %vm259_vm1, %v766_v18  ;;  %v769_v27 = vadd.f32 %v1235_v44, %v730_v24  ;;  %v746_v28 = vld [vmem:[#allocation2 + $0xd8] sm:$0xff]  ;;  %699 = vst.msk [vmem:[#allocation2 + $0x78] sm:$0xff] %vm259_vm1, %v666_v20  ;;  %v664_v29 = vadd.f32 %v575_v26, %v305_v17  ;;  %v639_v30 = vpop.f32.mrf.mxu1 }
  0xf1   : > { %814 = vst.msk [vmem:[%s1242_s29 + $0xc0] sm:$0xff] %vm259_vm1, %v782_v23  ;;  %v785_v31 = vadd.f32 %v1235_v44, %v746_v28  ;;  %v728_v32 = vld [vmem:[#allocation2 + $0x48] sm:$0xff]  ;;  %715 = vst.msk [vmem:[#allocation2 + $0xf8] sm:$0xff] %vm259_vm1, %v682_v25  ;;  %v680_v33 = vadd.f32 %v639_v30, %v321_v22 }
  0xf2   : > { %801 = vst.msk [vmem:[%s1242_s29 + $0x58] sm:$0xff] %vm259_vm1, %v769_v27  ;;  %v767_v34 = vadd.f32 %v1235_v44, %v728_v32  ;;  %v744_v35 = vld [vmem:[#allocation2 + $0xc8] sm:$0xff]  ;;  %697 = vst.msk [vmem:[#allocation2 + $0x68] sm:$0xff] %vm259_vm1, %v664_v29 }
  0xf3   : > { %817 = vst.msk [vmem:[%s1242_s29 + $0xd8] sm:$0xff] %vm259_vm1, %v785_v31  ;;  %v783_v36 = vadd.f32 %v1235_v44, %v744_v35  ;;  %v733_v37 = vld [vmem:[#allocation2 + $0x70] sm:$0xff]  ;;  %713 = vst.msk [vmem:[#allocation2 + $0xe8] sm:$0xff] %vm259_vm1, %v680_v33 }
  0xf4   : > { %799 = vst.msk [vmem:[%s1242_s29 + $0x48] sm:$0xff] %vm259_vm1, %v767_v34  ;;  %v772_v38 = vadd.f32 %v1235_v44, %v733_v37  ;;  %v749_v39 = vld [vmem:[#allocation2 + $0xf0] sm:$0xff] }
  0xf5   : > { %815 = vst.msk [vmem:[%s1242_s29 + $0xc8] sm:$0xff] %vm259_vm1, %v783_v36  ;;  %v788_v40 = vadd.f32 %v1235_v44, %v749_v39  ;;  %v731_v41 = vld [vmem:[#allocation2 + $0x60] sm:$0xff] }
  0xf6   : > { %804 = vst.msk [vmem:[%s1242_s29 + $0x70] sm:$0xff] %vm259_vm1, %v772_v38  ;;  %v770_v42 = vadd.f32 %v1235_v44, %v731_v41  ;;  %v747_v43 = vld [vmem:[#allocation2 + $0xe0] sm:$0xff] }
  0xf7   : > { %820 = vst.msk [vmem:[%s1242_s29 + $0xf0] sm:$0xff] %vm259_vm1, %v788_v40  ;;  %v786_v45 = vadd.f32 %v1235_v44, %v747_v43  ;;  %v734_v46 = vld [vmem:[#allocation2 + $0x78] sm:$0xff] }
  0xf8   : > { %802 = vst.msk [vmem:[%s1242_s29 + $0x60] sm:$0xff] %vm259_vm1, %v770_v42  ;;  %v773_v47 = vadd.f32 %v1235_v44, %v734_v46  ;;  %v750_v48 = vld [vmem:[#allocation2 + $0xf8] sm:$0xff] }
  0xf9   : > { %818 = vst.msk [vmem:[%s1242_s29 + $0xe0] sm:$0xff] %vm259_vm1, %v786_v45  ;;  %v789_v49 = vadd.f32 %v1235_v44, %v750_v48  ;;  %v732_v50 = vld [vmem:[#allocation2 + $0x68] sm:$0xff] }
  0xfa   : > { %805 = vst.msk [vmem:[%s1242_s29 + $0x78] sm:$0xff] %vm259_vm1, %v773_v47  ;;  %v771_v51 = vadd.f32 %v1235_v44, %v732_v50  ;;  %v748_v52 = vld [vmem:[#allocation2 + $0xe8] sm:$0xff] }
  0xfb   : > { %821 = vst.msk [vmem:[%s1242_s29 + $0xf8] sm:$0xff] %vm259_vm1, %v789_v49  ;;  %v787_v53 = vadd.f32 %v1235_v44, %v748_v52 }
  0xfc   : > { %803 = vst.msk [vmem:[%s1242_s29 + $0x68] sm:$0xff] %vm259_vm1, %v771_v51 }
  0xfd   : > { %819 = vst.msk [vmem:[%s1242_s29 + $0xe8] sm:$0xff] %vm259_vm1, %v787_v53 }
  0xfe PF: > { %s13_s14 = sadd.s32 1, %s1097_s14   ;;  %s1379_s12 = smov %s1093_s13 }
  0xff   : > { %p10_p5 = scmp.ge.s32.totalorder %s13_s14, 4   ;;  %s1380_s13 = smov %s1382_s15 }
 0x101   :  { %12 = sbr.rel (!%p10_p5) target bundleno = 2 (0x2), region = 76 }

// kernel: down_block_forward.14
= control target key start
LH: loop header
LB: loop body
LE: loop exit
PB: predicated region body
PF: predicated region fallthrough
CT: control target
= control target key end

     0   :  { %s1208_s21 = smov 0   ;;  %s1861_s0 = inlined_call_operand.vmem [shape: f32[2,256,16], index: 0, kind: input, shape index: {}]   ;;  %s1862_s1 = inlined_call_operand.vmem [shape: f32[16,4], index: 1, kind: input, shape index: {}]   ;;  %s1863_s2 = inlined_call_operand.vmem [shape: f32[4,16], index: 2, kind: input, shape index: {}]   ;;  %s1864_s3 = inlined_call_operand.vmem [shape: f32[1,16], index: 3, kind: input, shape index: {}]   ;;  %s1865_s4 = inlined_call_operand.vmem [shape: f32[1,16], index: 4, kind: input, shape index: {}]   ;;  %s1866_s5 = inlined_call_operand.vmem [shape: f32[2,256,16], index: 5, kind: input, shape index: {}]   ;;  %s1867_s6 = inlined_call_operand.vmem [shape: f32[2,256,16], index: 6, kind: output, shape index: {}]  }
   0x1 LB: > { %s1093_s22 = sadd.s32 4294967295, %s1169_s21   ;;  %p1097_p0 = scmp.ge.s32.totalorder %s1169_s21, 1  ;;  %s1169_s21 = sphi %s1208_s21, %s16_s21  }
   0x2   : > { %p222_p1 = scmp.lt.s32.totalorder %s1169_s21, 3 }
   0x4   : > { %p223_p2 = pnand %p1097_p0, %p222_p1 }
   0x6   : > { %226 = sbr.rel (%p223_p2) target bundleno = 1010 (0x3f2), region = 44 }
   0xb   : > { %v1219_v0 = vld [vmem:[%s1862_s1 + $0x8] sm:$0xff]  ;;  %p257_p3 = scmp.lt.s32.totalorder %s1093_s22, 1  ;;  %v1171_v1 = vmov 0.0   ;;  %v1225_v2 = vld [vmem:[%s1862_s1] sm:$0xff]  ;;  %vm1172_vm0 = vmmov 0   ;;  %vm309_vm1 = vcmask 130048  }
   0xc   : > { %1127 = vmatprep.subr.mxu0 %v1171_v1  ;;  %1131 = vmatprep.mubr.msk.f32.mxu0 %vm1172_vm0, %v1171_v1  ;;  %vm458_vm2 = vcmask 1043456   ;;  %vm454_vm3 = vcmask 31744  }
   0xd   : > { %1128 = vmatpush3.msra.mxu0 %v1219_v0  ;;  %s1871_s22 = smov (!%p257_p3, %s1093_s22), 1  ;;  %1134 = vmatprep.subr.mxu1 %v1171_v1 }
   0xe   : > { %1129 = vmatprep.subr.mxu0 %v1171_v1  ;;  %1136 = vmatprep.mubr.msk.f32.mxu1 %vm1172_vm0, %v1171_v1  ;;  %s1235_s27 = sshll.u32 %s1871_s22, 8 }
   0xf   : > { %1130 = vmatpush3.msra.mxu0 %v1225_v2  ;;  %s1241_s30 = scalar_lea.vmem %s1861_s0, %s1235_s27  ;;  %s1694_s15 = scalar_lea.vmem %s1866_s5, %s1235_s27 }
  0x10   : > { %1146 = vmatprep.subr.mxu0 %v1171_v1  ;;  %v1245_v3 = vld [vmem:[%s1241_s30] sm:$0xff]  ;;  %v1248_v4 = vld [vmem:[%s1241_s30 + $0x8] sm:$0xff]  ;;  %v1251_v5 = vld [vmem:[%s1241_s30 + $0x10] sm:$0xff]  ;;  %s1746_s18 = scalar_lea.vmem %s1867_s6, %s1235_s27 }
  0x11   : > { %v1254_v6 = vld [vmem:[%s1241_s30 + $0x18] sm:$0xff]  ;;  %v310_v7 = vsel %vm309_vm1, %v1245_v3, 0.0  ;;  %v311_v8 = vsel %vm309_vm1, %v1248_v4, 0.0  ;;  %v313_v9 = vsel %vm309_vm1, %v1251_v5, 0.0  ;;  %v1263_v10 = vld [vmem:[%s1241_s30 + $0x20] sm:$0xff]  ;;  %v1268_v13 = vld [vmem:[%s1241_s30 + $0x28] sm:$0xff] }
  0x12   : > { %v312_v11 = vadd.f32 %v311_v8, %v310_v7  ;;  %v315_v12 = vsel %vm309_vm1, %v1254_v6, 0.0  ;;  %v317_v15 = vsel %vm309_vm1, %v1263_v10, 0.0  ;;  %v1273_v16 = vld [vmem:[%s1241_s30 + $0x30] sm:$0xff]  ;;  %v319_v18 = vsel %vm309_vm1, %v1268_v13, 0.0  ;;  %v1278_v19 = vld [vmem:[%s1241_s30 + $0x38] sm:$0xff]  ;;  %v1283_v22 = vld [vmem:[%s1241_s30 + $0x40] sm:$0xff] }
  0x13   : > { %v321_v21 = vsel %vm309_vm1, %v1273_v16, 0.0  ;;  %v323_v24 = vsel %vm309_vm1, %v1278_v19, 0.0  ;;  %v1288_v25 = vld [vmem:[%s1241_s30 + $0x48] sm:$0xff]  ;;  %v325_v27 = vsel %vm309_vm1, %v1283_v22, 0.0  ;;  %v1293_v28 = vld [vmem:[%s1241_s30 + $0x50] sm:$0xff]  ;;  %v1298_v31 = vld [vmem:[%s1241_s30 + $0x58] sm:$0xff] }
  0x14   : > { %v314_v14 = vadd.f32 %v313_v9, %v312_v11  ;;  %v327_v30 = vsel %vm309_vm1, %v1288_v25, 0.0  ;;  %v329_v33 = vsel %vm309_vm1, %v1293_v28, 0.0  ;;  %v1303_v34 = vld [vmem:[%s1241_s30 + $0x60] sm:$0xff]  ;;  %v331_v36 = vsel %vm309_vm1, %v1298_v31, 0.0  ;;  %v1308_v37 = vld [vmem:[%s1241_s30 + $0x68] sm:$0xff]  ;;  %v1313_v40 = vld [vmem:[%s1241_s30 + $0x70] sm:$0xff] }
  0x15   : > { %v333_v39 = vsel %vm309_vm1, %v1303_v34, 0.0  ;;  %v335_v42 = vsel %vm309_vm1, %v1308_v37, 0.0  ;;  %v1318_v43 = vld [vmem:[%s1241_s30 + $0x78] sm:$0xff]  ;;  %v337_v45 = vsel %vm309_vm1, %v1313_v40, 0.0  ;;  %v1323_v46 = vld [vmem:[%s1241_s30 + $0x80] sm:$0xff]  ;;  %v1328_v49 = vld [vmem:[%s1241_s30 + $0x88] sm:$0xff] }
  0x16   : > { %v316_v17 = vadd.f32 %v315_v12, %v314_v14  ;;  %v339_v48 = vsel %vm309_vm1, %v1318_v43, 0.0  ;;  %v341_v51 = vsel %vm309_vm1, %v1323_v46, 0.0  ;;  %v1333_v52 = vld [vmem:[%s1241_s30 + $0x90] sm:$0xff]  ;;  %v343_v54 = vsel %vm309_vm1, %v1328_v49, 0.0  ;;  %v1338_v55 = vld [vmem:[%s1241_s30 + $0x98] sm:$0xff]  ;;  %v1343_v58 = vld [vmem:[%s1241_s30 + $0xa0] sm:$0xff] }
  0x17   : > { %v345_v57 = vsel %vm309_vm1, %v1333_v52, 0.0  ;;  %v347_v60 = vsel %vm309_vm1, %v1338_v55, 0.0  ;;  %v1348_v61 = vld [vmem:[%s1241_s30 + $0xa8] sm:$0xff]  ;;  %v349_v63 = vsel %vm309_vm1, %v1343_v58, 0.0  ;;  %v1353_v7 = vld [vmem:[%s1241_s30 + $0xb0] sm:$0xff]  ;;  %v1358_v11 = vld [vmem:[%s1241_s30 + $0xb8] sm:$0xff] }
  0x18   : > { %v318_v20 = vadd.f32 %v317_v15, %v316_v17  ;;  %v351_v9 = vsel %vm309_vm1, %v1348_v61, 0.0  ;;  %v353_v14 = vsel %vm309_vm1, %v1353_v7, 0.0  ;;  %v1363_v15 = vld [vmem:[%s1241_s30 + $0xc0] sm:$0xff] }
  0x1a   : > { %v320_v23 = vadd.f32 %v319_v18, %v318_v20  ;;  %v355_v18 = vsel %vm309_vm1, %v1358_v11, 0.0  ;;  %v1368_v20 = vld [vmem:[%s1241_s30 + $0xc8] sm:$0xff] }
  0x1c   : > { %v322_v26 = vadd.f32 %v321_v21, %v320_v23  ;;  %v357_v23 = vsel %vm309_vm1, %v1363_v15, 0.0 }
  0x1e   : > { %v324_v29 = vadd.f32 %v323_v24, %v322_v26  ;;  %v1373_v24 = vld [vmem:[%s1241_s30 + $0xd0] sm:$0xff] }
  0x20   : > { %v326_v32 = vadd.f32 %v325_v27, %v324_v29  ;;  %v359_v27 = vsel %vm309_vm1, %v1368_v20, 0.0  ;;  %v1378_v29 = vld [vmem:[%s1241_s30 + $0xd8] sm:$0xff] }
  0x22   : > { %v328_v35 = vadd.f32 %v327_v30, %v326_v32  ;;  %v361_v32 = vsel %vm309_vm1, %v1373_v24, 0.0 }
  0x24   : > { %v330_v38 = vadd.f32 %v329_v33, %v328_v35  ;;  %v1383_v33 = vld [vmem:[%s1241_s30 + $0xe0] sm:$0xff] }
  0x26   : > { %v332_v41 = vadd.f32 %v331_v36, %v330_v38  ;;  %v363_v36 = vsel %vm309_vm1, %v1378_v29, 0.0  ;;  %v1388_v38 = vld [vmem:[%s1241_s30 + $0xe8] sm:$0xff] }
  0x28   : > { %v334_v44 = vadd.f32 %v333_v39, %v332_v41  ;;  %v365_v41 = vsel %vm309_vm1, %v1383_v33, 0.0 }
  0x2a   : > { %v336_v47 = vadd.f32 %v335_v42, %v334_v44  ;;  %v1393_v42 = vld [vmem:[%s1241_s30 + $0xf0] sm:$0xff] }
  0x2c   : > { %v338_v50 = vadd.f32 %v337_v45, %v336_v47  ;;  %v367_v45 = vsel %vm309_vm1, %v1388_v38, 0.0  ;;  %v1398_v47 = vld [vmem:[%s1241_s30 + $0xf8] sm:$0xff] }
  0x2e   : > { %v340_v53 = vadd.f32 %v339_v48, %v338_v50  ;;  %v369_v50 = vsel %vm309_vm1, %v1393_v42, 0.0 }
  0x30   : > { %v342_v56 = vadd.f32 %v341_v51, %v340_v53  ;;  %v371_v53 = vsel %vm309_vm1, %v1398_v47, 0.0 }
  0x32   : > { %v344_v59 = vadd.f32 %v343_v54, %v342_v56 }
  0x34   : > { %v346_v62 = vadd.f32 %v345_v57, %v344_v59 }
  0x36   : > { %v348_v8 = vadd.f32 %v347_v60, %v346_v62 }
  0x38   : > { %v350_v12 = vadd.f32 %v349_v63, %v348_v8 }
  0x3a   : > { %v352_v17 = vadd.f32 %v351_v9, %v350_v12  ;;  %v306_v9 = vld [vmem:[%s1863_s2] sm:$0xf] }
  0x3b   : > { %1135 = vmatpush3.msk.msra.mxu1 %vm458_vm2, %v306_v9 }
  0x3c   : > { %v354_v21 = vadd.f32 %v353_v14, %v352_v17  ;;  %1139 = vmatprep.subr.mxu1 %v1171_v1 }
  0x3e   : > { %v356_v26 = vadd.f32 %v355_v18, %v354_v21  ;;  %v532_v18 = vlaneseq }
  0x40   : > { %v358_v30 = vadd.f32 %v357_v23, %v356_v26  ;;  %v1417_v21 = vshrl.u32 %v532_v18, 7 }
  0x42   : > { %v360_v35 = vadd.f32 %v359_v27, %v358_v30  ;;  %v534_v27 = vsub.s32 0, %v1417_v21 }
  0x44   : > { %v362_v39 = vadd.f32 %v361_v32, %v360_v35 }
  0x46   : > { %v364_v44 = vadd.f32 %v363_v36, %v362_v39 }
  0x48   : > { %v366_v48 = vadd.f32 %v365_v41, %v364_v44 }
  0x4a   : > { %v368_v51 = vadd.f32 %v367_v45, %v366_v48 }
  0x4c   : > { %v370_v54 = vadd.f32 %v369_v50, %v368_v51 }
  0x4e   : > { %v372_v56 = vadd.f32 %v371_v53, %v370_v54 }
  0x50   : > { %v373_v57 = vrot.slane %v372_v56, 4 }
  0x52   : > { %v374_v59 = vadd.f32 %v373_v57, %v372_v56 }
  0x54   : > { %v375_v60 = vrot.slane %v374_v59, 2 }
  0x56   : > { %v376_v62 = vadd.f32 %v375_v60, %v374_v59 }
  0x58   : > { %v377_v63 = vrot.slane %v376_v62, 1 }
  0x5a   : > { %v378_v8 = vadd.f32 %v377_v63, %v376_v62 }
  0x5c   : > { %1132 = vmatmul.mubr.msk.f32.vlgmr.msra.gmra.mxu0 %vm309_vm1, %v378_v8 }
  0x5d   : > { %1148 = vmatprep.mubr.msk.f32.mxu0 %vm1172_vm0, %v1171_v1  ;;  %1147 = vmatpush3.msk.msra.mxu0 %vm458_vm2, %v306_v9 }
 0x11c   : > { %v448_v12 = vpop.f32.mrf.mxu0 }
 0x11d   : > { %v453_v14 = vmul.f32 0.0009765625, %v448_v12 }
 0x11e   : > { %v1133_v17 = vpop.f32.mrf.mxu0 }
 0x11f   : > { %1137 = vmatmul.mubr.msk.f32.vlgmr.msra.gmra.mxu1 %vm454_vm3, %v453_v14 }
 0x120   : > { %1140 = vmatpush3.msra.mxu1 %v1219_v0  ;;  %1143 = vmatprep.mubr.msk.f32.mxu1 %vm1172_vm0, %v1171_v1 }
 0x121   : > { %1141 = vmatprep.subr.mxu1 %v1171_v1 }
 0x122   : > { %1142 = vmatpush3.msra.mxu1 %v1225_v2 }
 0x1df   : > { %v528_v23 = vpop.f32.mrf.mxu1 }
 0x1e0   : > { %v1422_v30 = vrot.slane %v528_v23, %v534_v27 }
 0x1e1   : > { %v1138_v26 = vpop.f32.mrf.mxu1 }
 0x1e2   : > { %v1426_v0 = vsub.f32 %v1245_v3, %v1422_v30  ;;  %v1430_v1 = vsub.f32 %v1248_v4, %v1422_v30  ;;  %v1434_v2 = vsub.f32 %v1251_v5, %v1422_v30  ;;  %v1438_v32 = vsub.f32 %v1254_v6, %v1422_v30 }
 0x1e3   : > { %v1446_v3 = vsub.f32 %v1263_v10, %v1422_v30  ;;  %v1452_v5 = vsub.f32 %v1268_v13, %v1422_v30  ;;  %v1460_v45 = vsub.f32 %v1273_v16, %v1422_v30  ;;  %v1467_v13 = vsub.f32 %v1278_v19, %v1422_v30 }
 0x1e4   : > { %v568_v35 = vmul.f32 %v1426_v0, %v1426_v0  ;;  %v569_v36 = vmul.f32 %v1430_v1, %v1430_v1  ;;  %v570_v4 = vmul.f32 %v1434_v2, %v1434_v2  ;;  %v571_v6 = vmul.f32 %v1438_v32, %v1438_v32 }
 0x1e5   : > { %v572_v10 = vmul.f32 %v1446_v3, %v1446_v3  ;;  %v573_v51 = vmul.f32 %v1452_v5, %v1452_v5  ;;  %v1474_v16 = vsub.f32 %v1283_v22, %v1422_v30  ;;  %v574_v56 = vmul.f32 %v1460_v45, %v1460_v45 }
 0x1e6   : > { %v600_v39 = vsel %vm309_vm1, %v568_v35, 0.0  ;;  %v601_v41 = vsel %vm309_vm1, %v569_v36, 0.0  ;;  %v603_v48 = vsel %vm309_vm1, %v570_v4, 0.0  ;;  %v605_v53 = vsel %vm309_vm1, %v571_v6, 0.0 }
 0x1e7   : > { %v602_v44 = vadd.f32 %v601_v41, %v600_v39  ;;  %v607_v57 = vsel %vm309_vm1, %v572_v10, 0.0  ;;  %v1481_v19 = vsub.f32 %v1288_v25, %v1422_v30  ;;  %v575_v60 = vmul.f32 %v1467_v13, %v1467_v13 }
 0x1e8   : > { %v609_v62 = vsel %vm309_vm1, %v573_v51, 0.0  ;;  %v1488_v22 = vsub.f32 %v1293_v28, %v1422_v30  ;;  %v576_v8 = vmul.f32 %v1474_v16, %v1474_v16  ;;  %v611_v9 = vsel %vm309_vm1, %v574_v56, 0.0 }
 0x1e9   : > { %v604_v50 = vadd.f32 %v603_v48, %v602_v44  ;;  %v1495_v25 = vsub.f32 %v1298_v31, %v1422_v30  ;;  %v577_v14 = vmul.f32 %v1481_v19, %v1481_v19  ;;  %v613_v17 = vsel %vm309_vm1, %v575_v60, 0.0 }
 0x1ea   : > { %v1502_v28 = vsub.f32 %v1303_v34, %v1422_v30  ;;  %v578_v23 = vmul.f32 %v1488_v22, %v1488_v22  ;;  %v615_v26 = vsel %vm309_vm1, %v576_v8, 0.0  ;;  %v1509_v31 = vsub.f32 %v1308_v37, %v1422_v30 }
 0x1eb   : > { %v606_v54 = vadd.f32 %v605_v53, %v604_v50  ;;  %v579_v36 = vmul.f32 %v1495_v25, %v1495_v25  ;;  %v617_v4 = vsel %vm309_vm1, %v577_v14, 0.0  ;;  %v1516_v34 = vsub.f32 %v1313_v40, %v1422_v30 }
 0x1ec   : > { %v580_v39 = vmul.f32 %v1502_v28, %v1502_v28  ;;  %v619_v41 = vsel %vm309_vm1, %v578_v23, 0.0  ;;  %v1523_v37 = vsub.f32 %v1318_v43, %v1422_v30  ;;  %v581_v10 = vmul.f32 %v1509_v31, %v1509_v31 }
 0x1ed   : > { %v608_v59 = vadd.f32 %v607_v57, %v606_v54  ;;  %v621_v48 = vsel %vm309_vm1, %v579_v36, 0.0  ;;  %v1530_v40 = vsub.f32 %v1323_v46, %v1422_v30  ;;  %v582_v51 = vmul.f32 %v1516_v34, %v1516_v34 }
 0x1ee   : > { %v623_v53 = vsel %vm309_vm1, %v580_v39, 0.0  ;;  %v1537_v43 = vsub.f32 %v1328_v49, %v1422_v30  ;;  %v583_v56 = vmul.f32 %v1523_v37, %v1523_v37  ;;  %v625_v57 = vsel %vm309_vm1, %v581_v10, 0.0 }
 0x1ef   : > { %v610_v63 = vadd.f32 %v609_v62, %v608_v59  ;;  %v1544_v46 = vsub.f32 %v1333_v52, %v1422_v30  ;;  %v584_v60 = vmul.f32 %v1530_v40, %v1530_v40  ;;  %v627_v62 = vsel %vm309_vm1, %v582_v51, 0.0 }
 0x1f0   : > { %v1551_v49 = vsub.f32 %v1338_v55, %v1422_v30  ;;  %v585_v8 = vmul.f32 %v1537_v43, %v1537_v43  ;;  %v1558_v52 = vsub.f32 %v1343_v58, %v1422_v30  ;;  %v1565_v55 = vsub.f32 %v1348_v61, %v1422_v30 }
 0x1f1   : > { %v612_v12 = vadd.f32 %v611_v9, %v610_v63  ;;  %v629_v9 = vsel %vm309_vm1, %v583_v56, 0.0  ;;  %v586_v14 = vmul.f32 %v1544_v46, %v1544_v46  ;;  %v1572_v58 = vsub.f32 %v1353_v7, %v1422_v30 }
 0x1f2   : > { %v587_v23 = vmul.f32 %v1551_v49, %v1551_v49  ;;  %v588_v36 = vmul.f32 %v1558_v52, %v1558_v52  ;;  %v1579_v61 = vsub.f32 %v1358_v11, %v1422_v30  ;;  %v589_v39 = vmul.f32 %v1565_v55, %v1565_v55 }
 0x1f3   : > { %v614_v18 = vadd.f32 %v613_v17, %v612_v12  ;;  %v631_v17 = vsel %vm309_vm1, %v584_v60, 0.0  ;;  %v1586_v7 = vsub.f32 %v1363_v15, %v1422_v30  ;;  %v590_v10 = vmul.f32 %v1572_v58, %v1572_v58 }
 0x1f4   : > { %v1593_v11 = vsub.f32 %v1368_v20, %v1422_v30  ;;  %v591_v51 = vmul.f32 %v1579_v61, %v1579_v61  ;;  %v1600_v15 = vsub.f32 %v1373_v24, %v1422_v30  ;;  %v1607_v20 = vsub.f32 %v1378_v29, %v1422_v30 }
 0x1f5   : > { %v616_v35 = vadd.f32 %v615_v26, %v614_v18  ;;  %v633_v26 = vsel %vm309_vm1, %v585_v8, 0.0  ;;  %v592_v56 = vmul.f32 %v1586_v7, %v1586_v7  ;;  %v1614_v24 = vsub.f32 %v1383_v33, %v1422_v30 }
 0x1f6   : > { %v593_v60 = vmul.f32 %v1593_v11, %v1593_v11  ;;  %v594_v8 = vmul.f32 %v1600_v15, %v1600_v15  ;;  %v1621_v29 = vsub.f32 %v1388_v38, %v1422_v30  ;;  %v1628_v33 = vsub.f32 %v1393_v42, %v1422_v30 }
 0x1f7   : > { %v618_v6 = vadd.f32 %v617_v4, %v616_v35  ;;  %v635_v4 = vsel %vm309_vm1, %v586_v14, 0.0  ;;  %v595_v14 = vmul.f32 %v1607_v20, %v1607_v20  ;;  %v1635_v38 = vsub.f32 %v1398_v47, %v1422_v30 }
 0x1f8   : > { %v598_v42 = vmul.f32 %v1628_v33, %v1628_v33 }
 0x1f9   : > { %v620_v44 = vadd.f32 %v619_v41, %v618_v6  ;;  %v637_v41 = vsel %vm309_vm1, %v587_v23, 0.0  ;;  %v596_v23 = vmul.f32 %v1614_v24, %v1614_v24 }
 0x1fa   : > { %v659_v47 = vsel %vm309_vm1, %v598_v42, 0.0 }
 0x1fb   : > { %v622_v50 = vadd.f32 %v621_v48, %v620_v44  ;;  %v639_v48 = vsel %vm309_vm1, %v588_v36, 0.0  ;;  %v597_v36 = vmul.f32 %v1621_v29, %v1621_v29 }
 0x1fd   : > { %v624_v54 = vadd.f32 %v623_v53, %v622_v50  ;;  %v641_v53 = vsel %vm309_vm1, %v589_v39, 0.0  ;;  %v655_v39 = vsel %vm309_vm1, %v596_v23, 0.0 }
 0x1ff   : > { %v626_v59 = vadd.f32 %v625_v57, %v624_v54  ;;  %v643_v57 = vsel %vm309_vm1, %v590_v10, 0.0  ;;  %v657_v10 = vsel %vm309_vm1, %v597_v36, 0.0 }
 0x201   : > { %v628_v63 = vadd.f32 %v627_v62, %v626_v59  ;;  %v645_v62 = vsel %vm309_vm1, %v591_v51, 0.0 }
 0x203   : > { %v630_v12 = vadd.f32 %v629_v9, %v628_v63  ;;  %v647_v9 = vsel %vm309_vm1, %v592_v56, 0.0 }
 0x205   : > { %v632_v18 = vadd.f32 %v631_v17, %v630_v12  ;;  %v649_v17 = vsel %vm309_vm1, %v593_v60, 0.0 }
 0x207   : > { %v634_v35 = vadd.f32 %v633_v26, %v632_v18  ;;  %v651_v26 = vsel %vm309_vm1, %v594_v8, 0.0 }
 0x209   : > { %v636_v6 = vadd.f32 %v635_v4, %v634_v35  ;;  %v653_v4 = vsel %vm309_vm1, %v595_v14, 0.0 }
 0x20b   : > { %v638_v44 = vadd.f32 %v637_v41, %v636_v6 }
 0x20d   : > { %v640_v50 = vadd.f32 %v639_v48, %v638_v44  ;;  %v599_v44 = vmul.f32 %v1635_v38, %v1635_v38 }
 0x20f   : > { %v642_v54 = vadd.f32 %v641_v53, %v640_v50  ;;  %v661_v50 = vsel %vm309_vm1, %v599_v44, 0.0 }
 0x211   : > { %v644_v59 = vadd.f32 %v643_v57, %v642_v54 }
 0x213   : > { %v646_v63 = vadd.f32 %v645_v62, %v644_v59 }
 0x215   : > { %v648_v12 = vadd.f32 %v647_v9, %v646_v63 }
 0x217   : > { %v650_v18 = vadd.f32 %v649_v17, %v648_v12 }
 0x219   : > { %v652_v35 = vadd.f32 %v651_v26, %v650_v18 }
 0x21b   : > { %v654_v6 = vadd.f32 %v653_v4, %v652_v35 }
 0x21d   : > { %v656_v41 = vadd.f32 %v655_v39, %v654_v6 }
 0x21f   : > { %v658_v48 = vadd.f32 %v657_v10, %v656_v41 }
 0x221   : > { %v660_v30 = vadd.f32 %v659_v47, %v658_v48 }
 0x223   : > { %v662_v51 = vadd.f32 %v661_v50, %v660_v30 }
 0x225   : > { %v663_v53 = vrot.slane %v662_v51, 4 }
 0x227   : > { %v664_v54 = vadd.f32 %v663_v53, %v662_v51 }
 0x229   : > { %v665_v56 = vrot.slane %v664_v54, 2 }
 0x22b   : > { %v666_v57 = vadd.f32 %v665_v56, %v664_v54 }
 0x22d   : > { %v667_v59 = vrot.slane %v666_v57, 1 }
 0x22f   : > { %v668_v60 = vadd.f32 %v667_v59, %v666_v57  ;;  %v1111_v57 = vld [vmem:[%s1865_s4] ss:$0 sm:$0xff] }
 0x231   : > { %1144 = vmatmul.mubr.msk.f32.vlgmr.msra.gmra.mxu1 %vm309_vm1, %v668_v60 }
 0x2f1   : > { %v738_v62 = vpop.f32.mrf.mxu1 }
 0x2f2   : > { %v742_v63 = vmul.f32 0.0009765625, %v738_v62 }
 0x2f3   : > { %v1145_v8 = vpop.f32.mrf.mxu1 }
 0x2f4   : > { %v743_v9 = vadd.f32 1e-05, %v742_v63 }
 0x2f6   : > { %1161 = vrsqrt.f32 %v743_v9 }
 0x303   : > { %v1162_v12 = vpop.eup %1161 }
 0x304   : > { %1149 = vmatmul.mubr.msk.f32.vlgmr.msra.gmra.mxu0 %vm454_vm3, %v1162_v12 }
 0x3c4   : > { %v814_v14 = vpop.f32.mrf.mxu0 }
 0x3c5   : > { %v821_v17 = vrot.slane %v814_v14, %v534_v27 }
 0x3c6   : > { %v1150_v18 = vpop.f32.mrf.mxu0 }
 0x3c7   : > { %v822_v23 = vmul.f32 %v821_v17, %v1426_v0  ;;  %v823_v26 = vmul.f32 %v821_v17, %v1430_v1  ;;  %v824_v35 = vmul.f32 %v821_v17, %v1434_v2  ;;  %v825_v36 = vmul.f32 %v821_v17, %v1438_v32 }
 0x3c8   : > { %v826_v4 = vmul.f32 %v821_v17, %v1446_v3  ;;  %v827_v6 = vmul.f32 %v821_v17, %v1452_v5  ;;  %v828_v42 = vmul.f32 %v821_v17, %v1460_v45  ;;  %v829_v39 = vmul.f32 %v821_v17, %v1467_v13 }
 0x3c9   : > { %v830_v21 = vmul.f32 %v821_v17, %v1474_v16  ;;  %v831_v27 = vmul.f32 %v821_v17, %v1481_v19  ;;  %v832_v0 = vmul.f32 %v821_v17, %v1488_v22  ;;  %v833_v1 = vmul.f32 %v821_v17, %v1495_v25  ;;  %v1110_v22 = vld [vmem:[%s1864_s3] ss:$0 sm:$0xff] }
 0x3ca   : > { %v834_v2 = vmul.f32 %v821_v17, %v1502_v28  ;;  %v835_v32 = vmul.f32 %v821_v17, %v1509_v31  ;;  %v836_v3 = vmul.f32 %v821_v17, %v1516_v34  ;;  %v837_v5 = vmul.f32 %v821_v17, %v1523_v37 }
 0x3cb   : > { %v838_v45 = vmul.f32 %v821_v17, %v1530_v40  ;;  %v839_v13 = vmul.f32 %v821_v17, %v1537_v43  ;;  %v840_v16 = vmul.f32 %v821_v17, %v1544_v46  ;;  %v841_v19 = vmul.f32 %v821_v17, %v1551_v49 }
 0x3cc   : > { %v842_v25 = vmul.f32 %v821_v17, %v1558_v52  ;;  %v843_v28 = vmul.f32 %v821_v17, %v1565_v55  ;;  %v844_v31 = vmul.f32 %v821_v17, %v1572_v58  ;;  %v845_v34 = vmul.f32 %v821_v17, %v1579_v61 }
 0x3cd   : > { %v846_v37 = vmul.f32 %v821_v17, %v1586_v7  ;;  %v847_v40 = vmul.f32 %v821_v17, %v1593_v11  ;;  %v848_v43 = vmul.f32 %v821_v17, %v1600_v15  ;;  %v849_v46 = vmul.f32 %v821_v17, %v1607_v20 }
 0x3ce   : > { %v850_v49 = vmul.f32 %v821_v17, %v1614_v24  ;;  %v851_v41 = vmul.f32 %v821_v17, %v1621_v29  ;;  %v852_v52 = vmul.f32 %v821_v17, %v1628_v33  ;;  %v853_v55 = vmul.f32 %v821_v17, %v1635_v38 }
 0x3cf   : > { %v860_v44 = vmul.f32 %v1110_v22, %v822_v23  ;;  %v861_v58 = vmul.f32 %v1110_v22, %v823_v26  ;;  %v862_v10 = vmul.f32 %v1110_v22, %v824_v35  ;;  %v863_v61 = vmul.f32 %v1110_v22, %v825_v36 }
 0x3d0   : > { %v864_v48 = vmul.f32 %v1110_v22, %v826_v4  ;;  %v865_v7 = vmul.f32 %v1110_v22, %v827_v6  ;;  %v866_v47 = vmul.f32 %v1110_v22, %v828_v42  ;;  %v867_v11 = vmul.f32 %v1110_v22, %v829_v39 }
 0x3d1   : > { %v868_v30 = vmul.f32 %v1110_v22, %v830_v21  ;;  %v869_v15 = vmul.f32 %v1110_v22, %v831_v27  ;;  %v870_v50 = vmul.f32 %v1110_v22, %v832_v0  ;;  %v871_v20 = vmul.f32 %v1110_v22, %v833_v1 }
 0x3d2   : > { %v872_v51 = vmul.f32 %v1110_v22, %v834_v2  ;;  %v873_v24 = vmul.f32 %v1110_v22, %v835_v32  ;;  %v874_v53 = vmul.f32 %v1110_v22, %v836_v3  ;;  %v875_v29 = vmul.f32 %v1110_v22, %v837_v5 }
 0x3d3   : > { %v876_v54 = vmul.f32 %v1110_v22, %v838_v45  ;;  %v877_v33 = vmul.f32 %v1110_v22, %v839_v13  ;;  %v878_v38 = vmul.f32 %v1110_v22, %v840_v16  ;;  %v879_v56 = vmul.f32 %v1110_v22, %v841_v19  ;;  %v930_v16 = vld [vmem:[%s1694_s15] sm:$0xff]  ;;  %v931_v19 = vld [vmem:[%s1694_s15 + $0x8] sm:$0xff] }
 0x3d4   : > { %v880_v59 = vmul.f32 %v1110_v22, %v842_v25  ;;  %v881_v60 = vmul.f32 %v1110_v22, %v843_v28  ;;  %v882_v62 = vmul.f32 %v1110_v22, %v844_v31  ;;  %v883_v63 = vmul.f32 %v1110_v22, %v845_v34  ;;  %v933_v25 = vld [vmem:[%s1694_s15 + $0x18] sm:$0xff] }
 0x3d5   : > { %v884_v8 = vmul.f32 %v1110_v22, %v846_v37  ;;  %v885_v9 = vmul.f32 %v1110_v22, %v847_v40  ;;  %v886_v12 = vmul.f32 %v1110_v22, %v848_v43  ;;  %v887_v14 = vmul.f32 %v1110_v22, %v849_v46  ;;  %v934_v40 = vld [vmem:[%s1694_s15 + $0x20] sm:$0xff]  ;;  %v935_v43 = vld [vmem:[%s1694_s15 + $0x28] sm:$0xff]  ;;  %v936_v46 = vld [vmem:[%s1694_s15 + $0x30] sm:$0xff] }
 0x3d6   : > { %v888_v17 = vmul.f32 %v1110_v22, %v850_v49  ;;  %v889_v18 = vmul.f32 %v1110_v22, %v851_v41  ;;  %v890_v23 = vmul.f32 %v1110_v22, %v852_v52  ;;  %v891_v26 = vmul.f32 %v1110_v22, %v853_v55  ;;  %v932_v22 = vld [vmem:[%s1694_s15 + $0x10] sm:$0xff]  ;;  %v937_v49 = vld [vmem:[%s1694_s15 + $0x38] sm:$0xff] }
 0x3d7   : > { %v898_v35 = vadd.f32 %v1111_v57, %v860_v44  ;;  %v899_v36 = vadd.f32 %v1111_v57, %v861_v58  ;;  %v900_v4 = vadd.f32 %v1111_v57, %v862_v10  ;;  %v901_v6 = vadd.f32 %v1111_v57, %v863_v61  ;;  %v938_v58 = vld [vmem:[%s1694_s15 + $0x40] sm:$0xff]  ;;  %v939_v10 = vld [vmem:[%s1694_s15 + $0x48] sm:$0xff]  ;;  %v940_v61 = vld [vmem:[%s1694_s15 + $0x50] sm:$0xff] }
 0x3d8   : > { %v902_v42 = vadd.f32 %v1111_v57, %v864_v48  ;;  %v903_v39 = vadd.f32 %v1111_v57, %v865_v7  ;;  %v904_v21 = vadd.f32 %v1111_v57, %v866_v47  ;;  %v905_v27 = vadd.f32 %v1111_v57, %v867_v11 }
 0x3d9   : > { %v906_v0 = vadd.f32 %v1111_v57, %v868_v30  ;;  %v907_v1 = vadd.f32 %v1111_v57, %v869_v15  ;;  %v908_v2 = vadd.f32 %v1111_v57, %v870_v50  ;;  %v909_v32 = vadd.f32 %v1111_v57, %v871_v20  ;;  %v941_v30 = vld [vmem:[%s1694_s15 + $0x58] sm:$0xff]  ;;  %v942_v15 = vld [vmem:[%s1694_s15 + $0x60] sm:$0xff]  ;;  %v943_v50 = vld [vmem:[%s1694_s15 + $0x68] sm:$0xff] }
 0x3da   : > { %v1696_v3 = vadd.f32 %v1111_v57, %v872_v51  ;;  %v1698_v5 = vadd.f32 %v1111_v57, %v873_v24  ;;  %v1700_v45 = vadd.f32 %v1111_v57, %v874_v53  ;;  %v1702_v13 = vadd.f32 %v1111_v57, %v875_v29  ;;  %v944_v29 = vld [vmem:[%s1694_s15 + $0x70] sm:$0xff] }
 0x3db   : > { %v1708_v28 = vadd.f32 %v1111_v57, %v876_v54  ;;  %v1710_v31 = vadd.f32 %v1111_v57, %v877_v33  ;;  %v1712_v34 = vadd.f32 %v1111_v57, %v878_v38  ;;  %v1714_v37 = vadd.f32 %v1111_v57, %v879_v56  ;;  %v945_v54 = vld [vmem:[%s1694_s15 + $0x78] sm:$0xff]  ;;  %v946_v33 = vld [vmem:[%s1694_s15 + $0x80] sm:$0xff]  ;;  %v947_v38 = vld [vmem:[%s1694_s15 + $0x88] sm:$0xff] }
 0x3dc   : > { %v1720_v41 = vadd.f32 %v1111_v57, %v880_v59  ;;  %v1722_v52 = vadd.f32 %v1111_v57, %v881_v60  ;;  %v1724_v55 = vadd.f32 %v1111_v57, %v882_v62  ;;  %v1726_v44 = vadd.f32 %v1111_v57, %v883_v63  ;;  %v948_v56 = vld [vmem:[%s1694_s15 + $0x90] sm:$0xff]  ;;  %v949_v59 = vld [vmem:[%s1694_s15 + $0x98] sm:$0xff] }
 0x3dd   : > { %v1731_v48 = vadd.f32 %v1111_v57, %v884_v8  ;;  %v1733_v7 = vadd.f32 %v1111_v57, %v885_v9  ;;  %v1735_v47 = vadd.f32 %v1111_v57, %v886_v12  ;;  %v1737_v11 = vadd.f32 %v1111_v57, %v887_v14  ;;  %v950_v9 = vld [vmem:[%s1694_s15 + $0xa0] sm:$0xff]  ;;  %v951_v12 = vld [vmem:[%s1694_s15 + $0xa8] sm:$0xff] }
 0x3de   : > { %v1748_v20 = vadd.f32 %v1111_v57, %v888_v17  ;;  %v1750_v51 = vadd.f32 %v1111_v57, %v889_v18  ;;  %v1752_v24 = vadd.f32 %v1111_v57, %v890_v23  ;;  %v1754_v53 = vadd.f32 %v1111_v57, %v891_v26  ;;  %v952_v57 = vld [vmem:[%s1694_s15 + $0xb0] sm:$0xff]  ;;  %v953_v26 = vld [vmem:[%s1694_s15 + $0xb8] sm:$0xff] }
 0x3df   : > { %v962_v60 = vadd.f32 %v930_v16, %v898_v35  ;;  %v963_v62 = vadd.f32 %v931_v19, %v899_v36  ;;  %v964_v63 = vadd.f32 %v932_v22, %v900_v4  ;;  %v965_v8 = vadd.f32 %v933_v25, %v901_v6  ;;  %v955_v35 = vld [vmem:[%s1694_s15 + $0xc8] sm:$0xff] }
 0x3e0   : > { %1868 = vst [vmem:[#allocation2_spill] sm:$0xff] %v1754_v53  ;;  %v966_v14 = vadd.f32 %v934_v40, %v902_v42  ;;  %v967_v17 = vadd.f32 %v935_v43, %v903_v39  ;;  %v968_v18 = vadd.f32 %v936_v46, %v904_v21  ;;  %v969_v23 = vadd.f32 %v937_v49, %v905_v27  ;;  %v954_v53 = vld [vmem:[%s1694_s15 + $0xc0] sm:$0xff]  ;;  %v956_v42 = vld [vmem:[%s1694_s15 + $0xd0] sm:$0xff]  ;;  %v957_v39 = vld [vmem:[%s1694_s15 + $0xd8] sm:$0xff] }
 0x3e1   : > { %v970_v36 = vadd.f32 %v938_v58, %v906_v0  ;;  %v971_v4 = vadd.f32 %v939_v10, %v907_v1  ;;  %v972_v6 = vadd.f32 %v940_v61, %v908_v2  ;;  %v973_v16 = vadd.f32 %v941_v30, %v909_v32  ;;  %994 = vst.msk [vmem:[%s1746_s18] sm:$0xff] %vm309_vm1, %v962_v60  ;;  %v958_v21 = vld [vmem:[%s1694_s15 + $0xe0] sm:$0xff]  ;;  %v959_v32 = vld [vmem:[%s1694_s15 + $0xe8] sm:$0xff] }
 0x3e2   : > { %995 = vst.msk [vmem:[%s1746_s18 + $0x8] sm:$0xff] %vm309_vm1, %v963_v62  ;;  %996 = vst.msk [vmem:[%s1746_s18 + $0x10] sm:$0xff] %vm309_vm1, %v964_v63  ;;  %v974_v27 = vadd.f32 %v942_v15, %v1696_v3  ;;  %v975_v0 = vadd.f32 %v943_v50, %v1698_v5  ;;  %v976_v1 = vadd.f32 %v944_v29, %v1700_v45  ;;  %v960_v3 = vld [vmem:[%s1694_s15 + $0xf0] sm:$0xff]  ;;  %v961_v5 = vld [vmem:[%s1694_s15 + $0xf8] sm:$0xff] }
 0x3e3   : > { %997 = vst.msk [vmem:[%s1746_s18 + $0x18] sm:$0xff] %vm309_vm1, %v965_v8  ;;  %v977_v2 = vadd.f32 %v945_v54, %v1702_v13  ;;  %998 = vst.msk [vmem:[%s1746_s18 + $0x20] sm:$0xff] %vm309_vm1, %v966_v14  ;;  %v978_v45 = vadd.f32 %v946_v33, %v1708_v28  ;;  %v979_v19 = vadd.f32 %v947_v38, %v1710_v31 }
 0x3e4   : > { %999 = vst.msk [vmem:[%s1746_s18 + $0x28] sm:$0xff] %vm309_vm1, %v967_v17  ;;  %1000 = vst.msk [vmem:[%s1746_s18 + $0x30] sm:$0xff] %vm309_vm1, %v968_v18  ;;  %v980_v13 = vadd.f32 %v948_v56, %v1712_v34  ;;  %v981_v22 = vadd.f32 %v949_v59, %v1714_v37  ;;  %v982_v25 = vadd.f32 %v950_v9, %v1720_v41 }
 0x3e5   : > { %1001 = vst.msk [vmem:[%s1746_s18 + $0x38] sm:$0xff] %vm309_vm1, %v969_v23  ;;  %1002 = vst.msk [vmem:[%s1746_s18 + $0x40] sm:$0xff] %vm309_vm1, %v970_v36  ;;  %v983_v28 = vadd.f32 %v951_v12, %v1722_v52  ;;  %v984_v31 = vadd.f32 %v952_v57, %v1724_v55  ;;  %v985_v34 = vadd.f32 %v953_v26, %v1726_v44 }
 0x3e6   : > { %1003 = vst.msk [vmem:[%s1746_s18 + $0x48] sm:$0xff] %vm309_vm1, %v971_v4  ;;  %1004 = vst.msk [vmem:[%s1746_s18 + $0x50] sm:$0xff] %vm309_vm1, %v972_v6  ;;  %v986_v37 = vadd.f32 %v954_v53, %v1731_v48  ;;  %v987_v40 = vadd.f32 %v955_v35, %v1733_v7  ;;  %v988_v43 = vadd.f32 %v956_v42, %v1735_v47 }
 0x3e7   : > { %1005 = vst.msk [vmem:[%s1746_s18 + $0x58] sm:$0xff] %vm309_vm1, %v973_v16  ;;  %1006 = vst.msk [vmem:[%s1746_s18 + $0x60] sm:$0xff] %vm309_vm1, %v974_v27  ;;  %v989_v46 = vadd.f32 %v957_v39, %v1737_v11  ;;  %v990_v49 = vadd.f32 %v958_v21, %v1748_v20  ;;  %v991_v41 = vadd.f32 %v959_v32, %v1750_v51  ;;  %v1869_v55 = vld [vmem:[#allocation2_spill] sm:$0xff] }
 0x3e8   : > { %1007 = vst.msk [vmem:[%s1746_s18 + $0x68] sm:$0xff] %vm309_vm1, %v975_v0  ;;  %1008 = vst.msk [vmem:[%s1746_s18 + $0x70] sm:$0xff] %vm309_vm1, %v976_v1  ;;  %v992_v52 = vadd.f32 %v960_v3, %v1752_v24  ;;  %v993_v44 = vadd.f32 %v961_v5, %v1869_v55 }
 0x3e9   : > { %1009 = vst.msk [vmem:[%s1746_s18 + $0x78] sm:$0xff] %vm309_vm1, %v977_v2  ;;  %1010 = vst.msk [vmem:[%s1746_s18 + $0x80] sm:$0xff] %vm309_vm1, %v978_v45 }
 0x3ea   : > { %1011 = vst.msk [vmem:[%s1746_s18 + $0x88] sm:$0xff] %vm309_vm1, %v979_v19  ;;  %1012 = vst.msk [vmem:[%s1746_s18 + $0x90] sm:$0xff] %vm309_vm1, %v980_v13 }
 0x3eb   : > { %1013 = vst.msk [vmem:[%s1746_s18 + $0x98] sm:$0xff] %vm309_vm1, %v981_v22  ;;  %1014 = vst.msk [vmem:[%s1746_s18 + $0xa0] sm:$0xff] %vm309_vm1, %v982_v25 }
 0x3ec   : > { %1015 = vst.msk [vmem:[%s1746_s18 + $0xa8] sm:$0xff] %vm309_vm1, %v983_v28  ;;  %1016 = vst.msk [vmem:[%s1746_s18 + $0xb0] sm:$0xff] %vm309_vm1, %v984_v31 }
 0x3ed   : > { %1017 = vst.msk [vmem:[%s1746_s18 + $0xb8] sm:$0xff] %vm309_vm1, %v985_v34  ;;  %1018 = vst.msk [vmem:[%s1746_s18 + $0xc0] sm:$0xff] %vm309_vm1, %v986_v37 }
 0x3ee   : > { %1019 = vst.msk [vmem:[%s1746_s18 + $0xc8] sm:$0xff] %vm309_vm1, %v987_v40  ;;  %1020 = vst.msk [vmem:[%s1746_s18 + $0xd0] sm:$0xff] %vm309_vm1, %v988_v43 }
 0x3ef   : > { %1021 = vst.msk [vmem:[%s1746_s18 + $0xd8] sm:$0xff] %vm309_vm1, %v989_v46  ;;  %1022 = vst.msk [vmem:[%s1746_s18 + $0xe0] sm:$0xff] %vm309_vm1, %v990_v49 }
 0x3f0   : > { %1023 = vst.msk [vmem:[%s1746_s18 + $0xe8] sm:$0xff] %vm309_vm1, %v991_v41  ;;  %1024 = vst.msk [vmem:[%s1746_s18 + $0xf0] sm:$0xff] %vm309_vm1, %v992_v52 }
 0x3f1   : > { %1025 = vst.msk [vmem:[%s1746_s18 + $0xf8] sm:$0xff] %vm309_vm1, %v993_v44 }
 0x3f2 PF: > { %s16_s21 = sadd.s32 1, %s1169_s21  }
 0x3f3   : > { %p13_p4 = scmp.ge.s32.totalorder %s16_s21, 4  }
 0x3f5   :  { %15 = sbr.rel (!%p13_p4) target bundleno = 1 (0x1), region = 77 }

// kernel: down_block_forward.19
= control target key start
LH: loop header
LB: loop body
LE: loop exit
PB: predicated region body
PF: predicated region fallthrough
CT: control target
= control target key end

     0   :  { %9 = vsyncpa [#allocation3], 0  ;;  %s1426_s0 = inlined_call_operand.vmem [shape: bf16[2,18,9,16], index: 0, kind: input, shape index: {}]   ;;  %s1427_s1 = inlined_call_operand.vmem [shape: bf16[2,18,9,16], index: 1, kind: input, shape index: {}]   ;;  %s1428_s2 = inlined_call_operand.vmem [shape: bf16[9,16,16], index: 2, kind: input, shape index: {}]   ;;  %s1429_s3 = inlined_call_operand.vmem [shape: f32[1,16], index: 3, kind: input, shape index: {}]   ;;  %s1430_s4 = inlined_call_operand.hbm [shape: f32[2,8,8,16], index: 4, kind: output, shape index: {}]  }
   0x1   :  { %11 = vsyncpa [#allocation3 + $0x1], 0  ;;  %s1208_s15 = smov 0   ;;  %s1210_s16 = smov 0  }
   0x2   :  { %s1212_s17 = smov 0   ;;  %s1214_s18 = smov 0  }
   0x3   :  { %s1216_s19 = smov 0   ;;  %s1218_s20 = smov 0  }
   0x4   :  { %s1220_s21 = smov 0   ;;  %s1222_s22 = smov 0  }
   0x5 LB: > { %s870_s23 = sadd.s32 4294967295, %s1178_s22   ;;  %s871_s24 = sadd.s32 4294967294, %s1178_s22   ;;  %s1178_s22 = sphi %s1222_s22, %s17_s22   ;;  %s1174_s21 = sphi %s1220_s21, %s1442_s21   ;;  %s1170_s20 = sphi %s1218_s20, %s1441_s20   ;;  %s1166_s19 = sphi %s1216_s19, %s1440_s19   ;;  %s1162_s18 = sphi %s1214_s18, %s1439_s18   ;;  %s1158_s17 = sphi %s1212_s17, %s1438_s17   ;;  %s1154_s16 = sphi %s1210_s16, %s1437_s16   ;;  %s1150_s15 = sphi %s1208_s15, %s1436_s15  }
   0x6   : > { %s26_s25 = sadd.s32 1, %s1170_s20  ;;  %s29_s26 = sadd.s32 1, %s1174_s21 }
   0x7   : > { %p27_p0 = scmp.ge.s32.totalorder %s26_s25, 8  ;;  %p142_p1 = scmp.ne.s32.totalorder %s1158_s17, %s1154_s16 }
   0x8   : > { %p143_p2 = scmp.eq.s32.totalorder %s870_s23, 15  ;;  %p148_p5 = scmp.ne.s32.totalorder %s1154_s16, %s1150_s15 }
   0x9   : > { %s1444_s25 = smov (%p27_p0, %s26_s25), 0  ;;  %s1446_s26 = smov (!%p27_p0, %s29_s26), %s1174_s21 }
   0xa   : > { %s128_s27 = ssub.s32 %s1170_s20, %s1444_s25  ;;  %p1259_p3 = por %p143_p2, %p142_p1 }
   0xb   : > { %p31_p4 = scmp.ge.s32.totalorder %s1446_s26, 2  ;;  %p149_p6 = scmp.eq.s32.totalorder %s871_s24, 15 }
   0xc   : > { %p874_p7 = scmp.ge.s32.totalorder %s1178_s22, 1  ;;  %p189_p9 = scmp.lt.s32.totalorder %s1178_s22, 17 }
   0xd   : > { %s1448_s26 = smov (%p31_p4, %s1446_s26), 0  ;;  %p1268_p8 = por %p149_p6, %p148_p5 }
   0xe   : > { %1433 = sst [smem:[#allocation5_spill]] %s1448_s26  ;;  %s127_s30 = ssub.s32 %s1174_s21, %s1448_s26 }
   0xf   : > { %s132_s5 = sadd.s32 1, %s1158_s17  ;;  %s129_s6 = sor.u32 %s128_s27, %s127_s30 }
  0x10   : > { %p190_p10 = pnand %p874_p7, %p189_p9  ;;  %p130_p11 = scmp.eq.s32.totalorder %s129_s6, 0 }
  0x11   : > { %p220_p12 = scmp.lt.s32.totalorder (!%p190_p10), %s1166_s19, 1  ;;  %s926_s14 = sshll.u32 (!%p190_p10), %s1162_s18, 4 }
  0x12   : > { %s1277_s7 = scalar_select %p130_p11, %s1158_s17, %s132_s5  }
  0x13   : > { %193 = sbr.rel (%p190_p10) target bundleno = 275 (0x113), region = 36  ;;  %s921_s11 = sshll.u32 (!%p190_p10), %s1166_s19, 3 }
  0x14   : > { %s1182_s8 = smov (!%p190_p10), [#allocation2]  }
  0x18   : > { %v1074_v0 = vld [vmem:[%s1428_s2 + $0x8] sm:$0xff]   ;;  %v1180_v1 = vmov 0.0   ;;  %v1075_v2 = vld [vmem:[%s1428_s2] sm:$0xff]   ;;  %vm1181_vm0 = vmmov 0   ;;  %s221_s12 = scalar_select %p220_p12, %s1166_s19, 1  ;;  %v1077_v3 = vld [vmem:[%s1428_s2 + $0x10] sm:$0xff]  }
  0x19   : > { %946 = vmatprep.subr.bf16.mxu0 %v1180_v1  ;;  %952 = vmatprep.subr.bf16.mxu1 %v1180_v1  ;;  %vm257_vm1 = vcmask 130048   ;;  %v1078_v4 = vld [vmem:[%s1428_s2 + $0x18] sm:$0xff]   ;;  %v1080_v16 = vld [vmem:[%s1428_s2 + $0x20] sm:$0xff]   ;;  %v1081_v17 = vld [vmem:[%s1428_s2 + $0x28] sm:$0xff]  }
  0x1a   : > { %947 = vmatpush3.bf16.msra.mxu0 %v1074_v0  ;;  %948 = vmatprep.mubr.msk.bf16.mxu0 %vm1181_vm0, %v1180_v1  ;;  %s1000_s13 = smul.u32 144, %s221_s12  ;;  %v1082_v22 = vld [vmem:[%s1428_s2 + $0x30] sm:$0xff]   ;;  %v1083_v23 = vld [vmem:[%s1428_s2 + $0x38] sm:$0xff]   ;;  %v1085_v30 = vld [vmem:[%s1428_s2 + $0x40] sm:$0xff]  }
  0x1b   : > { %953 = vmatpush3.bf16.msra.mxu1 %v1075_v2  ;;  %954 = vmatprep.mubr.msk.bf16.mxu1 %vm1181_vm0, %v1180_v1 }
  0x1c   : > { %958 = vmatprep.subr.bf16.mxu0 %v1180_v1  ;;  %964 = vmatprep.subr.bf16.mxu1 %v1180_v1  ;;  %s224_s5 = scalar_lea.vmem %s1426_s0, %s1000_s13  ;;  %s229_s9 = scalar_lea.vmem %s1427_s1, %s1000_s13 }
  0x1d   : > { %s1308_s26 = scalar_lea.vmem %s224_s5, %s926_s14  ;;  %s1310_s12 = scalar_lea.vmem %s229_s9, %s926_s14 }
  0x1e   : > { %v243_v5 = vld [vmem:[%s1310_s12] sm:$0xf]  ;;  %v236_v7 = vld [vmem:[%s1308_s26 + $0x4] sm:$0x1]  ;;  %v237_v9 = vld [vmem:[%s1308_s26 + $0x8] sm:$0xf] }
  0x1f   : > { %v235_v6 = vld [vmem:[%s1308_s26] sm:$0xf]  ;;  %949 = vmatmul.mubr.msk.bf16.vlgmr.msra.gmra.mxu0 %vm257_vm1, %v243_v5  ;;  %v238_v10 = vld [vmem:[%s1308_s26 + $0xc] sm:$0x1]  ;;  %v244_v24 = vld [vmem:[%s1310_s12 + $0x8] sm:$0xf] }
  0x20   : > { %955 = vmatmul.mubr.msk.bf16.vlgmr.msra.gmra.mxu1 %vm257_vm1, %v235_v6  ;;  %v890_v8 = vcombine.low %v235_v6, %v236_v7  ;;  %959 = vmatpush3.bf16.msra.mxu0 %v1077_v3  ;;  %v903_v11 = vcombine.low %v237_v9, %v238_v10  ;;  %v239_v25 = vld [vmem:[%s1308_s26 + $0x10] sm:$0xf]  ;;  %v240_v26 = vld [vmem:[%s1308_s26 + $0x14] sm:$0x1]  ;;  %s217_s26 = sand.u32 1, %s1154_s16   ;;  %s1090_s9 = sshll.u32 %s1182_s8, 4  ;;  %s1091_s9 = int_to_ptr.vmem [resolvable:$false] %s1090_s9 }
  0x21   : > { %965 = vmatpush3.bf16.msra.mxu1 %v1078_v4  ;;  %960 = vmatprep.mubr.msk.bf16.mxu0 %vm1181_vm0, %v1180_v1  ;;  %v916_v27 = vcombine.low %v239_v25, %v240_v26  ;;  %v245_v29 = vld [vmem:[%s1310_s12 + $0x10] sm:$0xf]  ;;  %s875_s10 = sshll.u32 %s217_s26, 3  ;;  %s778_s12 = sadd.s32 %s1162_s18, %s921_s11  ;;  %v919_v10 = vld [vmem:[%s1429_s3] ss:$0 sm:$0xff] }
  0x22   : > { %v359_v12 = vshrl.u32 %v890_v8, 16  ;;  %v361_v13 = vshll.u32 %v890_v8, 16  ;;  %966 = vmatprep.mubr.msk.bf16.mxu1 %vm1181_vm0, %v1180_v1  ;;  %970 = vmatprep.subr.bf16.mxu0 %v1180_v1  ;;  %v532_v15 = vshll.u32 %v903_v11, 16  ;;  %v530_v19 = vshrl.u32 %v903_v11, 16  ;;  %s922_s23 = sshll.u32 %s778_s12, 7  ;;  %s219_s24 = scalar_lea.vmem [#allocation2], %s875_s10 }
  0x23   : > { %976 = vmatprep.subr.bf16.mxu1 %v1180_v1  ;;  %v703_v28 = vshll.u32 %v916_v27, 16  ;;  %v701_v31 = vshrl.u32 %v916_v27, 16  ;;  %s782_s27 = sshll.u32 %s219_s24, 4  ;;  %s1373_s5 = scalar_lea.hbm %s1430_s4, %s922_s23  ;;  %s1375_s27 = int_to_ptr.vmem [resolvable:$true] %s782_s27 }
  0x24   : > { %v363_v14 = vrot.slane %v361_v13, 1  ;;  %v534_v20 = vrot.slane %v532_v15, 1  ;;  %s767_s18 = scalar_lea.sflag [#allocation3], %s217_s26  ;;  %s1086_s6 = scalar_lea.vmem %s1375_s27, 128 }
  0x25   : > { %v705_v32 = vrot.slane %v703_v28, 1  ;;  %p1087_p13 = scmp.ne.s32.totalorder %s1375_s27, %s1086_s6  ;;  %s1092_s10 = scalar_lea.vmem %s1091_s9, 256 }
  0x26   : > { %v364_v18 = vor.u32 %v363_v14, %v359_v12  ;;  %v535_v21 = vor.u32 %v534_v20, %v530_v19  ;;  %p1093_p2 = scmp.lt.s32.totalorder %s1375_s27, %s1091_s9  ;;  %p1094_p4 = scmp.lt.s32.totalorder %s1092_s10, %s1086_s6 }
  0x27   : > { %v706_v33 = vor.u32 %v705_v32, %v701_v31  ;;  %p1088_p0 = pnand %p1087_p13, %p1259_p3 }
  0x28   : > { %961 = vmatmul.mubr.msk.bf16.vlgmr.msra.gmra.mxu0 %vm257_vm1, %v364_v18  ;;  %967 = vmatmul.mubr.msk.bf16.vlgmr.msra.gmra.mxu1 %vm257_vm1, %v237_v9  ;;  %p1095_p5 = por %p1094_p4, %p1093_p2 }
  0x29   : > { %971 = vmatpush3.bf16.msra.mxu0 %v1080_v16  ;;  %977 = vmatpush3.bf16.msra.mxu1 %v1081_v17  ;;  %p1089_p1 = pneg %p1088_p0 }
  0x2a   : > { %972 = vmatprep.mubr.msk.bf16.mxu0 %vm1181_vm0, %v1180_v1  ;;  %978 = vmatprep.mubr.msk.bf16.mxu1 %vm1181_vm0, %v1180_v1 }
  0x2b   : > { %982 = vmatprep.subr.bf16.mxu0 %v1180_v1  ;;  %988 = vmatprep.subr.bf16.mxu1 %v1180_v1  ;;  %p1096_p6 = pnand %p1095_p5, %p1089_p1 }
  0x30   : > { %973 = vmatmul.mubr.msk.bf16.vlgmr.msra.gmra.mxu0 %vm257_vm1, %v244_v24  ;;  %979 = vmatmul.mubr.msk.bf16.vlgmr.msra.gmra.mxu1 %vm257_vm1, %v535_v21 }
  0x31   : > { %983 = vmatpush3.bf16.msra.mxu0 %v1082_v22  ;;  %989 = vmatpush3.bf16.msra.mxu1 %v1083_v23 }
  0x32   : > { %984 = vmatprep.mubr.msk.bf16.mxu0 %vm1181_vm0, %v1180_v1  ;;  %990 = vmatprep.mubr.msk.bf16.mxu1 %vm1181_vm0, %v1180_v1 }
  0x33   : > { %994 = vmatprep.subr.bf16.mxu0 %v1180_v1 }
  0x38   : > { %985 = vmatmul.mubr.msk.bf16.vlgmr.msra.gmra.mxu0 %vm257_vm1, %v239_v25  ;;  %991 = vmatmul.mubr.msk.bf16.vlgmr.msra.gmra.mxu1 %vm257_vm1, %v245_v29 }
  0x39   : > { %995 = vmatpush3.bf16.msra.mxu0 %v1085_v30  ;;  %996 = vmatprep.mubr.msk.bf16.mxu0 %vm1181_vm0, %v1180_v1 }
  0x40   : > { %997 = vmatmul.mubr.msk.bf16.vlgmr.msra.gmra.mxu0 %vm257_vm1, %v706_v33 }
  0xdf   : > { %v295_v34 = vpop.f32.mrf.mxu0 }
  0xe0   : > { %v344_v35 = vpop.f32.mrf.mxu1 }
  0xe1   : > { %v950_v36 = vpop.f32.mrf.mxu0  ;;  %v345_v48 = vadd.f32 %v344_v35, %v295_v34 }
  0xe2   : > { %v956_v37 = vpop.f32.mrf.mxu1 }
  0xe3   : > { %v298_v38 = vpop.f32.mrf.mxu0 }
  0xe4   : > { %v347_v39 = vpop.f32.mrf.mxu1 }
  0xe5   : > { %v951_v40 = vpop.f32.mrf.mxu0 }
  0xe6   : > { %v957_v41 = vpop.f32.mrf.mxu1 }
  0xe8   : > { %v408_v42 = vpop.f32.mrf.mxu0  ;;  %v461_v43 = vpop.f32.mrf.mxu1 }
  0xe9   : > { %v414_v51 = vadd.f32 %v408_v42, %v345_v48 }
  0xea   : > { %v962_v44 = vpop.f32.mrf.mxu0  ;;  %v968_v45 = vpop.f32.mrf.mxu1 }
  0xeb   : > { %v467_v56 = vadd.f32 %v461_v43, %v414_v51 }
  0xec   : > { %v411_v46 = vpop.f32.mrf.mxu0  ;;  %v464_v47 = vpop.f32.mrf.mxu1 }
  0xee   : > { %v963_v49 = vpop.f32.mrf.mxu0  ;;  %v969_v50 = vpop.f32.mrf.mxu1 }
  0xf0   : > { %v514_v52 = vpop.f32.mrf.mxu0  ;;  %v579_v53 = vpop.f32.mrf.mxu1 }
  0xf1   : > { %v520_v59 = vadd.f32 %v514_v52, %v467_v56 }
  0xf2   : > { %v974_v54 = vpop.f32.mrf.mxu0  ;;  %v980_v55 = vpop.f32.mrf.mxu1 }
  0xf3   : > { %v585_v0 = vadd.f32 %v579_v53, %v520_v59 }
  0xf4   : > { %v517_v57 = vpop.f32.mrf.mxu0  ;;  %v582_v58 = vpop.f32.mrf.mxu1 }
  0xf6   : > { %v975_v60 = vpop.f32.mrf.mxu0  ;;  %v981_v61 = vpop.f32.mrf.mxu1 }
  0xf8   : > { %v632_v62 = vpop.f32.mrf.mxu0  ;;  %v685_v63 = vpop.f32.mrf.mxu1 }
  0xf9   : > { %v638_v3 = vadd.f32 %v632_v62, %v585_v0 }
  0xfa   : > { %v986_v1 = vpop.f32.mrf.mxu0  ;;  %v992_v2 = vpop.f32.mrf.mxu1 }
  0xfb   : > { %v691_v8 = vadd.f32 %v685_v63, %v638_v3 }
  0xfc   : > { %v635_v4 = vpop.f32.mrf.mxu0  ;;  %v688_v5 = vpop.f32.mrf.mxu1 }
  0xfe   : > { %v987_v6 = vpop.f32.mrf.mxu0  ;;  %v993_v7 = vpop.f32.mrf.mxu1 }
 0x100   : > { %v750_v9 = vpop.f32.mrf.mxu0 }
 0x101   : > { %v756_v11 = vadd.f32 %v750_v9, %v691_v8 }
 0x102   : > { %v998_v12 = vpop.f32.mrf.mxu0 }
 0x103   : > { %v764_v13 = vadd.f32 %v919_v10, %v756_v11 }
 0x104   : > { %v753_v14 = vpop.f32.mrf.mxu0 }
 0x105   : > { %765 = vst.msk [vmem:[%s219_s24] sm:$0xff] %vm257_vm1, %v764_v13 }
 0x106   : > { %v999_v15 = vpop.f32.mrf.mxu0 }
 0x107   : > { %1099 = shalt.err (!%p1096_p6)
}
 0x108   : > { %s1100_s11 = scalar_lea.hbm %s1373_s5, 128  ;;  %s1104_s13 = scalar_lea.hbm %s1430_s4, 2048 }
 0x109   : > { %p1101_p7 = scmp.ne.s32.totalorder %s1373_s5, %s1100_s11  ;;  %p1105_p11 = scmp.lt.s32.totalorder %s1373_s5, %s1430_s4 }
 0x10a   : > { %p1106_p12 = scmp.lt.s32.totalorder %s1104_s13, %s1100_s11 }
 0x10b   : > { %p1102_p9 = pnand %p1101_p7, %p1259_p3 }
 0x10c   : > { %p1107_p13 = por %p1106_p12, %p1105_p11 }
 0x10d   : > { %p1103_p10 = pneg %p1102_p9 }
 0x10f   : > { %p1108_p0 = pnand %p1107_p13, %p1103_p10 }
 0x111   : > { %1111 = shalt.err (!%p1108_p0)
}
 0x112   : > { %1001 = dma.vmem_to_hbm [thread:$0]  (%p1259_p3), %s1375_s27, 128, %s1373_s5, %s767_s18  }
 0x113 PF: > { %p1007_p1 = scmp.ge.s32.totalorder %s1178_s22, 2  ;;  %s794_s24 = sand.u32 1, %s1150_s15  }
 0x114   : > { %s795_s19 = scalar_lea.sflag [#allocation3], %s794_s24 }
 0x115   : > { %p1004_p2 = pnand %p1007_p1, %p1268_p8 }
 0x117   : > { %p1005_p4 = pneg %p1004_p2 }
 0x119   : > { %1145 = dma.done.wait (%p1005_p4), %s795_s19, 128  }
 0x11a   : > { %1147 = vsyncadd (%p1005_p4), %s795_s19, 4294967168  ;;  %s17_s22 = sadd.s32 1, %s1178_s22   ;;  %s1435_s28 = sld [smem:[#allocation5_spill]] }
 0x11b   : > { %p14_p5 = scmp.ge.s32.totalorder %s17_s22, 18   ;;  %s1436_s15 = smov %s1154_s16 }
 0x11c   : > { %s1437_s16 = smov %s1158_s17  ;;  %s1438_s17 = smov %s1277_s7 }
 0x11d   : > { %s1439_s18 = smov %s1170_s20  ;;  %s1440_s19 = smov %s1174_s21 }
 0x11e   : > { %s1441_s20 = smov %s1444_s25  ;;  %16 = sbr.rel (!%p14_p5) target bundleno = 5 (0x5), region = 84 }
 0x120   : > { %s1442_s21 = smov %s1435_s28 }
 0x123   :  { %800 = vsyncpa [#allocation3], 1 }
 0x124   :  { %802 = vsyncpa [#allocation3 + $0x1], 1 }

</bundles_post_ra>
